<compile_context>
chip_gen: v7x
topology: tpu7x:2x2x1
jax: 0.10.0
libtpu: 0.0.40
codegen_flags: <defaults>
</compile_context>

<pallas_src>
import functools

import jax
import jax.numpy as jnp
from jax.experimental import pallas as pl
from jax.experimental.pallas import tpu as pltpu

LANE = 128


def _rup(n, m):
    return ((n + m - 1) // m) * m


def _pad2(a, rows, cols):
    r, c = a.shape
    return jnp.pad(a, ((0, rows - r), (0, cols - c)))


def autoencoder_kernel(x_ref,
                       w1_ref, b1_ref,
                       w2_ref, b2_ref,
                       w3_ref, b3_ref,
                       w4_ref, b4_ref,
                       out_ref):
    """One tm-row batch tile through encoder + decoder.

    encoder: relu(x @ W1 + b1) -> relu(. @ W2 + b2)
    decoder: relu(. @ W3 + b3) -> sigmoid(. @ W4 + b4)

    Matmul inputs are bf16, accumulation + bias/ReLU/sigmoid are f32.
    Zero-padded hidden/bottleneck lanes contribute exact zeros, so results on
    the real columns are unchanged.
    """
    bf16, f32 = jnp.bfloat16, jnp.float32

    x = x_ref[...]                                                   # (tm, 784) bf16

    h1 = jnp.dot(x, w1_ref[...], preferred_element_type=f32) + b1_ref[...]
    h1 = jnp.maximum(h1, 0.0)

    z = jnp.dot(h1.astype(bf16), w2_ref[...], preferred_element_type=f32) + b2_ref[...]
    z = jnp.maximum(z, 0.0)

    h2 = jnp.dot(z.astype(bf16), w3_ref[...], preferred_element_type=f32) + b3_ref[...]
    h2 = jnp.maximum(h2, 0.0)

    logits = jnp.dot(h2.astype(bf16), w4_ref[...], preferred_element_type=f32) + b4_ref[...]

    # sigmoid(x) = 1 / (1 + exp(-x)); approx reciprocal keeps the divide on
    # the EUP slot (output is bf16 anyway, so the approximation is lossless).
    sig = pl.reciprocal(1.0 + jnp.exp(-logits), approx=True)
    out_ref[...] = sig.astype(out_ref.dtype)


def prepare_params(w1, b1, w2, b2, w3, b3, w4, b4):
    """One-time padding + casting of the parameters (hoisted out of the
    per-call path). Hidden/bottleneck dims are lane-padded (392->512, 8->128);
    the 784 input/output dims stay unpadded. Weights bf16, biases f32."""
    n_in, n_hid = w1.shape
    n_bot = w2.shape[1]
    n_out = w4.shape[1]
    p_hid = _rup(n_hid, LANE)   # 392 -> 512
    p_bot = _rup(n_bot, LANE)   # 8   -> 128
    bf16, f32 = jnp.bfloat16, jnp.float32
    return (
        _pad2(w1, n_in, p_hid).astype(bf16),
        _pad2(b1, 1, p_hid).astype(f32),
        _pad2(w2, p_hid, p_bot).astype(bf16),
        _pad2(b2, 1, p_bot).astype(f32),
        _pad2(w3, p_bot, p_hid).astype(bf16),
        _pad2(b3, 1, p_hid).astype(f32),
        _pad2(w4, p_hid, n_out).astype(bf16),
        _pad2(b4, 1, n_out).astype(f32),
    )


@functools.partial(jax.jit, static_argnames=("tm",))
def autoencoder_forward(x, w1, b1, w2, b2, w3, b3, w4, b4, *, tm=None):
    """x: (B, 784), ideally already bf16. Params from prepare_params().
    Returns (B, 784) bf16 reconstruction (upcast outside if f32 is needed)."""
    B, n_in = x.shape
    p_hid = w1.shape[1]          # 512
    p_bot = w2.shape[1]          # 128
    n_out = w4.shape[1]          # 784
    bf16, f32 = jnp.bfloat16, jnp.float32

    if x.dtype != bf16:          # prefer feeding bf16 to skip this extra pass
        x = x.astype(bf16)

    pb = _rup(B, 8)
    if tm is None:
        tm = min(512, pb)        # v5e/v6e default; pass tm=128 on v7x for small B
    pb = _rup(pb, tm)
    if pb != B:
        x = jnp.pad(x, ((0, pb - B), (0, 0)))
    grid = (pb // tm,)

    const = lambda i: (0, 0)     # weights/biases: same block every step -> VMEM-resident

    flops = 2 * pb * (n_in * p_hid + p_hid * p_bot + p_bot * p_hid + p_hid * n_out)
    param_bytes = sum(int(a.size) * a.dtype.itemsize
                      for a in (w1, b1, w2, b2, w3, b3, w4, b4))
    bytes_accessed = pb * n_in * 2 + param_bytes + pb * n_out * 2

    out = pl.pallas_call(
        autoencoder_kernel,
        out_shape=jax.ShapeDtypeStruct((pb, n_out), bf16),
        grid=grid,
        in_specs=[
            pl.BlockSpec((tm, n_in), lambda i: (i, 0)),   # x tile (streamed)
            pl.BlockSpec((n_in, p_hid), const),           # W1
            pl.BlockSpec((1, p_hid), const),              # b1
            pl.BlockSpec((p_hid, p_bot), const),          # W2
            pl.BlockSpec((1, p_bot), const),              # b2
            pl.BlockSpec((p_bot, p_hid), const),          # W3
            pl.BlockSpec((1, p_hid), const),              # b3
            pl.BlockSpec((p_hid, n_out), const),          # W4
            pl.BlockSpec((1, n_out), const),              # b4
        ],
        out_specs=pl.BlockSpec((tm, n_out), lambda i: (i, 0)),
        compiler_params=pltpu.CompilerParams(
            dimension_semantics=("parallel",),
            vmem_limit_bytes=32 << 20,
        ),
        cost_estimate=pl.CostEstimate(
            flops=flops,
            transcendentals=2 * pb * n_out,   # exp + reciprocal per output
            bytes_accessed=bytes_accessed,
        ),
    )(x, w1, b1, w2, b2, w3, b3, w4, b4)

    if pb != B:
        out = out[:B]
    return out


def init_params(key, n_input=784, n_bottleneck=8, n_output=784):
    """Mimics torch.nn.Linear's U(-1/sqrt(fan_in), +1/sqrt(fan_in)) init.
    Weights stored transposed to (in_features, out_features); biases as
    (1, out_features)."""
    n2 = n_input // 2
    dims = [(n_input, n2), (n2, n_bottleneck), (n_bottleneck, n2), (n2, n_output)]
    params = []
    for (fan_in, fan_out) in dims:
        key, kw, kb = jax.random.split(key, 3)
        bound = 1.0 / jnp.sqrt(float(fan_in))
        w = jax.random.uniform(kw, (fan_in, fan_out), jnp.float32, -bound, bound)
        b = jax.random.uniform(kb, (1, fan_out), jnp.float32, -bound, bound)
        params += [w, b]
    return params


def reference_forward_bf16(x, w1, b1, w2, b2, w3, b3, w4, b4):
    """Same matmul numerics as the kernel (bf16 inputs, f32 accumulation)."""
    bf16, f32 = jnp.bfloat16, jnp.float32
    h1 = jnp.maximum(jnp.dot(x.astype(bf16), w1.astype(bf16),
                             preferred_element_type=f32) + b1, 0.0)
    z = jnp.maximum(jnp.dot(h1.astype(bf16), w2.astype(bf16),
                            preferred_element_type=f32) + b2, 0.0)
    h2 = jnp.maximum(jnp.dot(z.astype(bf16), w3.astype(bf16),
                             preferred_element_type=f32) + b3, 0.0)
    return jax.nn.sigmoid(jnp.dot(h2.astype(bf16), w4.astype(bf16),
                                  preferred_element_type=f32) + b4)


def reference_forward_f32(x, w1, b1, w2, b2, w3, b3, w4, b4):
    h1 = jnp.maximum(x @ w1 + b1, 0.0)
    z = jnp.maximum(h1 @ w2 + b2, 0.0)
    h2 = jnp.maximum(z @ w3 + b3, 0.0)
    return jax.nn.sigmoid(h2 @ w4 + b4)


if __name__ == "__main__":
    N_INPUT = 784
    N_BOTTLENECK = 8
    N_OUTPUT = 784
    BATCH = 256   # two 128-row grid steps -> exercises the streaming pipeline
    TM = 128

    key = jax.random.PRNGKey(0)
    key, kx = jax.random.split(key)
    x = jax.random.uniform(kx, (BATCH, N_INPUT), jnp.float32)  # MNIST-like pixels in [0,1)
    params = init_params(key, N_INPUT, N_BOTTLENECK, N_OUTPUT)

    padded_params = prepare_params(*params)          # one-time pad + bf16 cast
    x_bf16 = x.astype(jnp.bfloat16)                   # cast once, outside the call

    out = autoencoder_forward(x_bf16, *padded_params, tm=TM)
    out = jax.block_until_ready(out)
    assert out.shape == (BATCH, N_OUTPUT)
    assert out.dtype == jnp.bfloat16
    out_f32 = out.astype(jnp.float32)

    # Tight-ish check against a reference mirroring the kernel's bf16/f32 mix
    # (slack for bf16 output rounding + approx reciprocal in the sigmoid).
    ref_bf = reference_forward_bf16(x_bf16, *params)
    assert jnp.allclose(out_f32, ref_bf, atol=1.5e-2, rtol=1.5e-2), "mismatch vs bf16 reference"

    # Loose sanity check against the pure-f32 (PyTorch-equivalent) forward.
    ref_f32 = reference_forward_f32(x, *params)
    assert jnp.allclose(out_f32, ref_f32, atol=3e-2, rtol=3e-2), "mismatch vs f32 reference"

    print("KERNEL_OK")
</pallas_src>

<mosaic_0001>
module attributes {stable_mosaic.version = 11 : i64} {
  func.func @autoencoder_kernel(%arg0: i32, %arg1: memref<128x784xbf16, #tpu.memory_space<vmem>>, %arg2: memref<784x512xbf16, #tpu.memory_space<vmem>>, %arg3: memref<1x512xf32, #tpu.memory_space<vmem>>, %arg4: memref<512x128xbf16, #tpu.memory_space<vmem>>, %arg5: memref<1x128xf32, #tpu.memory_space<vmem>>, %arg6: memref<128x512xbf16, #tpu.memory_space<vmem>>, %arg7: memref<1x512xf32, #tpu.memory_space<vmem>>, %arg8: memref<512x784xbf16, #tpu.memory_space<vmem>>, %arg9: memref<1x784xf32, #tpu.memory_space<vmem>>, %arg10: memref<128x784xbf16, #tpu.memory_space<vmem>>) attributes {dimension_semantics = [#tpu.dimension_semantics<parallel>], iteration_bounds = array<i64: 2>, scalar_prefetch = 0 : i64, scratch_operands = 0 : i64, tpu.core_type = #tpu.core_type<tc>, window_params = [{transform_indices = @transform_0, window_bounds = array<i64: 128, 784>}, {pipeline_mode = #tpu.pipeline_mode<synchronous>, transform_indices = @transform_1, window_bounds = array<i64: 784, 512>}, {pipeline_mode = #tpu.pipeline_mode<synchronous>, transform_indices = @transform_2, window_bounds = array<i64: 1, 512>}, {pipeline_mode = #tpu.pipeline_mode<synchronous>, transform_indices = @transform_3, window_bounds = array<i64: 512, 128>}, {pipeline_mode = #tpu.pipeline_mode<synchronous>, transform_indices = @transform_4, window_bounds = array<i64: 1, 128>}, {pipeline_mode = #tpu.pipeline_mode<synchronous>, transform_indices = @transform_5, window_bounds = array<i64: 128, 512>}, {pipeline_mode = #tpu.pipeline_mode<synchronous>, transform_indices = @transform_6, window_bounds = array<i64: 1, 512>}, {pipeline_mode = #tpu.pipeline_mode<synchronous>, transform_indices = @transform_7, window_bounds = array<i64: 512, 784>}, {pipeline_mode = #tpu.pipeline_mode<synchronous>, transform_indices = @transform_8, window_bounds = array<i64: 1, 784>}, {transform_indices = @transform_9, window_bounds = array<i64: 128, 784>}]} {
    %c0 = arith.constant 0 : index
    %c0_0 = arith.constant 0 : index
    %0 = vector.load %arg1[%c0, %c0_0] : memref<128x784xbf16, #tpu.memory_space<vmem>>, vector<128x784xbf16>
    %c0_1 = arith.constant 0 : index
    %c0_2 = arith.constant 0 : index
    %1 = vector.load %arg2[%c0_1, %c0_2] : memref<784x512xbf16, #tpu.memory_space<vmem>>, vector<784x512xbf16>
    %cst = arith.constant dense<0.000000e+00> : vector<128x512xf32>
    %2 = tpu.matmul %0, %1, %cst {dimension_numbers = #tpu.dot_dimension_numbers<[1], [0], [0], [1], [0, 0, 1, 1], [], []>} : vector<128x784xbf16>, vector<784x512xbf16>, vector<128x512xf32> -> vector<128x512xf32>
    %c0_3 = arith.constant 0 : index
    %c0_4 = arith.constant 0 : index
    %3 = vector.load %arg3[%c0_3, %c0_4] : memref<1x512xf32, #tpu.memory_space<vmem>>, vector<1x512xf32>
    %4 = vector.broadcast %3 : vector<1x512xf32> to vector<128x512xf32>
    %5 = arith.addf %2, %4 : vector<128x512xf32>
    %cst_5 = arith.constant 0.000000e+00 : f32
    %6 = vector.broadcast %cst_5 : f32 to vector<128x512xf32>
    %7 = arith.maximumf %5, %6 : vector<128x512xf32>
    %8 = arith.truncf %7 : vector<128x512xf32> to vector<128x512xbf16>
    %c0_6 = arith.constant 0 : index
    %c0_7 = arith.constant 0 : index
    %9 = vector.load %arg4[%c0_6, %c0_7] : memref<512x128xbf16, #tpu.memory_space<vmem>>, vector<512x128xbf16>
    %cst_8 = arith.constant dense<0.000000e+00> : vector<128x128xf32>
    %10 = tpu.matmul %8, %9, %cst_8 {dimension_numbers = #tpu.dot_dimension_numbers<[1], [0], [0], [1], [0, 0, 1, 1], [], []>} : vector<128x512xbf16>, vector<512x128xbf16>, vector<128x128xf32> -> vector<128x128xf32>
    %c0_9 = arith.constant 0 : index
    %c0_10 = arith.constant 0 : index
    %11 = vector.load %arg5[%c0_9, %c0_10] : memref<1x128xf32, #tpu.memory_space<vmem>>, vector<1x128xf32>
    %12 = vector.broadcast %11 : vector<1x128xf32> to vector<128x128xf32>
    %13 = arith.addf %10, %12 : vector<128x128xf32>
    %cst_11 = arith.constant 0.000000e+00 : f32
    %14 = vector.broadcast %cst_11 : f32 to vector<128x128xf32>
    %15 = arith.maximumf %13, %14 : vector<128x128xf32>
    %16 = arith.truncf %15 : vector<128x128xf32> to vector<128x128xbf16>
    %c0_12 = arith.constant 0 : index
    %c0_13 = arith.constant 0 : index
    %17 = vector.load %arg6[%c0_12, %c0_13] : memref<128x512xbf16, #tpu.memory_space<vmem>>, vector<128x512xbf16>
    %cst_14 = arith.constant dense<0.000000e+00> : vector<128x512xf32>
    %18 = tpu.matmul %16, %17, %cst_14 {dimension_numbers = #tpu.dot_dimension_numbers<[1], [0], [0], [1], [0, 0, 1, 1], [], []>} : vector<128x128xbf16>, vector<128x512xbf16>, vector<128x512xf32> -> vector<128x512xf32>
    %c0_15 = arith.constant 0 : index
    %c0_16 = arith.constant 0 : index
    %19 = vector.load %arg7[%c0_15, %c0_16] : memref<1x512xf32, #tpu.memory_space<vmem>>, vector<1x512xf32>
    %20 = vector.broadcast %19 : vector<1x512xf32> to vector<128x512xf32>
    %21 = arith.addf %18, %20 : vector<128x512xf32>
    %cst_17 = arith.constant 0.000000e+00 : f32
    %22 = vector.broadcast %cst_17 : f32 to vector<128x512xf32>
    %23 = arith.maximumf %21, %22 : vector<128x512xf32>
    %24 = arith.truncf %23 : vector<128x512xf32> to vector<128x512xbf16>
    %c0_18 = arith.constant 0 : index
    %c0_19 = arith.constant 0 : index
    %25 = vector.load %arg8[%c0_18, %c0_19] : memref<512x784xbf16, #tpu.memory_space<vmem>>, vector<512x784xbf16>
    %cst_20 = arith.constant dense<0.000000e+00> : vector<128x784xf32>
    %26 = tpu.matmul %24, %25, %cst_20 {dimension_numbers = #tpu.dot_dimension_numbers<[1], [0], [0], [1], [0, 0, 1, 1], [], []>} : vector<128x512xbf16>, vector<512x784xbf16>, vector<128x784xf32> -> vector<128x784xf32>
    %c0_21 = arith.constant 0 : index
    %c0_22 = arith.constant 0 : index
    %27 = vector.load %arg9[%c0_21, %c0_22] : memref<1x784xf32, #tpu.memory_space<vmem>>, vector<1x784xf32>
    %28 = vector.broadcast %27 : vector<1x784xf32> to vector<128x784xf32>
    %29 = arith.addf %26, %28 : vector<128x784xf32>
    %cst_23 = arith.constant 0.000000e+00 : f32
    %30 = vector.broadcast %cst_23 : f32 to vector<128x784xf32>
    %31 = arith.subf %30, %29 : vector<128x784xf32>
    %32 = math.exp %31 : vector<128x784xf32>
    %cst_24 = arith.constant 1.000000e+00 : f32
    %33 = vector.broadcast %cst_24 : f32 to vector<128x784xf32>
    %34 = arith.addf %33, %32 : vector<128x784xf32>
    %35 = tpu.reciprocal %34 {approx = true} : vector<128x784xf32> -> vector<128x784xf32>
    %36 = arith.truncf %35 : vector<128x784xf32> to vector<128x784xbf16>
    %c0_25 = arith.constant 0 : index
    %c0_26 = arith.constant 0 : index
    %37 = vector.load %arg10[%c0_25, %c0_26] : memref<128x784xbf16, #tpu.memory_space<vmem>>, vector<128x784xbf16>
    tpu.vector_store %arg10[%c0_25, %c0_26], %36 {strides = array<i32>} : memref<128x784xbf16, #tpu.memory_space<vmem>>, vector<128x784xbf16>,
    return
  }
  func.func @transform_0(%arg0: i32) -> (i32, i32) {
    %c0_i32 = arith.constant 0 : i32
    %c0_i32_0 = arith.constant 0 : i32
    return %arg0, %c0_i32 : i32, i32
  }
  func.func @transform_1(%arg0: i32) -> (i32, i32) {
    %c0_i32 = arith.constant 0 : i32
    %c0_i32_0 = arith.constant 0 : i32
    %c0_i32_1 = arith.constant 0 : i32
    return %c0_i32, %c0_i32_0 : i32, i32
  }
  func.func @transform_2(%arg0: i32) -> (i32, i32) {
    %c0_i32 = arith.constant 0 : i32
    %c0_i32_0 = arith.constant 0 : i32
    %c0_i32_1 = arith.constant 0 : i32
    return %c0_i32, %c0_i32_0 : i32, i32
  }
  func.func @transform_3(%arg0: i32) -> (i32, i32) {
    %c0_i32 = arith.constant 0 : i32
    %c0_i32_0 = arith.constant 0 : i32
    %c0_i32_1 = arith.constant 0 : i32
    return %c0_i32, %c0_i32_0 : i32, i32
  }
  func.func @transform_4(%arg0: i32) -> (i32, i32) {
    %c0_i32 = arith.constant 0 : i32
    %c0_i32_0 = arith.constant 0 : i32
    %c0_i32_1 = arith.constant 0 : i32
    return %c0_i32, %c0_i32_0 : i32, i32
  }
  func.func @transform_5(%arg0: i32) -> (i32, i32) {
    %c0_i32 = arith.constant 0 : i32
    %c0_i32_0 = arith.constant 0 : i32
    %c0_i32_1 = arith.constant 0 : i32
    return %c0_i32, %c0_i32_0 : i32, i32
  }
  func.func @transform_6(%arg0: i32) -> (i32, i32) {
    %c0_i32 = arith.constant 0 : i32
    %c0_i32_0 = arith.constant 0 : i32
    %c0_i32_1 = arith.constant 0 : i32
    return %c0_i32, %c0_i32_0 : i32, i32
  }
  func.func @transform_7(%arg0: i32) -> (i32, i32) {
    %c0_i32 = arith.constant 0 : i32
    %c0_i32_0 = arith.constant 0 : i32
    %c0_i32_1 = arith.constant 0 : i32
    return %c0_i32, %c0_i32_0 : i32, i32
  }
  func.func @transform_8(%arg0: i32) -> (i32, i32) {
    %c0_i32 = arith.constant 0 : i32
    %c0_i32_0 = arith.constant 0 : i32
    %c0_i32_1 = arith.constant 0 : i32
    return %c0_i32, %c0_i32_0 : i32, i32
  }
  func.func @transform_9(%arg0: i32) -> (i32, i32) {
    %c0_i32 = arith.constant 0 : i32
    %c0_i32_0 = arith.constant 0 : i32
    return %arg0, %c0_i32 : i32, i32
  }
}

</mosaic_0001>

<bundles_post_ra>
// kernel: autoencoder_forward.1
= control target key start
LH: loop header
LB: loop body
LE: loop exit
PB: predicated region body
PF: predicated region fallthrough
CT: control target
= control target key end

     0   :  { %s9970_s30 = smov 0   ;;  %s12426_s0 = inlined_call_operand.vmem [shape: bf16[256,784], index: 0, kind: input, shape index: {}]   ;;  %s12427_s1 = inlined_call_operand.vmem [shape: bf16[784,512], index: 1, kind: input, shape index: {}]   ;;  %s12428_s2 = inlined_call_operand.vmem [shape: f32[1,512], index: 2, kind: input, shape index: {}]   ;;  %s12429_s3 = inlined_call_operand.vmem [shape: bf16[512,128], index: 3, kind: input, shape index: {}]   ;;  %s12430_s4 = inlined_call_operand.vmem [shape: f32[1,128], index: 4, kind: input, shape index: {}]   ;;  %s12431_s5 = inlined_call_operand.vmem [shape: bf16[128,512], index: 5, kind: input, shape index: {}]   ;;  %s12432_s6 = inlined_call_operand.vmem [shape: f32[1,512], index: 6, kind: input, shape index: {}]   ;;  %s12433_s7 = inlined_call_operand.vmem [shape: bf16[512,784], index: 7, kind: input, shape index: {}]   ;;  %s12434_s8 = inlined_call_operand.vmem [shape: f32[1,784], index: 8, kind: input, shape index: {}]   ;;  %s12435_s9 = inlined_call_operand.vmem [shape: bf16[256,784], index: 9, kind: output, shape index: {}]  }
   0x1 LB: > { %s7278_s10 = sadd.s32 4294967295, %s9917_s30   ;;  %p7282_p0 = scmp.ge.s32.totalorder %s9917_s30, 1  ;;  %s9917_s30 = sphi %s9970_s30, %s19_s30  }
   0x2   : > { %p289_p1 = scmp.lt.s32.totalorder %s9917_s30, 3 }
   0x4   : > { %p290_p2 = pnand %p7282_p0, %p289_p1 }
   0x5   : > { %v8688_v0 = vld [vmem:[%s12427_s1 + $0x4] ss:$16 sps:$4 sm:$0xff] (!%p290_p2)   ;;  %v8690_v1 = vld [vmem:[%s12427_s1 + $0xc] ss:$16 sps:$4 sm:$0xff] (!%p290_p2)   ;;  %v8692_v2 = vld [vmem:[%s12427_s1] ss:$16 sps:$4 sm:$0xff] (!%p290_p2)  }
   0x6   : > { %293 = sbr.rel (%p290_p2) target bundleno = 1460 (0x5b4), region = 56  ;;  %1909 = vmatprep.subr.bf16.mxu0 (!%p290_p2), %v8688_v0  ;;  %v8693_v3 = vld [vmem:[%s12427_s1 + $0x8] ss:$16 sps:$4 sm:$0xff] (!%p290_p2)   ;;  %2361 = vmatprep.subr.bf16.mxu1 (!%p290_p2), %v8690_v1  ;;  %v8694_v4 = vld [vmem:[%s12427_s1 + $0x24] ss:$16 sps:$4 sm:$0xff] (!%p290_p2)   ;;  %s7283_s14 = sshll.u32 (!%p290_p2), %s7278_s10, 4 }
   0x7   : > { %1910 = vmatpush1.bf16.msra.mxu0 (!%p290_p2), %v8692_v2  ;;  %2362 = vmatpush1.bf16.msra.mxu1 (!%p290_p2), %v8693_v3  ;;  %v8696_v5 = vld [vmem:[%s12427_s1 + $0x2c] ss:$16 sps:$4 sm:$0xff] (!%p290_p2)   ;;  %v8698_v6 = vld [vmem:[%s12427_s1 + $0x20] ss:$16 sps:$4 sm:$0xff] (!%p290_p2)   ;;  %v8699_v7 = vld [vmem:[%s12427_s1 + $0x28] ss:$16 sps:$4 sm:$0xff] (!%p290_p2)  }
   0x8   : > { %1911 = vmatprep.subr.bf16.mxu0 (!%p290_p2), %v8694_v4  ;;  %2363 = vmatprep.subr.bf16.mxu1 (!%p290_p2), %v8696_v5  ;;  %v8700_v8 = vld [vmem:[%s12427_s1 + $0x44] ss:$16 sps:$4 sm:$0xff] (!%p290_p2)   ;;  %v8702_v9 = vld [vmem:[%s12427_s1 + $0x4c] ss:$16 sps:$4 sm:$0xff] (!%p290_p2)   ;;  %v8704_v10 = vld [vmem:[%s12427_s1 + $0x40] ss:$16 sps:$4 sm:$0xff] (!%p290_p2)  }
   0x9   : > { %v8705_v11 = vld [vmem:[%s12427_s1 + $0x48] ss:$16 sps:$4 sm:$0xff] (!%p290_p2)   ;;  %v8706_v12 = vld [vmem:[%s12427_s1 + $0x64] ss:$16 sps:$4 sm:$0xff] (!%p290_p2)   ;;  %v8708_v13 = vld [vmem:[%s12427_s1 + $0x6c] ss:$16 sps:$4 sm:$0xff] (!%p290_p2)  }
   0xa   : > { %v8710_v14 = vld [vmem:[%s12427_s1 + $0x60] ss:$16 sps:$4 sm:$0xff] (!%p290_p2)   ;;  %v8711_v15 = vld [vmem:[%s12427_s1 + $0x68] ss:$16 sps:$4 sm:$0xff] (!%p290_p2)   ;;  %v8712_v16 = vld [vmem:[%s12427_s1 + $0x84] ss:$16 sps:$4 sm:$0xff] (!%p290_p2)  }
   0xb   : > { %1912 = vmatpush1.bf16.msra.mxu0 (!%p290_p2), %v8698_v6  ;;  %2364 = vmatpush1.bf16.msra.mxu1 (!%p290_p2), %v8699_v7  ;;  %v8714_v17 = vld [vmem:[%s12427_s1 + $0x8c] ss:$16 sps:$4 sm:$0xff] (!%p290_p2)   ;;  %v8716_v18 = vld [vmem:[%s12427_s1 + $0x80] ss:$16 sps:$4 sm:$0xff] (!%p290_p2)   ;;  %v8717_v19 = vld [vmem:[%s12427_s1 + $0x88] ss:$16 sps:$4 sm:$0xff] (!%p290_p2)  }
   0xc   : > { %1913 = vmatprep.subr.bf16.mxu0 (!%p290_p2), %v8700_v8  ;;  %2365 = vmatprep.subr.bf16.mxu1 (!%p290_p2), %v8702_v9  ;;  %v8718_v20 = vld [vmem:[%s12427_s1 + $0xa4] ss:$16 sps:$4 sm:$0xff] (!%p290_p2)   ;;  %v8720_v21 = vld [vmem:[%s12427_s1 + $0xac] ss:$16 sps:$4 sm:$0xff] (!%p290_p2)   ;;  %v8722_v22 = vld [vmem:[%s12427_s1 + $0xa0] ss:$16 sps:$4 sm:$0xff] (!%p290_p2)  }
   0xd   : > { %v8723_v23 = vld [vmem:[%s12427_s1 + $0xa8] ss:$16 sps:$4 sm:$0xff]   ;;  %v8724_v24 = vld [vmem:[%s12427_s1 + $0xc4] ss:$16 sps:$4 sm:$0xff]   ;;  %v8726_v25 = vld [vmem:[%s12427_s1 + $0xcc] ss:$16 sps:$4 sm:$0xff]  }
   0xe   : > { %v8728_v26 = vld [vmem:[%s12427_s1 + $0xc0] ss:$16 sps:$4 sm:$0xff]   ;;  %v8729_v27 = vld [vmem:[%s12427_s1 + $0xc8] ss:$16 sps:$4 sm:$0xff]   ;;  %v8730_v28 = vld [vmem:[%s12427_s1 + $0xe4] ss:$16 sps:$4 sm:$0xff]  }
   0xf   : > { %1914 = vmatpush1.bf16.msra.mxu0 %v8704_v10  ;;  %2366 = vmatpush1.bf16.msra.mxu1 %v8705_v11  ;;  %v8732_v29 = vld [vmem:[%s12427_s1 + $0xec] ss:$16 sps:$4 sm:$0xff]   ;;  %v8734_v30 = vld [vmem:[%s12427_s1 + $0xe0] ss:$16 sps:$4 sm:$0xff]   ;;  %v8735_v31 = vld [vmem:[%s12427_s1 + $0xe8] ss:$16 sps:$4 sm:$0xff]  }
  0x10   : > { %1915 = vmatprep.subr.bf16.mxu0 %v8706_v12  ;;  %2367 = vmatprep.subr.bf16.mxu1 %v8708_v13  ;;  %v8736_v32 = vld [vmem:[%s12427_s1 + $0x104] ss:$16 sps:$4 sm:$0xff]   ;;  %p328_p3 = scmp.lt.s32.totalorder %s7283_s14, 31  ;;  %v8738_v33 = vld [vmem:[%s12427_s1 + $0x10c] ss:$16 sps:$4 sm:$0xff]   ;;  %vm1884_vm0 = vcmask 130048  }
  0x11   : > { %v8740_v34 = vld [vmem:[%s12427_s1 + $0x100] ss:$16 sps:$4 sm:$0xff]   ;;  %v8741_v35 = vld [vmem:[%s12427_s1 + $0x108] ss:$16 sps:$4 sm:$0xff]   ;;  %v8742_v36 = vld [vmem:[%s12427_s1 + $0x124] ss:$16 sps:$4 sm:$0xff]  }
  0x12   : > { %s12437_s14 = smov (!%p328_p3, %s7283_s14), 31  ;;  %v8744_v37 = vld [vmem:[%s12427_s1 + $0x12c] ss:$16 sps:$4 sm:$0xff]   ;;  %v8746_v38 = vld [vmem:[%s12427_s1 + $0x120] ss:$16 sps:$4 sm:$0xff]   ;;  %vm7158_vm1 = vcmask 125952  }
  0x13   : > { %1916 = vmatpush1.bf16.msra.mxu0 %v8710_v14  ;;  %2368 = vmatpush1.bf16.msra.mxu1 %v8711_v15  ;;  %v8747_v39 = vld [vmem:[%s12427_s1 + $0x128] ss:$16 sps:$4 sm:$0xff]   ;;  %v8748_v40 = vld [vmem:[%s12427_s1 + $0x144] ss:$16 sps:$4 sm:$0xff]   ;;  %s8678_s18 = smul.u32 28, %s12437_s14 }
  0x14   : > { %1917 = vmatprep.subr.bf16.mxu0 %v8712_v16  ;;  %2369 = vmatprep.subr.bf16.mxu1 %v8714_v17  ;;  %v8750_v41 = vld [vmem:[%s12427_s1 + $0x14c] ss:$16 sps:$4 sm:$0xff]   ;;  %v8752_v42 = vld [vmem:[%s12427_s1 + $0x140] ss:$16 sps:$4 sm:$0xff]   ;;  %v8753_v43 = vld [vmem:[%s12427_s1 + $0x148] ss:$16 sps:$4 sm:$0xff]  }
  0x15   : > { %v8754_v44 = vld [vmem:[%s12427_s1 + $0x164] ss:$16 sps:$4 sm:$0xff]   ;;  %s10123_s28 = scalar_lea.vmem %s12426_s0, %s8678_s18  ;;  %v8756_v45 = vld [vmem:[%s12427_s1 + $0x16c] ss:$16 sps:$4 sm:$0xff]   ;;  %v8758_v46 = vld [vmem:[%s12427_s1 + $0x160] ss:$16 sps:$4 sm:$0xff]  }
  0x16   : > { %v8759_v47 = vld [vmem:[%s12427_s1 + $0x168] ss:$16 sps:$4 sm:$0xff]   ;;  %v8786_v48 = vld [vmem:[%s10123_s28 + $0x4] ss:$28 sps:$4 sm:$0xff]   ;;  %v8762_v50 = vld [vmem:[%s12427_s1 + $0x18c] ss:$16 sps:$4 sm:$0xff]  }
  0x17   : > { %1918 = vmatpush1.bf16.msra.mxu0 %v8716_v18  ;;  %2370 = vmatpush1.bf16.msra.mxu1 %v8717_v19  ;;  %v8760_v49 = vld [vmem:[%s12427_s1 + $0x184] ss:$16 sps:$4 sm:$0xff]   ;;  %v8764_v51 = vld [vmem:[%s12427_s1 + $0x180] ss:$16 sps:$4 sm:$0xff]   ;;  %v8765_v52 = vld [vmem:[%s12427_s1 + $0x188] ss:$16 sps:$4 sm:$0xff]  }
  0x18   : > { %1919 = vmatprep.subr.bf16.mxu0 %v8718_v20  ;;  %2371 = vmatprep.subr.bf16.mxu1 %v8720_v21  ;;  %v8766_v53 = vld [vmem:[%s12427_s1 + $0x1a4] ss:$16 sps:$4 sm:$0xff]   ;;  %v8768_v54 = vld [vmem:[%s12427_s1 + $0x1ac] ss:$16 sps:$4 sm:$0xff]   ;;  %v8770_v55 = vld [vmem:[%s12427_s1 + $0x1a0] ss:$16 sps:$4 sm:$0xff]  }
  0x19   : > { %1941 = vmatprep.mubr.bf16.mxu0 %v8786_v48  ;;  %2393 = vmatprep.mubr.bf16.mxu1 %v8786_v48  ;;  %v8771_v56 = vld [vmem:[%s12427_s1 + $0x1a8] ss:$16 sps:$4 sm:$0xff]   ;;  %v8772_v57 = vld [vmem:[%s12427_s1 + $0x1c4] ss:$16 sps:$4 sm:$0xff]   ;;  %v8774_v58 = vld [vmem:[%s12427_s1 + $0x1cc] ss:$16 sps:$4 sm:$0xff]  }
  0x1a   : > { %v8776_v59 = vld [vmem:[%s12427_s1 + $0x1c0] ss:$16 sps:$4 sm:$0xff]   ;;  %v8777_v60 = vld [vmem:[%s12427_s1 + $0x1c8] ss:$16 sps:$4 sm:$0xff]   ;;  %v8778_v61 = vld [vmem:[%s12427_s1 + $0x1e4] ss:$16 sps:$4 sm:$0xff]  }
  0x1b   : > { %1920 = vmatpush1.bf16.msra.mxu0 %v8722_v22  ;;  %2372 = vmatpush1.bf16.msra.mxu1 %v8723_v23  ;;  %v8780_v62 = vld [vmem:[%s12427_s1 + $0x1ec] ss:$16 sps:$4 sm:$0xff]   ;;  %v8782_v63 = vld [vmem:[%s12427_s1 + $0x1e0] ss:$16 sps:$4 sm:$0xff]   ;;  %v8783_v0 = vld [vmem:[%s12427_s1 + $0x1e8] ss:$16 sps:$4 sm:$0xff]  }
  0x1c   : > { %1921 = vmatprep.subr.bf16.mxu0 %v8724_v24  ;;  %2373 = vmatprep.subr.bf16.mxu1 %v8726_v25  ;;  %v8789_v1 = vld [vmem:[%s12427_s1 + $0x204] ss:$16 sps:$4 sm:$0xff]   ;;  %v8792_v2 = vld [vmem:[%s12427_s1 + $0x20c] ss:$16 sps:$4 sm:$0xff]   ;;  %v8787_v4 = vld [vmem:[%s12427_s1 + $0x200] ss:$16 sps:$4 sm:$0xff]  }
  0x1d   : > { %v8784_v3 = vld [vmem:[%s10123_s28] ss:$28 sps:$4 sm:$0xff]   ;;  %v8790_v5 = vld [vmem:[%s12427_s1 + $0x208] ss:$16 sps:$4 sm:$0xff]   ;;  %v8795_v6 = vld [vmem:[%s12427_s1 + $0x224] ss:$16 sps:$4 sm:$0xff]  }
  0x1e   : > { %v8798_v7 = vld [vmem:[%s12427_s1 + $0x22c] ss:$16 sps:$4 sm:$0xff]   ;;  %v8793_v9 = vld [vmem:[%s12427_s1 + $0x220] ss:$16 sps:$4 sm:$0xff]   ;;  %v8796_v10 = vld [vmem:[%s12427_s1 + $0x228] ss:$16 sps:$4 sm:$0xff]  }
  0x1f   : > { %1922 = vmatpush1.bf16.msra.mxu0 %v8728_v26  ;;  %2374 = vmatpush1.bf16.msra.mxu1 %v8729_v27  ;;  %v8799_v8 = vld [vmem:[%s10123_s28 + $0x3c] ss:$28 sps:$4 sm:$0xff]   ;;  %v8804_v11 = vld [vmem:[%s12427_s1 + $0x244] ss:$16 sps:$4 sm:$0xff]   ;;  %v8802_v14 = vld [vmem:[%s12427_s1 + $0x240] ss:$16 sps:$4 sm:$0xff]  }
  0x20   : > { %1923 = vmatprep.subr.bf16.mxu0 %v8730_v28  ;;  %2375 = vmatprep.subr.bf16.mxu1 %v8732_v29  ;;  %v8807_v12 = vld [vmem:[%s12427_s1 + $0x24c] ss:$16 sps:$4 sm:$0xff]   ;;  %v8801_v13 = vld [vmem:[%s10123_s28 + $0x38] ss:$28 sps:$4 sm:$0xff]   ;;  %v8808_v19 = vld [vmem:[%s12427_s1 + $0x260] ss:$16 sps:$4 sm:$0xff]  }
  0x21   : > { %v8805_v15 = vld [vmem:[%s12427_s1 + $0x248] ss:$16 sps:$4 sm:$0xff]   ;;  %v8810_v16 = vld [vmem:[%s12427_s1 + $0x264] ss:$16 sps:$4 sm:$0xff]   ;;  %v8813_v17 = vld [vmem:[%s12427_s1 + $0x26c] ss:$16 sps:$4 sm:$0xff]  }
  0x22   : > { %v8814_v18 = vld [vmem:[%s10123_s28 + $0x74] ss:$28 sps:$4 sm:$0xff]   ;;  %v8811_v20 = vld [vmem:[%s12427_s1 + $0x268] ss:$16 sps:$4 sm:$0xff]   ;;  %v8822_v22 = vld [vmem:[%s12427_s1 + $0x28c] ss:$16 sps:$4 sm:$0xff]  }
  0x23   : > { %1924 = vmatpush1.bf16.msra.mxu0 %v8734_v30  ;;  %2376 = vmatpush1.bf16.msra.mxu1 %v8735_v31  ;;  %v8819_v21 = vld [vmem:[%s12427_s1 + $0x284] ss:$16 sps:$4 sm:$0xff]   ;;  %v8816_v23 = vld [vmem:[%s10123_s28 + $0x70] ss:$28 sps:$4 sm:$0xff]   ;;  %v8820_v25 = vld [vmem:[%s12427_s1 + $0x288] ss:$16 sps:$4 sm:$0xff]  }
  0x24   : > { %1925 = vmatprep.subr.bf16.mxu0 %v8736_v32  ;;  %2377 = vmatprep.subr.bf16.mxu1 %v8738_v33  ;;  %v8817_v24 = vld [vmem:[%s12427_s1 + $0x280] ss:$16 sps:$4 sm:$0xff]   ;;  %v8825_v26 = vld [vmem:[%s12427_s1 + $0x2a4] ss:$16 sps:$4 sm:$0xff]   ;;  %v8828_v27 = vld [vmem:[%s12427_s1 + $0x2ac] ss:$16 sps:$4 sm:$0xff]  }
  0x25   : > { %v8829_v28 = vld [vmem:[%s10123_s28 + $0xac] ss:$28 sps:$4 sm:$0xff]   ;;  %v8823_v29 = vld [vmem:[%s12427_s1 + $0x2a0] ss:$16 sps:$4 sm:$0xff]   ;;  %v8834_v31 = vld [vmem:[%s12427_s1 + $0x2c4] ss:$16 sps:$4 sm:$0xff]  }
  0x26   : > { %v8826_v30 = vld [vmem:[%s12427_s1 + $0x2a8] ss:$16 sps:$4 sm:$0xff]   ;;  %v8837_v32 = vld [vmem:[%s12427_s1 + $0x2cc] ss:$16 sps:$4 sm:$0xff]  }
  0x27   : > { %1926 = vmatpush1.bf16.msra.mxu0 %v8740_v34  ;;  %2378 = vmatpush1.bf16.msra.mxu1 %v8741_v35  ;;  %v8831_v33 = vld [vmem:[%s10123_s28 + $0xa8] ss:$28 sps:$4 sm:$0xff]   ;;  %v8832_v34 = vld [vmem:[%s12427_s1 + $0x2c0] ss:$16 sps:$4 sm:$0xff]   ;;  %v8859_v48 = vld [vmem:[%s10123_s28 + $0x11c] ss:$28 sps:$4 sm:$0xff]  }
  0x28   : > { %1927 = vmatprep.subr.bf16.mxu0 %v8742_v36  ;;  %2379 = vmatprep.subr.bf16.mxu1 %v8744_v37  ;;  %v8835_v35 = vld [vmem:[%s12427_s1 + $0x2c8] ss:$16 sps:$4 sm:$0xff]   ;;  %v8840_v36 = vld [vmem:[%s12427_s1 + $0x2e4] ss:$16 sps:$4 sm:$0xff]   ;;  %v8843_v37 = vld [vmem:[%s12427_s1 + $0x2ec] ss:$16 sps:$4 sm:$0xff]  }
  0x2b   : > { %1928 = vmatpush1.bf16.msra.mxu0 %v8746_v38  ;;  %2380 = vmatpush1.bf16.msra.mxu1 %v8747_v39  ;;  %v8844_v38 = vld [vmem:[%s10123_s28 + $0xe4] ss:$28 sps:$4 sm:$0xff]  }
  0x2c   : > { %1929 = vmatprep.subr.bf16.mxu0 %v8748_v40  ;;  %2381 = vmatprep.subr.bf16.mxu1 %v8750_v41  ;;  %v8838_v39 = vld [vmem:[%s12427_s1 + $0x2e0] ss:$16 sps:$4 sm:$0xff]   ;;  %v8841_v40 = vld [vmem:[%s12427_s1 + $0x2e8] ss:$16 sps:$4 sm:$0xff]   ;;  %v8849_v41 = vld [vmem:[%s12427_s1 + $0x304] ss:$16 sps:$4 sm:$0xff]  }
  0x2f   : > { %1930 = vmatpush1.bf16.msra.mxu0 %v8752_v42  ;;  %2382 = vmatpush1.bf16.msra.mxu1 %v8753_v43  ;;  %v8852_v42 = vld [vmem:[%s12427_s1 + $0x30c] ss:$16 sps:$4 sm:$0xff]  }
  0x30   : > { %1931 = vmatprep.subr.bf16.mxu0 %v8754_v44  ;;  %2383 = vmatprep.subr.bf16.mxu1 %v8756_v45  ;;  %v8846_v43 = vld [vmem:[%s10123_s28 + $0xe0] ss:$28 sps:$4 sm:$0xff]   ;;  %v8850_v45 = vld [vmem:[%s12427_s1 + $0x308] ss:$16 sps:$4 sm:$0xff]  }
  0x31   : > { %v8847_v44 = vld [vmem:[%s12427_s1 + $0x300] ss:$16 sps:$4 sm:$0xff]  }
  0x33   : > { %1932 = vmatpush1.bf16.msra.mxu0 %v8758_v46  ;;  %2384 = vmatpush1.bf16.msra.mxu1 %v8759_v47  ;;  %v8855_v46 = vld [vmem:[%s12427_s1 + $0x324] ss:$16 sps:$4 sm:$0xff]   ;;  %v8858_v47 = vld [vmem:[%s12427_s1 + $0x32c] ss:$16 sps:$4 sm:$0xff]  }
  0x34   : > { %1933 = vmatprep.subr.bf16.mxu0 %v8760_v49  ;;  %2385 = vmatprep.subr.bf16.mxu1 %v8762_v50  ;;  %v8853_v49 = vld [vmem:[%s12427_s1 + $0x320] ss:$16 sps:$4 sm:$0xff]   ;;  %v8856_v50 = vld [vmem:[%s12427_s1 + $0x328] ss:$16 sps:$4 sm:$0xff]  }
  0x37   : > { %1934 = vmatpush1.bf16.msra.mxu0 %v8764_v51  ;;  %2386 = vmatpush1.bf16.msra.mxu1 %v8765_v52  ;;  %v8864_v51 = vld [vmem:[%s12427_s1 + $0x344] ss:$16 sps:$4 sm:$0xff]   ;;  %v8867_v52 = vld [vmem:[%s12427_s1 + $0x34c] ss:$16 sps:$4 sm:$0xff]  }
  0x38   : > { %1935 = vmatprep.subr.bf16.mxu0 %v8766_v53  ;;  %2387 = vmatprep.subr.bf16.mxu1 %v8768_v54  ;;  %v8861_v53 = vld [vmem:[%s10123_s28 + $0x118] ss:$28 sps:$4 sm:$0xff]   ;;  %v8862_v54 = vld [vmem:[%s12427_s1 + $0x340] ss:$16 sps:$4 sm:$0xff]  }
  0x3b   : > { %1936 = vmatpush1.bf16.msra.mxu0 %v8770_v55  ;;  %2388 = vmatpush1.bf16.msra.mxu1 %v8771_v56  ;;  %v8865_v55 = vld [vmem:[%s12427_s1 + $0x348] ss:$16 sps:$4 sm:$0xff]   ;;  %v8870_v56 = vld [vmem:[%s12427_s1 + $0x364] ss:$16 sps:$4 sm:$0xff]  }
  0x3c   : > { %1937 = vmatprep.subr.bf16.mxu0 %v8772_v57  ;;  %2389 = vmatprep.subr.bf16.mxu1 %v8774_v58  ;;  %v8873_v57 = vld [vmem:[%s12427_s1 + $0x36c] ss:$16 sps:$4 sm:$0xff]   ;;  %v8874_v58 = vld [vmem:[%s10123_s28 + $0x154] ss:$28 sps:$4 sm:$0xff]  }
  0x3f   : > { %1938 = vmatpush1.bf16.msra.mxu0 %v8776_v59  ;;  %2390 = vmatpush1.bf16.msra.mxu1 %v8777_v60  ;;  %v8868_v59 = vld [vmem:[%s12427_s1 + $0x360] ss:$16 sps:$4 sm:$0xff]   ;;  %v8871_v60 = vld [vmem:[%s12427_s1 + $0x368] ss:$16 sps:$4 sm:$0xff]  }
  0x40   : > { %1939 = vmatprep.subr.bf16.mxu0 %v8778_v61  ;;  %2391 = vmatprep.subr.bf16.mxu1 %v8780_v62  ;;  %v8879_v61 = vld [vmem:[%s12427_s1 + $0x384] ss:$16 sps:$4 sm:$0xff]   ;;  %v8882_v62 = vld [vmem:[%s12427_s1 + $0x38c] ss:$16 sps:$4 sm:$0xff]  }
  0x43   : > { %1940 = vmatpush1.bf16.msra.mxu0 %v8782_v63  ;;  %2392 = vmatpush1.bf16.msra.mxu1 %v8783_v0  ;;  %v8876_v63 = vld [vmem:[%s10123_s28 + $0x150] ss:$28 sps:$4 sm:$0xff]  }
  0x44   : > { %2022 = vmatprep.subr.bf16.mxu0 %v8789_v1  ;;  %2474 = vmatprep.subr.bf16.mxu1 %v8792_v2  ;;  %v8877_v0 = vld [vmem:[%s12427_s1 + $0x380] ss:$16 sps:$4 sm:$0xff]   ;;  %v8880_v1 = vld [vmem:[%s12427_s1 + $0x388] ss:$16 sps:$4 sm:$0xff]   ;;  %v8885_v2 = vld [vmem:[%s12427_s1 + $0x3a4] ss:$16 sps:$4 sm:$0xff]  }
  0x46   : > { %1942 = vmatmul.mubr.bf16.vlgmr.msra.gmra.mrb[0].mxu0 %v8784_v3  ;;  %2394 = vmatmul.mubr.bf16.vlgmr.msra.gmra.mrb[0].mxu1 %v8784_v3  ;;  %v8888_v3 = vld [vmem:[%s12427_s1 + $0x3ac] ss:$16 sps:$4 sm:$0xff]  }
  0x47   : > { %2023 = vmatpush1.bf16.msra.mxu0 %v8787_v4  ;;  %2475 = vmatpush1.bf16.msra.mxu1 %v8790_v5  ;;  %v8889_v4 = vld [vmem:[%s10123_s28 + $0x18c] ss:$28 sps:$4 sm:$0xff]   ;;  %v8883_v5 = vld [vmem:[%s12427_s1 + $0x3a0] ss:$16 sps:$4 sm:$0xff]  }
  0x48   : > { %2024 = vmatprep.subr.bf16.mxu0 %v8795_v6  ;;  %2476 = vmatprep.subr.bf16.mxu1 %v8798_v7  ;;  %v8886_v6 = vld [vmem:[%s12427_s1 + $0x3a8] ss:$16 sps:$4 sm:$0xff]   ;;  %v8894_v7 = vld [vmem:[%s12427_s1 + $0x3c4] ss:$16 sps:$4 sm:$0xff]  }
  0x49   : > { %1951 = vmatprep.mubr.bf16.mxu0 %v8799_v8  ;;  %2403 = vmatprep.mubr.bf16.mxu1 %v8799_v8  ;;  %v8897_v8 = vld [vmem:[%s12427_s1 + $0x3cc] ss:$16 sps:$4 sm:$0xff]  }
  0x4b   : > { %2025 = vmatpush1.bf16.msra.mxu0 %v8793_v9  ;;  %2477 = vmatpush1.bf16.msra.mxu1 %v8796_v10  ;;  %v8891_v9 = vld [vmem:[%s10123_s28 + $0x188] ss:$28 sps:$4 sm:$0xff]   ;;  %v8892_v10 = vld [vmem:[%s12427_s1 + $0x3c0] ss:$16 sps:$4 sm:$0xff]  }
  0x4c   : > { %2026 = vmatprep.subr.bf16.mxu0 %v8804_v11  ;;  %2478 = vmatprep.subr.bf16.mxu1 %v8807_v12  ;;  %v8895_v11 = vld [vmem:[%s12427_s1 + $0x3c8] ss:$16 sps:$4 sm:$0xff]   ;;  %v8900_v12 = vld [vmem:[%s12427_s1 + $0x3e4] ss:$16 sps:$4 sm:$0xff]  }
  0x4e   : > { %1952 = vmatmul.mubr.bf16.gmra.mrb[4].mxu0 %v8801_v13  ;;  %2404 = vmatmul.mubr.bf16.gmra.mrb[4].mxu1 %v8801_v13  ;;  %v8903_v13 = vld [vmem:[%s12427_s1 + $0x3ec] ss:$16 sps:$4 sm:$0xff]  }
  0x4f   : > { %2027 = vmatpush1.bf16.msra.mxu0 %v8802_v14  ;;  %2479 = vmatpush1.bf16.msra.mxu1 %v8805_v15  ;;  %v8906_v14 = vld [vmem:[%s10123_s28 + $0xc] ss:$28 sps:$4 sm:$0xff]   ;;  %v8898_v15 = vld [vmem:[%s12427_s1 + $0x3e0] ss:$16 sps:$4 sm:$0xff]  }
  0x50   : > { %2028 = vmatprep.subr.bf16.mxu0 %v8810_v16  ;;  %2480 = vmatprep.subr.bf16.mxu1 %v8813_v17  ;;  %v8901_v16 = vld [vmem:[%s12427_s1 + $0x3e8] ss:$16 sps:$4 sm:$0xff]   ;;  %v8909_v17 = vld [vmem:[%s12427_s1 + $0x404] ss:$16 sps:$4 sm:$0xff]  }
  0x51   : > { %1961 = vmatprep.mubr.bf16.mxu0 %v8814_v18  ;;  %2413 = vmatprep.mubr.bf16.mxu1 %v8814_v18  ;;  %v8912_v18 = vld [vmem:[%s12427_s1 + $0x40c] ss:$16 sps:$4 sm:$0xff]  }
  0x53   : > { %2029 = vmatpush1.bf16.msra.mxu0 %v8808_v19  ;;  %2481 = vmatpush1.bf16.msra.mxu1 %v8811_v20  ;;  %v8904_v19 = vld [vmem:[%s10123_s28 + $0x8] ss:$28 sps:$4 sm:$0xff]   ;;  %v8907_v20 = vld [vmem:[%s12427_s1 + $0x400] ss:$16 sps:$4 sm:$0xff]  }
  0x54   : > { %2030 = vmatprep.subr.bf16.mxu0 %v8819_v21  ;;  %2482 = vmatprep.subr.bf16.mxu1 %v8822_v22  ;;  %v8910_v21 = vld [vmem:[%s12427_s1 + $0x408] ss:$16 sps:$4 sm:$0xff]   ;;  %v8915_v22 = vld [vmem:[%s12427_s1 + $0x424] ss:$16 sps:$4 sm:$0xff]  }
  0x56   : > { %1962 = vmatmul.mubr.bf16.gmra.mrb[8].mxu0 %v8816_v23  ;;  %2414 = vmatmul.mubr.bf16.gmra.mrb[8].mxu1 %v8816_v23  ;;  %v8918_v23 = vld [vmem:[%s12427_s1 + $0x42c] ss:$16 sps:$4 sm:$0xff]  }
  0x57   : > { %2031 = vmatpush1.bf16.msra.mxu0 %v8817_v24  ;;  %2483 = vmatpush1.bf16.msra.mxu1 %v8820_v25  ;;  %v8919_v24 = vld [vmem:[%s10123_s28 + $0x44] ss:$28 sps:$4 sm:$0xff]  }
  0x58   : > { %2032 = vmatprep.subr.bf16.mxu0 %v8825_v26  ;;  %2484 = vmatprep.subr.bf16.mxu1 %v8828_v27  ;;  %v8913_v25 = vld [vmem:[%s12427_s1 + $0x420] ss:$16 sps:$4 sm:$0xff]   ;;  %v8916_v26 = vld [vmem:[%s12427_s1 + $0x428] ss:$16 sps:$4 sm:$0xff]   ;;  %v8924_v27 = vld [vmem:[%s12427_s1 + $0x444] ss:$16 sps:$4 sm:$0xff]  }
  0x59   : > { %1971 = vmatprep.mubr.bf16.mxu0 %v8829_v28  ;;  %2423 = vmatprep.mubr.bf16.mxu1 %v8829_v28  ;;  %v8927_v28 = vld [vmem:[%s12427_s1 + $0x44c] ss:$16 sps:$4 sm:$0xff]  }
  0x5b   : > { %2033 = vmatpush1.bf16.msra.mxu0 %v8823_v29  ;;  %2485 = vmatpush1.bf16.msra.mxu1 %v8826_v30  ;;  %v8921_v29 = vld [vmem:[%s10123_s28 + $0x40] ss:$28 sps:$4 sm:$0xff]  }
  0x5c   : > { %2034 = vmatprep.subr.bf16.mxu0 %v8834_v31  ;;  %2486 = vmatprep.subr.bf16.mxu1 %v8837_v32  ;;  %v8922_v30 = vld [vmem:[%s12427_s1 + $0x440] ss:$16 sps:$4 sm:$0xff]   ;;  %v8925_v31 = vld [vmem:[%s12427_s1 + $0x448] ss:$16 sps:$4 sm:$0xff]   ;;  %v8930_v32 = vld [vmem:[%s12427_s1 + $0x464] ss:$16 sps:$4 sm:$0xff]  }
  0x5e   : > { %1972 = vmatmul.mubr.bf16.gmra.mrb[12].mxu0 %v8831_v33  ;;  %2424 = vmatmul.mubr.bf16.gmra.mrb[12].mxu1 %v8831_v33  ;;  %v8933_v33 = vld [vmem:[%s12427_s1 + $0x46c] ss:$16 sps:$4 sm:$0xff]  }
  0x5f   : > { %2035 = vmatpush1.bf16.msra.mxu0 %v8832_v34  ;;  %2487 = vmatpush1.bf16.msra.mxu1 %v8835_v35  ;;  %v8934_v34 = vld [vmem:[%s10123_s28 + $0x7c] ss:$28 sps:$4 sm:$0xff]   ;;  %v8928_v35 = vld [vmem:[%s12427_s1 + $0x460] ss:$16 sps:$4 sm:$0xff]  }
  0x60   : > { %2036 = vmatprep.subr.bf16.mxu0 %v8840_v36  ;;  %2488 = vmatprep.subr.bf16.mxu1 %v8843_v37  ;;  %v8931_v36 = vld [vmem:[%s12427_s1 + $0x468] ss:$16 sps:$4 sm:$0xff]   ;;  %v8939_v37 = vld [vmem:[%s12427_s1 + $0x484] ss:$16 sps:$4 sm:$0xff]  }
  0x61   : > { %1981 = vmatprep.mubr.bf16.mxu0 %v8844_v38  ;;  %2433 = vmatprep.mubr.bf16.mxu1 %v8844_v38  ;;  %v8942_v38 = vld [vmem:[%s12427_s1 + $0x48c] ss:$16 sps:$4 sm:$0xff]  }
  0x63   : > { %2037 = vmatpush1.bf16.msra.mxu0 %v8838_v39  ;;  %2489 = vmatpush1.bf16.msra.mxu1 %v8841_v40  ;;  %v8936_v39 = vld [vmem:[%s10123_s28 + $0x78] ss:$28 sps:$4 sm:$0xff]   ;;  %v8937_v40 = vld [vmem:[%s12427_s1 + $0x480] ss:$16 sps:$4 sm:$0xff]  }
  0x64   : > { %2038 = vmatprep.subr.bf16.mxu0 %v8849_v41  ;;  %2490 = vmatprep.subr.bf16.mxu1 %v8852_v42  ;;  %v8940_v41 = vld [vmem:[%s12427_s1 + $0x488] ss:$16 sps:$4 sm:$0xff]   ;;  %v8945_v42 = vld [vmem:[%s12427_s1 + $0x4a4] ss:$16 sps:$4 sm:$0xff]  }
  0x66   : > { %1982 = vmatmul.mubr.bf16.gmra.mrb[16].mxu0 %v8846_v43  ;;  %2434 = vmatmul.mubr.bf16.gmra.mrb[16].mxu1 %v8846_v43  ;;  %v8948_v43 = vld [vmem:[%s12427_s1 + $0x4ac] ss:$16 sps:$4 sm:$0xff]  }
  0x67   : > { %2039 = vmatpush1.bf16.msra.mxu0 %v8847_v44  ;;  %2491 = vmatpush1.bf16.msra.mxu1 %v8850_v45  ;;  %v8949_v44 = vld [vmem:[%s10123_s28 + $0xb4] ss:$28 sps:$4 sm:$0xff]  }
  0x68   : > { %2040 = vmatprep.subr.bf16.mxu0 %v8855_v46  ;;  %2492 = vmatprep.subr.bf16.mxu1 %v8858_v47  ;;  %v8943_v45 = vld [vmem:[%s12427_s1 + $0x4a0] ss:$16 sps:$4 sm:$0xff]   ;;  %v8946_v46 = vld [vmem:[%s12427_s1 + $0x4a8] ss:$16 sps:$4 sm:$0xff]   ;;  %v8954_v47 = vld [vmem:[%s12427_s1 + $0x4c4] ss:$16 sps:$4 sm:$0xff]  }
  0x69   : > { %1991 = vmatprep.mubr.bf16.mxu0 %v8859_v48  ;;  %2443 = vmatprep.mubr.bf16.mxu1 %v8859_v48  ;;  %v8957_v48 = vld [vmem:[%s12427_s1 + $0x4cc] ss:$16 sps:$4 sm:$0xff]  }
  0x6b   : > { %2041 = vmatpush1.bf16.msra.mxu0 %v8853_v49  ;;  %2493 = vmatpush1.bf16.msra.mxu1 %v8856_v50  ;;  %v8951_v49 = vld [vmem:[%s10123_s28 + $0xb0] ss:$28 sps:$4 sm:$0xff]  }
  0x6c   : > { %2042 = vmatprep.subr.bf16.mxu0 %v8864_v51  ;;  %2494 = vmatprep.subr.bf16.mxu1 %v8867_v52  ;;  %v8952_v50 = vld [vmem:[%s12427_s1 + $0x4c0] ss:$16 sps:$4 sm:$0xff]   ;;  %v8955_v51 = vld [vmem:[%s12427_s1 + $0x4c8] ss:$16 sps:$4 sm:$0xff]   ;;  %v8960_v52 = vld [vmem:[%s12427_s1 + $0x4e4] ss:$16 sps:$4 sm:$0xff]  }
  0x6e   : > { %1992 = vmatmul.mubr.bf16.gmra.mrb[20].mxu0 %v8861_v53  ;;  %2444 = vmatmul.mubr.bf16.gmra.mrb[20].mxu1 %v8861_v53  ;;  %v8963_v53 = vld [vmem:[%s12427_s1 + $0x4ec] ss:$16 sps:$4 sm:$0xff]  }
  0x6f   : > { %2043 = vmatpush1.bf16.msra.mxu0 %v8862_v54  ;;  %2495 = vmatpush1.bf16.msra.mxu1 %v8865_v55  ;;  %v8964_v54 = vld [vmem:[%s10123_s28 + $0xec] ss:$28 sps:$4 sm:$0xff]   ;;  %v8958_v55 = vld [vmem:[%s12427_s1 + $0x4e0] ss:$16 sps:$4 sm:$0xff]  }
  0x70   : > { %2044 = vmatprep.subr.bf16.mxu0 %v8870_v56  ;;  %2496 = vmatprep.subr.bf16.mxu1 %v8873_v57  ;;  %v8961_v56 = vld [vmem:[%s12427_s1 + $0x4e8] ss:$16 sps:$4 sm:$0xff]   ;;  %v8969_v57 = vld [vmem:[%s12427_s1 + $0x504] ss:$16 sps:$4 sm:$0xff]  }
  0x71   : > { %2001 = vmatprep.mubr.bf16.mxu0 %v8874_v58  ;;  %2453 = vmatprep.mubr.bf16.mxu1 %v8874_v58  ;;  %v8972_v58 = vld [vmem:[%s12427_s1 + $0x50c] ss:$16 sps:$4 sm:$0xff]  }
  0x73   : > { %2045 = vmatpush1.bf16.msra.mxu0 %v8868_v59  ;;  %2497 = vmatpush1.bf16.msra.mxu1 %v8871_v60  ;;  %v8966_v59 = vld [vmem:[%s10123_s28 + $0xe8] ss:$28 sps:$4 sm:$0xff]   ;;  %v8967_v60 = vld [vmem:[%s12427_s1 + $0x500] ss:$16 sps:$4 sm:$0xff]  }
  0x74   : > { %2046 = vmatprep.subr.bf16.mxu0 %v8879_v61  ;;  %2498 = vmatprep.subr.bf16.mxu1 %v8882_v62  ;;  %v8970_v61 = vld [vmem:[%s12427_s1 + $0x508] ss:$16 sps:$4 sm:$0xff]   ;;  %v8975_v62 = vld [vmem:[%s12427_s1 + $0x524] ss:$16 sps:$4 sm:$0xff]  }
  0x76   : > { %2002 = vmatmul.mubr.bf16.gmra.mrb[24].mxu0 %v8876_v63  ;;  %2454 = vmatmul.mubr.bf16.gmra.mrb[24].mxu1 %v8876_v63  ;;  %v8978_v63 = vld [vmem:[%s12427_s1 + $0x52c] ss:$16 sps:$4 sm:$0xff]  }
  0x77   : > { %2047 = vmatpush1.bf16.msra.mxu0 %v8877_v0  ;;  %2499 = vmatpush1.bf16.msra.mxu1 %v8880_v1  ;;  %v8973_v0 = vld [vmem:[%s12427_s1 + $0x520] ss:$16 sps:$4 sm:$0xff]  }
  0x78   : > { %2048 = vmatprep.subr.bf16.mxu0 %v8885_v2  ;;  %2500 = vmatprep.subr.bf16.mxu1 %v8888_v3  ;;  %v8979_v1 = vld [vmem:[%s10123_s28 + $0x124] ss:$28 sps:$4 sm:$0xff]   ;;  %v8976_v2 = vld [vmem:[%s12427_s1 + $0x528] ss:$16 sps:$4 sm:$0xff]  }
  0x79   : > { %2011 = vmatprep.mubr.bf16.mxu0 %v8889_v4  ;;  %2463 = vmatprep.mubr.bf16.mxu1 %v8889_v4  ;;  %v8984_v3 = vld [vmem:[%s12427_s1 + $0x544] ss:$16 sps:$4 sm:$0xff]   ;;  %v8981_v4 = vld [vmem:[%s10123_s28 + $0x120] ss:$28 sps:$4 sm:$0xff]  }
  0x7b   : > { %2049 = vmatpush1.bf16.msra.mxu0 %v8883_v5  ;;  %2501 = vmatpush1.bf16.msra.mxu1 %v8886_v6  ;;  %v8987_v5 = vld [vmem:[%s12427_s1 + $0x54c] ss:$16 sps:$4 sm:$0xff]   ;;  %v8982_v6 = vld [vmem:[%s12427_s1 + $0x540] ss:$16 sps:$4 sm:$0xff]  }
  0x7c   : > { %2050 = vmatprep.subr.bf16.mxu0 %v8894_v7  ;;  %2502 = vmatprep.subr.bf16.mxu1 %v8897_v8  ;;  %v8985_v7 = vld [vmem:[%s12427_s1 + $0x548] ss:$16 sps:$4 sm:$0xff]   ;;  %v8990_v8 = vld [vmem:[%s12427_s1 + $0x564] ss:$16 sps:$4 sm:$0xff]  }
  0x7e   : > { %2012 = vmatmul.mubr.bf16.gmra.mrb[28].mxu0 %v8891_v9  ;;  %2464 = vmatmul.mubr.bf16.gmra.mrb[28].mxu1 %v8891_v9  ;;  %v8993_v9 = vld [vmem:[%s12427_s1 + $0x56c] ss:$16 sps:$4 sm:$0xff]  }
  0x7f   : > { %2051 = vmatpush1.bf16.msra.mxu0 %v8892_v10  ;;  %2503 = vmatpush1.bf16.msra.mxu1 %v8895_v11  ;;  %v8994_v10 = vld [vmem:[%s10123_s28 + $0x15c] ss:$28 sps:$4 sm:$0xff]   ;;  %v8988_v11 = vld [vmem:[%s12427_s1 + $0x560] ss:$16 sps:$4 sm:$0xff]  }
  0x80   : > { %2052 = vmatprep.subr.bf16.mxu0 %v8900_v12  ;;  %2504 = vmatprep.subr.bf16.mxu1 %v8903_v13  ;;  %v8991_v12 = vld [vmem:[%s12427_s1 + $0x568] ss:$16 sps:$4 sm:$0xff]   ;;  %v8999_v13 = vld [vmem:[%s12427_s1 + $0x584] ss:$16 sps:$4 sm:$0xff]  }
  0x81   : > { %2054 = vmatprep.mubr.bf16.mxu0 %v8906_v14  ;;  %2506 = vmatprep.mubr.bf16.mxu1 %v8906_v14  ;;  %v9002_v14 = vld [vmem:[%s12427_s1 + $0x58c] ss:$16 sps:$4 sm:$0xff]  }
  0x83   : > { %2053 = vmatpush1.bf16.msra.mxu0 %v8898_v15  ;;  %2505 = vmatpush1.bf16.msra.mxu1 %v8901_v16  ;;  %v8996_v15 = vld [vmem:[%s10123_s28 + $0x158] ss:$28 sps:$4 sm:$0xff]   ;;  %v8997_v16 = vld [vmem:[%s12427_s1 + $0x580] ss:$16 sps:$4 sm:$0xff]  }
  0x84   : > { %2135 = vmatprep.subr.bf16.mxu0 %v8909_v17  ;;  %2587 = vmatprep.subr.bf16.mxu1 %v8912_v18  ;;  %v9000_v17 = vld [vmem:[%s12427_s1 + $0x588] ss:$16 sps:$4 sm:$0xff]   ;;  %v9005_v18 = vld [vmem:[%s12427_s1 + $0x5a4] ss:$16 sps:$4 sm:$0xff]  }
  0x86   : > { %2055 = vmatmul.mubr.bf16.vlgmr.msra.gmra.mrb[0].mxu0 %v8904_v19  ;;  %2507 = vmatmul.mubr.bf16.vlgmr.msra.gmra.mrb[0].mxu1 %v8904_v19  ;;  %v9008_v19 = vld [vmem:[%s12427_s1 + $0x5ac] ss:$16 sps:$4 sm:$0xff]  }
  0x87   : > { %2136 = vmatpush1.bf16.msra.mxu0 %v8907_v20  ;;  %2588 = vmatpush1.bf16.msra.mxu1 %v8910_v21  ;;  %v9009_v20 = vld [vmem:[%s10123_s28 + $0x194] ss:$28 sps:$4 sm:$0xff]  }
  0x88   : > { %2137 = vmatprep.subr.bf16.mxu0 %v8915_v22  ;;  %2589 = vmatprep.subr.bf16.mxu1 %v8918_v23  ;;  %v9003_v21 = vld [vmem:[%s12427_s1 + $0x5a0] ss:$16 sps:$4 sm:$0xff]   ;;  %v9006_v22 = vld [vmem:[%s12427_s1 + $0x5a8] ss:$16 sps:$4 sm:$0xff]   ;;  %v9014_v23 = vld [vmem:[%s12427_s1 + $0x5c4] ss:$16 sps:$4 sm:$0xff]  }
  0x89   : > { %2064 = vmatprep.mubr.bf16.mxu0 %v8919_v24  ;;  %2516 = vmatprep.mubr.bf16.mxu1 %v8919_v24  ;;  %v9017_v24 = vld [vmem:[%s12427_s1 + $0x5cc] ss:$16 sps:$4 sm:$0xff]  }
  0x8b   : > { %2138 = vmatpush1.bf16.msra.mxu0 %v8913_v25  ;;  %2590 = vmatpush1.bf16.msra.mxu1 %v8916_v26  ;;  %v9011_v25 = vld [vmem:[%s10123_s28 + $0x190] ss:$28 sps:$4 sm:$0xff]  }
  0x8c   : > { %2139 = vmatprep.subr.bf16.mxu0 %v8924_v27  ;;  %2591 = vmatprep.subr.bf16.mxu1 %v8927_v28  ;;  %v9012_v26 = vld [vmem:[%s12427_s1 + $0x5c0] ss:$16 sps:$4 sm:$0xff]   ;;  %v9015_v27 = vld [vmem:[%s12427_s1 + $0x5c8] ss:$16 sps:$4 sm:$0xff]   ;;  %v9020_v28 = vld [vmem:[%s12427_s1 + $0x5e4] ss:$16 sps:$4 sm:$0xff]  }
  0x8e   : > { %2065 = vmatmul.mubr.bf16.gmra.mrb[4].mxu0 %v8921_v29  ;;  %2517 = vmatmul.mubr.bf16.gmra.mrb[4].mxu1 %v8921_v29  ;;  %v9023_v29 = vld [vmem:[%s12427_s1 + $0x5ec] ss:$16 sps:$4 sm:$0xff]  }
  0x8f   : > { %2140 = vmatpush1.bf16.msra.mxu0 %v8922_v30  ;;  %2592 = vmatpush1.bf16.msra.mxu1 %v8925_v31  ;;  %v9026_v30 = vld [vmem:[%s10123_s28 + $0x14] ss:$28 sps:$4 sm:$0xff]  }
  0x90   : > { %2141 = vmatprep.subr.bf16.mxu0 %v8930_v32  ;;  %2593 = vmatprep.subr.bf16.mxu1 %v8933_v33  ;;  %v9018_v31 = vld [vmem:[%s12427_s1 + $0x5e0] ss:$16 sps:$4 sm:$0xff]   ;;  %v9021_v32 = vld [vmem:[%s12427_s1 + $0x5e8] ss:$16 sps:$4 sm:$0xff]   ;;  %v9029_v33 = vld [vmem:[%s12427_s1 + $0x604] ss:$16 sps:$4 sm:$0xff]  }
  0x91   : > { %2074 = vmatprep.mubr.bf16.mxu0 %v8934_v34  ;;  %2526 = vmatprep.mubr.bf16.mxu1 %v8934_v34  ;;  %v9032_v34 = vld [vmem:[%s12427_s1 + $0x60c] ss:$16 sps:$4 sm:$0xff]  }
  0x93   : > { %2142 = vmatpush1.bf16.msra.mxu0 %v8928_v35  ;;  %2594 = vmatpush1.bf16.msra.mxu1 %v8931_v36  ;;  %v9024_v35 = vld [vmem:[%s10123_s28 + $0x10] ss:$28 sps:$4 sm:$0xff]  }
  0x94   : > { %2143 = vmatprep.subr.bf16.mxu0 %v8939_v37  ;;  %2595 = vmatprep.subr.bf16.mxu1 %v8942_v38  ;;  %v9027_v36 = vld [vmem:[%s12427_s1 + $0x600] ss:$16 sps:$4 sm:$0xff]   ;;  %v9030_v37 = vld [vmem:[%s12427_s1 + $0x608] ss:$16 sps:$4 sm:$0xff]  }
  0x95   : > { %v9033_v38 = vld [vmem:[%s10123_s28 + $0x4c] ss:$28 sps:$4 sm:$0xff]  }
  0x96   : > { %2075 = vmatmul.mubr.bf16.gmra.mrb[8].mxu0 %v8936_v39  ;;  %2527 = vmatmul.mubr.bf16.gmra.mrb[8].mxu1 %v8936_v39  ;;  %v9062_v39 = vld [vmem:[%s12429_s3 + $0x40] sm:$0xff]  }
  0x97   : > { %2144 = vmatpush1.bf16.msra.mxu0 %v8937_v40  ;;  %2596 = vmatpush1.bf16.msra.mxu1 %v8940_v41  ;;  %v9064_v40 = vld [vmem:[%s12429_s3 + $0xc0] sm:$0xff]  }
  0x98   : > { %2145 = vmatprep.subr.bf16.mxu0 %v8945_v42  ;;  %2597 = vmatprep.subr.bf16.mxu1 %v8948_v43  ;;  %v9035_v41 = vld [vmem:[%s10123_s28 + $0x48] ss:$28 sps:$4 sm:$0xff]   ;;  %v9038_v43 = vld [vmem:[%s10123_s28 + $0x80] ss:$28 sps:$4 sm:$0xff]  }
  0x99   : > { %2084 = vmatprep.mubr.bf16.mxu0 %v8949_v44  ;;  %2536 = vmatprep.mubr.bf16.mxu1 %v8949_v44  ;;  %v9036_v42 = vld [vmem:[%s10123_s28 + $0x84] ss:$28 sps:$4 sm:$0xff]   ;;  %v9039_v44 = vld [vmem:[%s10123_s28 + $0xbc] ss:$28 sps:$4 sm:$0xff]  }
  0x9b   : > { %2146 = vmatpush1.bf16.msra.mxu0 %v8943_v45  ;;  %2598 = vmatpush1.bf16.msra.mxu1 %v8946_v46  ;;  %v9041_v45 = vld [vmem:[%s10123_s28 + $0xb8] ss:$28 sps:$4 sm:$0xff]  }
  0x9c   : > { %2147 = vmatprep.subr.bf16.mxu0 %v8954_v47  ;;  %2599 = vmatprep.subr.bf16.mxu1 %v8957_v48  ;;  %v9042_v46 = vld [vmem:[%s10123_s28 + $0xf4] ss:$28 sps:$4 sm:$0xff]   ;;  %v9045_v48 = vld [vmem:[%s10123_s28 + $0x12c] ss:$28 sps:$4 sm:$0xff]  }
  0x9d   : > { %v9044_v47 = vld [vmem:[%s10123_s28 + $0xf0] ss:$28 sps:$4 sm:$0xff]  }
  0x9e   : > { %2085 = vmatmul.mubr.bf16.gmra.mrb[12].mxu0 %v8951_v49  ;;  %2537 = vmatmul.mubr.bf16.gmra.mrb[12].mxu1 %v8951_v49  ;;  %v9047_v49 = vld [vmem:[%s10123_s28 + $0x128] ss:$28 sps:$4 sm:$0xff]  }
  0x9f   : > { %2148 = vmatpush1.bf16.msra.mxu0 %v8952_v50  ;;  %2600 = vmatpush1.bf16.msra.mxu1 %v8955_v51  ;;  %v9048_v50 = vld [vmem:[%s10123_s28 + $0x164] ss:$28 sps:$4 sm:$0xff]  }
  0xa0   : > { %2149 = vmatprep.subr.bf16.mxu0 %v8960_v52  ;;  %2601 = vmatprep.subr.bf16.mxu1 %v8963_v53  ;;  %v9050_v51 = vld [vmem:[%s10123_s28 + $0x160] ss:$28 sps:$4 sm:$0xff]   ;;  %v9053_v53 = vld [vmem:[%s10123_s28 + $0x198] ss:$28 sps:$4 sm:$0xff]  }
  0xa1   : > { %2094 = vmatprep.mubr.bf16.mxu0 %v8964_v54  ;;  %2546 = vmatprep.mubr.bf16.mxu1 %v8964_v54  ;;  %v9051_v52 = vld [vmem:[%s10123_s28 + $0x19c] ss:$28 sps:$4 sm:$0xff]   ;;  %v9919_v54 = vmov 0  }
  0xa3   : > { %2150 = vmatpush1.bf16.msra.mxu0 %v8958_v55  ;;  %2602 = vmatpush1.bf16.msra.mxu1 %v8961_v56  ;;  %v9054_v55 = vld [vmem:[%s10123_s28 + $0x18] ss:$28 sps:$4 sm:$0xff]   ;;  %v9063_v56 = vld [vmem:[%s12429_s3] sm:$0xff]  }
  0xa4   : > { %2151 = vmatprep.subr.bf16.mxu0 %v8969_v57  ;;  %2603 = vmatprep.subr.bf16.mxu1 %v8972_v58  ;;  %v9065_v57 = vld [vmem:[%s12429_s3 + $0x80] sm:$0xff]   ;;  %v9066_v58 = vld [vmem:[%s12429_s3 + $0x48] sm:$0xff]  }
  0xa6   : > { %2095 = vmatmul.mubr.bf16.gmra.mrb[16].mxu0 %v8966_v59  ;;  %2547 = vmatmul.mubr.bf16.gmra.mrb[16].mxu1 %v8966_v59  ;;  %v9068_v59 = vld [vmem:[%s12429_s3 + $0xc8] sm:$0xff]  }
  0xa7   : > { %2152 = vmatpush1.bf16.msra.mxu0 %v8967_v60  ;;  %2604 = vmatpush1.bf16.msra.mxu1 %v8970_v61  ;;  %v9067_v60 = vld [vmem:[%s12429_s3 + $0x8] sm:$0xff]  }
  0xa8   : > { %2153 = vmatprep.subr.bf16.mxu0 %v8975_v62  ;;  %2605 = vmatprep.subr.bf16.mxu1 %v8978_v63  ;;  %v9069_v61 = vld [vmem:[%s12429_s3 + $0x88] sm:$0xff]   ;;  %v9070_v62 = vld [vmem:[%s12429_s3 + $0x50] sm:$0xff]  }
  0xa9   : > { %2104 = vmatprep.mubr.bf16.mxu0 %v8979_v1  ;;  %2556 = vmatprep.mubr.bf16.mxu1 %v8979_v1  ;;  %v9072_v63 = vld [vmem:[%s12429_s3 + $0xd0] sm:$0xff]  }
  0xaa   : > { %v9071_v1 = vld [vmem:[%s12429_s3 + $0x10] sm:$0xff]  }
  0xab   : > { %2154 = vmatpush1.bf16.msra.mxu0 %v8973_v0  ;;  %2606 = vmatpush1.bf16.msra.mxu1 %v8976_v2  ;;  %v9055_v0 = vld [vmem:[%s10123_s28 + $0x50] ss:$28 sps:$4 sm:$0xff]  }
  0xac   : > { %2155 = vmatprep.subr.bf16.mxu0 %v8984_v3  ;;  %2607 = vmatprep.subr.bf16.mxu1 %v8987_v5  ;;  %v9073_v2 = vld [vmem:[%s12429_s3 + $0x90] sm:$0xff]   ;;  %v9074_v3 = vld [vmem:[%s12429_s3 + $0x58] sm:$0xff]  }
  0xad   : > { %v9075_v5 = vld [vmem:[%s12429_s3 + $0x18] sm:$0xff]  }
  0xae   : > { %2105 = vmatmul.mubr.bf16.gmra.mrb[20].mxu0 %v8981_v4  ;;  %2557 = vmatmul.mubr.bf16.gmra.mrb[20].mxu1 %v8981_v4  ;;  %v9076_v4 = vld [vmem:[%s12429_s3 + $0xd8] sm:$0xff]  }
  0xaf   : > { %2156 = vmatpush1.bf16.msra.mxu0 %v8982_v6  ;;  %2608 = vmatpush1.bf16.msra.mxu1 %v8985_v7  ;;  %v9077_v6 = vld [vmem:[%s12429_s3 + $0x98] sm:$0xff]   ;;  %v9078_v7 = vld [vmem:[%s12429_s3 + $0x60] sm:$0xff]  }
  0xb0   : > { %2157 = vmatprep.subr.bf16.mxu0 %v8990_v8  ;;  %2609 = vmatprep.subr.bf16.mxu1 %v8993_v9  ;;  %v9080_v8 = vld [vmem:[%s12429_s3 + $0xe0] sm:$0xff]  }
  0xb1   : > { %2114 = vmatprep.mubr.bf16.mxu0 %v8994_v10  ;;  %2566 = vmatprep.mubr.bf16.mxu1 %v8994_v10  ;;  %v9056_v9 = vld [vmem:[%s10123_s28 + $0x88] ss:$28 sps:$4 sm:$0xff]  }
  0xb2   : > { %v9079_v10 = vld [vmem:[%s12429_s3 + $0x20] sm:$0xff]  }
  0xb3   : > { %2158 = vmatpush1.bf16.msra.mxu0 %v8988_v11  ;;  %2610 = vmatpush1.bf16.msra.mxu1 %v8991_v12  ;;  %v9081_v11 = vld [vmem:[%s12429_s3 + $0xa0] sm:$0xff]   ;;  %v9082_v12 = vld [vmem:[%s12429_s3 + $0x68] sm:$0xff]  }
  0xb4   : > { %2159 = vmatprep.subr.bf16.mxu0 %v8999_v13  ;;  %2611 = vmatprep.subr.bf16.mxu1 %v9002_v14  ;;  %v9084_v13 = vld [vmem:[%s12429_s3 + $0xe8] sm:$0xff]  }
  0xb5   : > { %v9083_v14 = vld [vmem:[%s12429_s3 + $0x28] sm:$0xff]  }
  0xb6   : > { %2115 = vmatmul.mubr.bf16.gmra.mrb[24].mxu0 %v8996_v15  ;;  %2567 = vmatmul.mubr.bf16.gmra.mrb[24].mxu1 %v8996_v15  ;;  %v9085_v15 = vld [vmem:[%s12429_s3 + $0xa8] sm:$0xff]  }
  0xb7   : > { %2160 = vmatpush1.bf16.msra.mxu0 %v8997_v16  ;;  %2612 = vmatpush1.bf16.msra.mxu1 %v9000_v17  ;;  %v9086_v16 = vld [vmem:[%s12429_s3 + $0x70] sm:$0xff]  }
  0xb8   : > { %2161 = vmatprep.subr.bf16.mxu0 %v9005_v18  ;;  %2613 = vmatprep.subr.bf16.mxu1 %v9008_v19  ;;  %v9088_v17 = vld [vmem:[%s12429_s3 + $0xf0] sm:$0xff]   ;;  %v9057_v18 = vld [vmem:[%s10123_s28 + $0xc0] ss:$28 sps:$4 sm:$0xff]  }
  0xb9   : > { %2124 = vmatprep.mubr.bf16.mxu0 %v9009_v20  ;;  %2576 = vmatprep.mubr.bf16.mxu1 %v9009_v20  ;;  %v9087_v19 = vld [vmem:[%s12429_s3 + $0x30] sm:$0xff]  }
  0xba   : > { %v9089_v20 = vld [vmem:[%s12429_s3 + $0xb0] sm:$0xff]  }
  0xbb   : > { %2162 = vmatpush1.bf16.msra.mxu0 %v9003_v21  ;;  %2614 = vmatpush1.bf16.msra.mxu1 %v9006_v22  ;;  %v9058_v21 = vld [vmem:[%s10123_s28 + $0xf8] ss:$28 sps:$4 sm:$0xff]   ;;  %v9059_v22 = vld [vmem:[%s10123_s28 + $0x130] ss:$28 sps:$4 sm:$0xff]  }
  0xbc   : > { %2163 = vmatprep.subr.bf16.mxu0 %v9014_v23  ;;  %2615 = vmatprep.subr.bf16.mxu1 %v9017_v24  ;;  %v9060_v23 = vld [vmem:[%s10123_s28 + $0x168] ss:$28 sps:$4 sm:$0xff]   ;;  %v9061_v24 = vld [vmem:[%s10123_s28 + $0x1a0] ss:$28 sps:$4 sm:$0xff]   ;;  %s11987_s28 = scalar_lea.vmem %s12435_s9, %s8678_s18 }
  0xbe   : > { %2125 = vmatmul.mubr.bf16.gmra.mrb[28].mxu0 %v9011_v25  ;;  %2577 = vmatmul.mubr.bf16.gmra.mrb[28].mxu1 %v9011_v25  ;;  %v9090_v25 = vld [vmem:[%s12429_s3 + $0x78] sm:$0xff]  }
  0xbf   : > { %2164 = vmatpush1.bf16.msra.mxu0 %v9012_v26  ;;  %2616 = vmatpush1.bf16.msra.mxu1 %v9015_v27  ;;  %v9092_v26 = vld [vmem:[%s12429_s3 + $0xf8] sm:$0xff]  }
  0xc0   : > { %2165 = vmatprep.subr.bf16.mxu0 %v9020_v28  ;;  %2617 = vmatprep.subr.bf16.mxu1 %v9023_v29  ;;  %v9091_v27 = vld [vmem:[%s12429_s3 + $0x38] sm:$0xff]   ;;  %v9096_v29 = vld [vmem:[%s12431_s5 + $0x4] ss:$16 sps:$4 sm:$0xff]  }
  0xc1   : > { %2167 = vmatprep.mubr.bf16.mxu0 %v9026_v30  ;;  %2619 = vmatprep.mubr.bf16.mxu1 %v9026_v30  ;;  %v9093_v28 = vld [vmem:[%s12429_s3 + $0xb8] sm:$0xff]  }
  0xc2   : > { %v9111_v30 = vld [vmem:[%s12431_s5 + $0xc] ss:$16 sps:$4 sm:$0xff]  }
  0xc3   : > { %2166 = vmatpush1.bf16.msra.mxu0 %v9018_v31  ;;  %2618 = vmatpush1.bf16.msra.mxu1 %v9021_v32  ;;  %v604_v31 = vlaneseq }
  0xc4   : > { %2248 = vmatprep.subr.bf16.mxu0 %v9029_v33  ;;  %2700 = vmatprep.subr.bf16.mxu1 %v9032_v34 }
  0xc5   : > { %v10768_v32 = vshrl.u32 %v604_v31, 7 }
  0xc6   : > { %2168 = vmatmul.mubr.bf16.vlgmr.msra.gmra.mrb[0].mxu0 %v9024_v35  ;;  %2620 = vmatmul.mubr.bf16.vlgmr.msra.gmra.mrb[0].mxu1 %v9024_v35  ;;  %v602_v35 = vld [vmem:[%s12428_s2] sm:$0xf] }
  0xc7   : > { %2249 = vmatpush1.bf16.msra.mxu0 %v9027_v36  ;;  %2701 = vmatpush1.bf16.msra.mxu1 %v9030_v37  ;;  %v10771_v33 = vsub.s32 0, %v10768_v32  ;;  %v10774_v34 = vsub.s32 2, %v10768_v32  ;;  %v10780_v36 = vsub.s32 1, %v10768_v32  ;;  %v10783_v37 = vsub.s32 3, %v10768_v32 }
  0xc8   : > { %2177 = vmatprep.mubr.bf16.mxu0 %v9033_v38  ;;  %2629 = vmatprep.mubr.bf16.mxu1 %v9033_v38 }
  0xc9   : > { %7974 = vmatprep.subr.bf16.mxu0 %v9062_v39  ;;  %8038 = vmatprep.subr.bf16.mxu1 %v9064_v40  ;;  %v10786_v38 = vrot.slane %v602_v35, %v10771_v33  ;;  %v10789_v39 = vrot.slane %v602_v35, %v10774_v34  ;;  %v10792_v40 = vrot.slane %v602_v35, %v10780_v36 }
  0xce   : > { %2178 = vmatmul.mubr.bf16.gmra.mrb[4].mxu0 %v9035_v41  ;;  %2630 = vmatmul.mubr.bf16.gmra.mrb[4].mxu1 %v9035_v41  ;;  %v10795_v41 = vrot.slane %v602_v35, %v10783_v37 }
  0xcf   : > { %2187 = vmatprep.mubr.bf16.mxu0 %v9036_v42  ;;  %2639 = vmatprep.mubr.bf16.mxu1 %v9036_v42 }
  0xd6   : > { %2188 = vmatmul.mubr.bf16.gmra.mrb[8].mxu0 %v9038_v43  ;;  %2640 = vmatmul.mubr.bf16.gmra.mrb[8].mxu1 %v9038_v43 }
  0xd7   : > { %2197 = vmatprep.mubr.bf16.mxu0 %v9039_v44  ;;  %2649 = vmatprep.mubr.bf16.mxu1 %v9039_v44 }
  0xde   : > { %2198 = vmatmul.mubr.bf16.gmra.mrb[12].mxu0 %v9041_v45  ;;  %2650 = vmatmul.mubr.bf16.gmra.mrb[12].mxu1 %v9041_v45 }
  0xdf   : > { %2207 = vmatprep.mubr.bf16.mxu0 %v9042_v46  ;;  %2659 = vmatprep.mubr.bf16.mxu1 %v9042_v46 }
  0xe6   : > { %2208 = vmatmul.mubr.bf16.gmra.mrb[16].mxu0 %v9044_v47  ;;  %2660 = vmatmul.mubr.bf16.gmra.mrb[16].mxu1 %v9044_v47 }
  0xe7   : > { %2217 = vmatprep.mubr.bf16.mxu0 %v9045_v48  ;;  %2669 = vmatprep.mubr.bf16.mxu1 %v9045_v48 }
  0xee   : > { %2218 = vmatmul.mubr.bf16.gmra.mrb[20].mxu0 %v9047_v49  ;;  %2670 = vmatmul.mubr.bf16.gmra.mrb[20].mxu1 %v9047_v49 }
  0xef   : > { %2227 = vmatprep.mubr.bf16.mxu0 %v9048_v50  ;;  %2679 = vmatprep.mubr.bf16.mxu1 %v9048_v50 }
  0xf6   : > { %2228 = vmatmul.mubr.bf16.gmra.mrb[24].mxu0 %v9050_v51  ;;  %2680 = vmatmul.mubr.bf16.gmra.mrb[24].mxu1 %v9050_v51 }
  0xf7   : > { %2237 = vmatprep.mubr.bf16.mxu0 %v9051_v52  ;;  %2689 = vmatprep.mubr.bf16.mxu1 %v9051_v52 }
  0xfe   : > { %2238 = vmatmul.mubr.bf16.gmra.mrb[28].mxu0 %v9053_v53  ;;  %2690 = vmatmul.mubr.bf16.gmra.mrb[28].mxu1 %v9053_v53 }
  0xff   : > { %2280 = vmatprep.mubr.bf16.mxu0 %v9919_v54  ;;  %2732 = vmatprep.mubr.bf16.mxu1 %v9919_v54 }
 0x106   : > { %7539 = vmatmul.mubr.msk.bf16.vlgmr.msra.gmra.mrb[0].mxu0 %vm1884_vm0, %v9054_v55  ;;  %7547 = vmatmul.mubr.msk.bf16.vlgmr.msra.gmra.mrb[0].mxu1 %vm1884_vm0, %v9054_v55 }
 0x107   : > { %2290 = vmatprep.mubr.bf16.mxu0 %v9919_v54  ;;  %2742 = vmatprep.mubr.bf16.mxu1 %v9919_v54 }
 0x108   : > { %7975 = vmatpush3.bf16.msra.mxu0 %v9063_v56  ;;  %8039 = vmatpush3.bf16.msra.mxu1 %v9065_v57 }
 0x109   : > { %7976 = vmatprep.subr.bf16.mxu0 %v9066_v58  ;;  %8040 = vmatprep.subr.bf16.mxu1 %v9068_v59 }
 0x10c   : > { %7977 = vmatpush3.bf16.msra.mxu0 %v9067_v60  ;;  %8041 = vmatpush3.bf16.msra.mxu1 %v9069_v61 }
 0x10d   : > { %7978 = vmatprep.subr.bf16.mxu0 %v9070_v62  ;;  %8042 = vmatprep.subr.bf16.mxu1 %v9072_v63 }
 0x10e   : > { %7540 = vmatmul.mubr.msk.bf16.gmra.mrb[4].mxu0 %vm1884_vm0, %v9055_v0  ;;  %7548 = vmatmul.mubr.msk.bf16.gmra.mrb[4].mxu1 %vm1884_vm0, %v9055_v0 }
 0x10f   : > { %2300 = vmatprep.mubr.bf16.mxu0 %v9919_v54  ;;  %2752 = vmatprep.mubr.bf16.mxu1 %v9919_v54 }
 0x110   : > { %7979 = vmatpush3.bf16.msra.mxu0 %v9071_v1  ;;  %8043 = vmatpush3.bf16.msra.mxu1 %v9073_v2 }
 0x111   : > { %7980 = vmatprep.subr.bf16.mxu0 %v9074_v3  ;;  %8044 = vmatprep.subr.bf16.mxu1 %v9076_v4 }
 0x114   : > { %7981 = vmatpush3.bf16.msra.mxu0 %v9075_v5  ;;  %8045 = vmatpush3.bf16.msra.mxu1 %v9077_v6 }
 0x115   : > { %7982 = vmatprep.subr.bf16.mxu0 %v9078_v7  ;;  %8046 = vmatprep.subr.bf16.mxu1 %v9080_v8 }
 0x116   : > { %7541 = vmatmul.mubr.msk.bf16.gmra.mrb[8].mxu0 %vm1884_vm0, %v9056_v9  ;;  %7549 = vmatmul.mubr.msk.bf16.gmra.mrb[8].mxu1 %vm1884_vm0, %v9056_v9  ;;  %v9094_v9 = vld [vmem:[%s12431_s5] ss:$16 sps:$4 sm:$0xff]  }
 0x117   : > { %2310 = vmatprep.mubr.bf16.mxu0 %v9919_v54  ;;  %2762 = vmatprep.mubr.bf16.mxu1 %v9919_v54 }
 0x118   : > { %7983 = vmatpush3.bf16.msra.mxu0 %v9079_v10  ;;  %8047 = vmatpush3.bf16.msra.mxu1 %v9081_v11  ;;  %v9109_v10 = vld [vmem:[%s12431_s5 + $0x8] ss:$16 sps:$4 sm:$0xff]  }
 0x119   : > { %7984 = vmatprep.subr.bf16.mxu0 %v9082_v12  ;;  %8048 = vmatprep.subr.bf16.mxu1 %v9084_v13 }
 0x11c   : > { %7985 = vmatpush3.bf16.msra.mxu0 %v9083_v14  ;;  %8049 = vmatpush3.bf16.msra.mxu1 %v9085_v15  ;;  %v9099_v15 = vld [vmem:[%s12431_s5 + $0x24] ss:$16 sps:$4 sm:$0xff]  }
 0x11d   : > { %7986 = vmatprep.subr.bf16.mxu0 %v9086_v16  ;;  %8050 = vmatprep.subr.bf16.mxu1 %v9088_v17  ;;  %v9114_v16 = vld [vmem:[%s12431_s5 + $0x2c] ss:$16 sps:$4 sm:$0xff]  }
 0x11e   : > { %7542 = vmatmul.mubr.msk.bf16.gmra.mrb[12].mxu0 %vm1884_vm0, %v9057_v18  ;;  %7550 = vmatmul.mubr.msk.bf16.gmra.mrb[12].mxu1 %vm1884_vm0, %v9057_v18 }
 0x11f   : > { %2320 = vmatprep.mubr.bf16.mxu0 %v9919_v54  ;;  %2772 = vmatprep.mubr.bf16.mxu1 %v9919_v54 }
 0x120   : > { %7987 = vmatpush3.bf16.msra.mxu0 %v9087_v19  ;;  %8051 = vmatpush3.bf16.msra.mxu1 %v9089_v20 }
 0x121   : > { %7988 = vmatprep.subr.bf16.mxu0 %v9090_v25  ;;  %8052 = vmatprep.subr.bf16.mxu1 %v9092_v26 }
 0x124   : > { %7989 = vmatpush3.bf16.msra.mxu0 %v9091_v27  ;;  %8053 = vmatpush3.bf16.msra.mxu1 %v9093_v28  ;;  %v9097_v27 = vld [vmem:[%s12431_s5 + $0x20] ss:$16 sps:$4 sm:$0xff]   ;;  %v9102_v28 = vld [vmem:[%s12431_s5 + $0x44] ss:$16 sps:$4 sm:$0xff]  }
 0x125   : > { %3604 = vmatprep.subr.bf16.mxu0 %v9096_v29  ;;  %3717 = vmatprep.subr.bf16.mxu1 %v9111_v30  ;;  %v9112_v29 = vld [vmem:[%s12431_s5 + $0x28] ss:$16 sps:$4 sm:$0xff]  }
 0x126   : > { %7543 = vmatmul.mubr.msk.bf16.gmra.mrb[16].mxu0 %vm1884_vm0, %v9058_v21  ;;  %7551 = vmatmul.mubr.msk.bf16.gmra.mrb[16].mxu1 %vm1884_vm0, %v9058_v21 }
 0x127   : > { %2330 = vmatprep.mubr.bf16.mxu0 %v9919_v54  ;;  %2782 = vmatprep.mubr.bf16.mxu1 %v9919_v54 }
 0x12e   : > { %7544 = vmatmul.mubr.msk.bf16.gmra.mrb[20].mxu0 %vm1884_vm0, %v9059_v22  ;;  %7552 = vmatmul.mubr.msk.bf16.gmra.mrb[20].mxu1 %vm1884_vm0, %v9059_v22 }
 0x12f   : > { %2340 = vmatprep.mubr.bf16.mxu0 %v9919_v54  ;;  %2792 = vmatprep.mubr.bf16.mxu1 %v9919_v54 }
 0x136   : > { %7545 = vmatmul.mubr.msk.bf16.gmra.mrb[24].mxu0 %vm1884_vm0, %v9060_v23  ;;  %7553 = vmatmul.mubr.msk.bf16.gmra.mrb[24].mxu1 %vm1884_vm0, %v9060_v23 }
 0x137   : > { %2350 = vmatprep.mubr.bf16.mxu0 %v9919_v54  ;;  %2802 = vmatprep.mubr.bf16.mxu1 %v9919_v54 }
 0x13e   : > { %7546 = vmatmul.mubr.msk.bf16.gmra.mrb[28].mxu0 %vm1884_vm0, %v9061_v24  ;;  %7554 = vmatmul.mubr.msk.bf16.gmra.mrb[28].mxu1 %vm1884_vm0, %v9061_v24 }
 0x1d9   : > { %v2282_v42 = vpop.f32.mrb[0].mxu0  ;;  %v2734_v43 = vpop.f32.mrb[0].mxu1 }
 0x1da   : > { %v8230_v44 = vadd.f32 %v2282_v42, %v10786_v38  ;;  %v8262_v45 = vadd.f32 %v2734_v43, %v10789_v39  ;;  %v2284_v46 = vpop.f32.mrb[1].mxu0  ;;  %v2736_v47 = vpop.f32.mrb[1].mxu1  ;;  %v9120_v43 = vld [vmem:[%s12431_s5 + $0x4c] ss:$16 sps:$4 sm:$0xff]  }
 0x1db   : > { %v8231_v48 = vadd.f32 %v2284_v46, %v10792_v40  ;;  %v8263_v49 = vadd.f32 %v2736_v47, %v10795_v41  ;;  %v2286_v50 = vpop.f32.mrb[2].mxu0  ;;  %v2738_v51 = vpop.f32.mrb[2].mxu1 }
 0x1dc   : > { %v8232_v52 = vadd.f32 %v2286_v50, %v10786_v38  ;;  %v8264_v53 = vadd.f32 %v2738_v51, %v10789_v39  ;;  %v2288_v55 = vpop.f32.mrb[3].mxu0  ;;  %v2740_v56 = vpop.f32.mrb[3].mxu1  ;;  %v2813_v59 = vmax.f32 %v8230_v44, 0.0  ;;  %v2815_v60 = vmax.f32 %v8262_v45, 0.0 }
 0x1dd   : > { %v8233_v57 = vadd.f32 %v2288_v55, %v10792_v40  ;;  %v8265_v58 = vadd.f32 %v2740_v56, %v10795_v41  ;;  %v2814_v63 = vmax.f32 %v8231_v48, 0.0  ;;  %v2816_v0 = vmax.f32 %v8263_v49, 0.0  ;;  %v9100_v55 = vld [vmem:[%s12431_s5 + $0x40] ss:$16 sps:$4 sm:$0xff]   ;;  %v9118_v56 = vld [vmem:[%s12431_s5 + $0x48] ss:$16 sps:$4 sm:$0xff]  }
 0x1de   : > { %v2817_v61 = vmax.f32 %v8232_v52, 0.0  ;;  %v2819_v62 = vmax.f32 %v8264_v53, 0.0 }
 0x1df   : > { %v2818_v1 = vmax.f32 %v8233_v57, 0.0  ;;  %v2820_v2 = vmax.f32 %v8265_v58, 0.0 }
 0x1e0   : > { %v2877_v3 = vpack.c.bf16 %v2817_v61, %v2813_v59  ;;  %v2879_v4 = vpack.c.bf16 %v2819_v62, %v2815_v60  ;;  %v9105_v61 = vld [vmem:[%s12431_s5 + $0x64] ss:$16 sps:$4 sm:$0xff]   ;;  %v9123_v62 = vld [vmem:[%s12431_s5 + $0x6c] ss:$16 sps:$4 sm:$0xff]  }
 0x1e1   : > { %v2878_v5 = vpack.c.bf16 %v2818_v1, %v2814_v63  ;;  %v2880_v6 = vpack.c.bf16 %v2820_v2, %v2816_v0  ;;  %v2292_v7 = vpop.f32.mrb[4].mxu0  ;;  %v2744_v8 = vpop.f32.mrb[4].mxu1 }
 0x1e2   : > { %v8234_v11 = vadd.f32 %v2292_v7, %v10786_v38  ;;  %v8266_v12 = vadd.f32 %v2744_v8, %v10789_v39  ;;  %v2294_v13 = vpop.f32.mrb[5].mxu0  ;;  %v2746_v14 = vpop.f32.mrb[5].mxu1 }
 0x1e3   : > { %v8235_v17 = vadd.f32 %v2294_v13, %v10792_v40  ;;  %v8267_v18 = vadd.f32 %v2746_v14, %v10795_v41  ;;  %v2296_v19 = vpop.f32.mrb[6].mxu0  ;;  %v2748_v20 = vpop.f32.mrb[6].mxu1  ;;  %3204 = vmatprep.mubr.bf16.mxu0 %v2878_v5  ;;  %3301 = vmatprep.mubr.bf16.mxu1 %v2880_v6 }
 0x1e4   : > { %v8236_v21 = vadd.f32 %v2296_v19, %v10786_v38  ;;  %v8268_v22 = vadd.f32 %v2748_v20, %v10789_v39  ;;  %v2298_v23 = vpop.f32.mrb[7].mxu0  ;;  %v2750_v24 = vpop.f32.mrb[7].mxu1  ;;  %3205 = vmatmul.mubr.bf16.vlgmr.msra.gmra.mrb[32].mxu0 %v2877_v3  ;;  %3302 = vmatmul.mubr.bf16.vlgmr.msra.gmra.mrb[32].mxu1 %v2879_v4  ;;  %v2821_v30 = vmax.f32 %v8234_v11, 0.0  ;;  %v2823_v31 = vmax.f32 %v8266_v12, 0.0  ;;  %v9121_v11 = vld [vmem:[%s12431_s5 + $0x68] ss:$16 sps:$4 sm:$0xff]  }
 0x1e5   : > { %v8237_v25 = vadd.f32 %v2298_v23, %v10792_v40  ;;  %v8269_v26 = vadd.f32 %v2750_v24, %v10795_v41  ;;  %3605 = vmatpush1.bf16.msra.mxu0 %v9094_v9  ;;  %3718 = vmatpush1.bf16.msra.mxu1 %v9109_v10  ;;  %v2822_v44 = vmax.f32 %v8235_v17, 0.0  ;;  %v2824_v45 = vmax.f32 %v8267_v18, 0.0  ;;  %v9103_v9 = vld [vmem:[%s12431_s5 + $0x60] ss:$16 sps:$4 sm:$0xff]   ;;  %v9108_v10 = vld [vmem:[%s12431_s5 + $0x84] ss:$16 sps:$4 sm:$0xff]  }
 0x1e6   : > { %v2825_v35 = vmax.f32 %v8236_v21, 0.0  ;;  %v2827_v42 = vmax.f32 %v8268_v22, 0.0  ;;  %3606 = vmatprep.subr.bf16.mxu0 %v9099_v15  ;;  %3719 = vmatprep.subr.bf16.mxu1 %v9114_v16  ;;  %v9129_v16 = vld [vmem:[%s12431_s5 + $0x8c] ss:$16 sps:$4 sm:$0xff]  }
 0x1e7   : > { %v2826_v46 = vmax.f32 %v8237_v25, 0.0  ;;  %v2828_v47 = vmax.f32 %v8269_v26, 0.0 }
 0x1e8   : > { %v2881_v48 = vpack.c.bf16 %v2825_v35, %v2821_v30  ;;  %v2883_v49 = vpack.c.bf16 %v2827_v42, %v2823_v31  ;;  %v9117_v42 = vld [vmem:[%s12431_s5 + $0xa4] ss:$16 sps:$4 sm:$0xff]  }
 0x1e9   : > { %v2882_v50 = vpack.c.bf16 %v2826_v46, %v2822_v44  ;;  %v2884_v51 = vpack.c.bf16 %v2828_v47, %v2824_v45  ;;  %v2302_v52 = vpop.f32.mrb[8].mxu0  ;;  %v2754_v53 = vpop.f32.mrb[8].mxu1  ;;  %3607 = vmatpush1.bf16.msra.mxu0 %v9097_v27  ;;  %3720 = vmatpush1.bf16.msra.mxu1 %v9112_v29  ;;  %v9106_v27 = vld [vmem:[%s12431_s5 + $0x80] ss:$16 sps:$4 sm:$0xff]  }
 0x1ea   : > { %v8238_v57 = vadd.f32 %v2302_v52, %v10786_v38  ;;  %v8270_v58 = vadd.f32 %v2754_v53, %v10789_v39  ;;  %v2304_v59 = vpop.f32.mrb[9].mxu0  ;;  %v2756_v60 = vpop.f32.mrb[9].mxu1  ;;  %3608 = vmatprep.subr.bf16.mxu0 %v9102_v28  ;;  %3721 = vmatprep.subr.bf16.mxu1 %v9120_v43  ;;  %v9127_v28 = vld [vmem:[%s12431_s5 + $0x88] ss:$16 sps:$4 sm:$0xff]   ;;  %v9115_v53 = vld [vmem:[%s12431_s5 + $0xa0] ss:$16 sps:$4 sm:$0xff]  }
 0x1eb   : > { %v8239_v63 = vadd.f32 %v2304_v59, %v10792_v40  ;;  %v8271_v0 = vadd.f32 %v2756_v60, %v10795_v41  ;;  %v2306_v1 = vpop.f32.mrb[10].mxu0  ;;  %v2758_v2 = vpop.f32.mrb[10].mxu1  ;;  %3212 = vmatprep.mubr.bf16.mxu0 %v2882_v50  ;;  %3309 = vmatprep.mubr.bf16.mxu1 %v2884_v51  ;;  %v9126_v59 = vld [vmem:[%s12431_s5 + $0xc4] ss:$16 sps:$4 sm:$0xff]  }
 0x1ec   : > { %v8240_v3 = vadd.f32 %v2306_v1, %v10786_v38  ;;  %v8272_v4 = vadd.f32 %v2758_v2, %v10789_v39  ;;  %v2308_v5 = vpop.f32.mrb[11].mxu0  ;;  %v2760_v6 = vpop.f32.mrb[11].mxu1  ;;  %3213 = vmatmul.mubr.bf16.gmra.mrb[36].mxu0 %v2881_v48  ;;  %3310 = vmatmul.mubr.bf16.gmra.mrb[36].mxu1 %v2883_v49  ;;  %v2829_v12 = vmax.f32 %v8238_v57, 0.0  ;;  %v2831_v13 = vmax.f32 %v8270_v58, 0.0 }
 0x1ed   : > { %v8241_v7 = vadd.f32 %v2308_v5, %v10792_v40  ;;  %v8273_v8 = vadd.f32 %v2760_v6, %v10795_v41  ;;  %3609 = vmatpush1.bf16.msra.mxu0 %v9100_v55  ;;  %3722 = vmatpush1.bf16.msra.mxu1 %v9118_v56  ;;  %v2830_v17 = vmax.f32 %v8239_v63, 0.0  ;;  %v2832_v18 = vmax.f32 %v8271_v0, 0.0  ;;  %v9124_v6 = vld [vmem:[%s12431_s5 + $0xc0] ss:$16 sps:$4 sm:$0xff]  }
 0x1ee   : > { %v2833_v14 = vmax.f32 %v8240_v3, 0.0  ;;  %v2835_v15 = vmax.f32 %v8272_v4, 0.0  ;;  %3610 = vmatprep.subr.bf16.mxu0 %v9105_v61  ;;  %3723 = vmatprep.subr.bf16.mxu1 %v9123_v62 }
 0x1ef   : > { %v2834_v19 = vmax.f32 %v8241_v7, 0.0  ;;  %v2836_v20 = vmax.f32 %v8273_v8, 0.0 }
 0x1f0   : > { %v2885_v21 = vpack.c.bf16 %v2833_v14, %v2829_v12  ;;  %v2887_v22 = vpack.c.bf16 %v2835_v15, %v2831_v13 }
 0x1f1   : > { %v2886_v23 = vpack.c.bf16 %v2834_v19, %v2830_v17  ;;  %v2888_v24 = vpack.c.bf16 %v2836_v20, %v2832_v18  ;;  %v2312_v25 = vpop.f32.mrb[12].mxu0  ;;  %v2764_v26 = vpop.f32.mrb[12].mxu1  ;;  %3611 = vmatpush1.bf16.msra.mxu0 %v9103_v9  ;;  %3724 = vmatpush1.bf16.msra.mxu1 %v9121_v11 }
 0x1f2   : > { %v8242_v29 = vadd.f32 %v2312_v25, %v10786_v38  ;;  %v8274_v30 = vadd.f32 %v2764_v26, %v10789_v39  ;;  %v2314_v31 = vpop.f32.mrb[13].mxu0  ;;  %v2766_v35 = vpop.f32.mrb[13].mxu1  ;;  %3612 = vmatprep.subr.bf16.mxu0 %v9108_v10  ;;  %3725 = vmatprep.subr.bf16.mxu1 %v9129_v16 }
 0x1f3   : > { %v8243_v43 = vadd.f32 %v2314_v31, %v10792_v40  ;;  %v8275_v44 = vadd.f32 %v2766_v35, %v10795_v41  ;;  %v2316_v45 = vpop.f32.mrb[14].mxu0  ;;  %v2768_v46 = vpop.f32.mrb[14].mxu1  ;;  %3220 = vmatprep.mubr.bf16.mxu0 %v2886_v23  ;;  %3317 = vmatprep.mubr.bf16.mxu1 %v2888_v24 }
 0x1f4   : > { %v8244_v47 = vadd.f32 %v2316_v45, %v10786_v38  ;;  %v8276_v48 = vadd.f32 %v2768_v46, %v10789_v39  ;;  %v2318_v49 = vpop.f32.mrb[15].mxu0  ;;  %v2770_v50 = vpop.f32.mrb[15].mxu1  ;;  %3221 = vmatmul.mubr.bf16.gmra.mrb[40].mxu0 %v2885_v21  ;;  %3318 = vmatmul.mubr.bf16.gmra.mrb[40].mxu1 %v2887_v22  ;;  %v2837_v55 = vmax.f32 %v8242_v29, 0.0  ;;  %v2839_v56 = vmax.f32 %v8274_v30, 0.0 }
 0x1f5   : > { %v8245_v51 = vadd.f32 %v2318_v49, %v10792_v40  ;;  %v8277_v52 = vadd.f32 %v2770_v50, %v10795_v41  ;;  %3613 = vmatpush1.bf16.msra.mxu0 %v9106_v27  ;;  %3726 = vmatpush1.bf16.msra.mxu1 %v9127_v28  ;;  %v2838_v60 = vmax.f32 %v8243_v43, 0.0  ;;  %v2840_v61 = vmax.f32 %v8275_v44, 0.0 }
 0x1f6   : > { %v2841_v57 = vmax.f32 %v8244_v47, 0.0  ;;  %v2843_v58 = vmax.f32 %v8276_v48, 0.0  ;;  %3614 = vmatprep.subr.bf16.mxu0 %v9117_v42 }
 0x1f7   : > { %v2842_v62 = vmax.f32 %v8245_v51, 0.0  ;;  %v2844_v63 = vmax.f32 %v8277_v52, 0.0 }
 0x1f8   : > { %v2889_v0 = vpack.c.bf16 %v2841_v57, %v2837_v55  ;;  %v2891_v1 = vpack.c.bf16 %v2843_v58, %v2839_v56 }
 0x1f9   : > { %v2890_v2 = vpack.c.bf16 %v2842_v62, %v2838_v60  ;;  %v2892_v3 = vpack.c.bf16 %v2844_v63, %v2840_v61  ;;  %v2322_v4 = vpop.f32.mrb[16].mxu0  ;;  %v2774_v5 = vpop.f32.mrb[16].mxu1  ;;  %3615 = vmatpush1.bf16.msra.mxu0 %v9115_v53 }
 0x1fa   : > { %v8246_v7 = vadd.f32 %v2322_v4, %v10786_v38  ;;  %v8278_v8 = vadd.f32 %v2774_v5, %v10789_v39  ;;  %v2324_v9 = vpop.f32.mrb[17].mxu0  ;;  %v2776_v10 = vpop.f32.mrb[17].mxu1  ;;  %3616 = vmatprep.subr.bf16.mxu0 %v9126_v59 }
 0x1fb   : > { %v8247_v11 = vadd.f32 %v2324_v9, %v10792_v40  ;;  %v8279_v12 = vadd.f32 %v2776_v10, %v10795_v41  ;;  %v2326_v13 = vpop.f32.mrb[18].mxu0  ;;  %v2778_v14 = vpop.f32.mrb[18].mxu1  ;;  %3228 = vmatprep.mubr.bf16.mxu0 %v2890_v2  ;;  %3325 = vmatprep.mubr.bf16.mxu1 %v2892_v3 }
 0x1fc   : > { %v8248_v15 = vadd.f32 %v2326_v13, %v10786_v38  ;;  %v8280_v16 = vadd.f32 %v2778_v14, %v10789_v39  ;;  %v2328_v17 = vpop.f32.mrb[19].mxu0  ;;  %v2780_v18 = vpop.f32.mrb[19].mxu1  ;;  %3229 = vmatmul.mubr.bf16.gmra.mrb[44].mxu0 %v2889_v0  ;;  %3326 = vmatmul.mubr.bf16.gmra.mrb[44].mxu1 %v2891_v1  ;;  %v2845_v21 = vmax.f32 %v8246_v7, 0.0  ;;  %v2847_v22 = vmax.f32 %v8278_v8, 0.0 }
 0x1fd   : > { %v8249_v19 = vadd.f32 %v2328_v17, %v10792_v40  ;;  %v8281_v20 = vadd.f32 %v2780_v18, %v10795_v41  ;;  %3617 = vmatpush1.bf16.msra.mxu0 %v9124_v6  ;;  %v2846_v25 = vmax.f32 %v8247_v11, 0.0  ;;  %v2848_v26 = vmax.f32 %v8279_v12, 0.0 }
 0x1fe   : > { %v2849_v23 = vmax.f32 %v8248_v15, 0.0  ;;  %v2851_v24 = vmax.f32 %v8280_v16, 0.0 }
 0x1ff   : > { %v2850_v27 = vmax.f32 %v8249_v19, 0.0  ;;  %v2852_v28 = vmax.f32 %v8281_v20, 0.0 }
 0x200   : > { %v2893_v29 = vpack.c.bf16 %v2849_v23, %v2845_v21  ;;  %v2895_v30 = vpack.c.bf16 %v2851_v24, %v2847_v22 }
 0x201   : > { %v2894_v31 = vpack.c.bf16 %v2850_v27, %v2846_v25  ;;  %v2896_v35 = vpack.c.bf16 %v2852_v28, %v2848_v26  ;;  %v2332_v42 = vpop.f32.mrb[20].mxu0  ;;  %v2784_v43 = vpop.f32.mrb[20].mxu1 }
 0x202   : > { %v8250_v44 = vadd.f32 %v2332_v42, %v10786_v38  ;;  %v8282_v45 = vadd.f32 %v2784_v43, %v10789_v39  ;;  %v2334_v46 = vpop.f32.mrb[21].mxu0  ;;  %v2786_v47 = vpop.f32.mrb[21].mxu1 }
 0x203   : > { %v8251_v48 = vadd.f32 %v2334_v46, %v10792_v40  ;;  %v8283_v49 = vadd.f32 %v2786_v47, %v10795_v41  ;;  %v2336_v50 = vpop.f32.mrb[22].mxu0  ;;  %v2788_v51 = vpop.f32.mrb[22].mxu1  ;;  %3236 = vmatprep.mubr.bf16.mxu0 %v2894_v31  ;;  %3333 = vmatprep.mubr.bf16.mxu1 %v2896_v35 }
 0x204   : > { %v8252_v52 = vadd.f32 %v2336_v50, %v10786_v38  ;;  %v8284_v53 = vadd.f32 %v2788_v51, %v10789_v39  ;;  %v2338_v55 = vpop.f32.mrb[23].mxu0  ;;  %v2790_v56 = vpop.f32.mrb[23].mxu1  ;;  %3237 = vmatmul.mubr.bf16.gmra.mrb[48].mxu0 %v2893_v29  ;;  %3334 = vmatmul.mubr.bf16.gmra.mrb[48].mxu1 %v2895_v30  ;;  %v2853_v59 = vmax.f32 %v8250_v44, 0.0  ;;  %v2855_v60 = vmax.f32 %v8282_v45, 0.0 }
 0x205   : > { %v8253_v57 = vadd.f32 %v2338_v55, %v10792_v40  ;;  %v8285_v58 = vadd.f32 %v2790_v56, %v10795_v41  ;;  %v2854_v63 = vmax.f32 %v8251_v48, 0.0  ;;  %v2856_v0 = vmax.f32 %v8283_v49, 0.0 }
 0x206   : > { %v2857_v61 = vmax.f32 %v8252_v52, 0.0  ;;  %v2859_v62 = vmax.f32 %v8284_v53, 0.0 }
 0x207   : > { %v2858_v1 = vmax.f32 %v8253_v57, 0.0  ;;  %v2860_v2 = vmax.f32 %v8285_v58, 0.0 }
 0x208   : > { %v2897_v3 = vpack.c.bf16 %v2857_v61, %v2853_v59  ;;  %v2899_v4 = vpack.c.bf16 %v2859_v62, %v2855_v60 }
 0x209   : > { %v2898_v5 = vpack.c.bf16 %v2858_v1, %v2854_v63  ;;  %v2900_v6 = vpack.c.bf16 %v2860_v2, %v2856_v0  ;;  %v2342_v7 = vpop.f32.mrb[24].mxu0  ;;  %v2794_v8 = vpop.f32.mrb[24].mxu1 }
 0x20a   : > { %v8254_v9 = vadd.f32 %v2342_v7, %v10786_v38  ;;  %v8286_v10 = vadd.f32 %v2794_v8, %v10789_v39  ;;  %v2344_v11 = vpop.f32.mrb[25].mxu0  ;;  %v2796_v12 = vpop.f32.mrb[25].mxu1  ;;  %v9138_v7 = vld [vmem:[%s12431_s5 + $0xcc] ss:$16 sps:$4 sm:$0xff]   ;;  %v9136_v8 = vld [vmem:[%s12431_s5 + $0xc8] ss:$16 sps:$4 sm:$0xff]  }
 0x20b   : > { %v8255_v13 = vadd.f32 %v2344_v11, %v10792_v40  ;;  %v8287_v14 = vadd.f32 %v2796_v12, %v10795_v41  ;;  %v2346_v15 = vpop.f32.mrb[26].mxu0  ;;  %v2798_v16 = vpop.f32.mrb[26].mxu1  ;;  %3244 = vmatprep.mubr.bf16.mxu0 %v2898_v5  ;;  %3341 = vmatprep.mubr.bf16.mxu1 %v2900_v6  ;;  %v9133_v11 = vld [vmem:[%s12431_s5 + $0xe0] ss:$16 sps:$4 sm:$0xff]   ;;  %v9139_v12 = vld [vmem:[%s12431_s5 + $0xe8] ss:$16 sps:$4 sm:$0xff]  }
 0x20c   : > { %v8256_v17 = vadd.f32 %v2346_v15, %v10786_v38  ;;  %v8288_v18 = vadd.f32 %v2798_v16, %v10789_v39  ;;  %v2348_v19 = vpop.f32.mrb[27].mxu0  ;;  %v2800_v20 = vpop.f32.mrb[27].mxu1  ;;  %3245 = vmatmul.mubr.bf16.gmra.mrb[52].mxu0 %v2897_v3  ;;  %3342 = vmatmul.mubr.bf16.gmra.mrb[52].mxu1 %v2899_v4  ;;  %v2861_v23 = vmax.f32 %v8254_v9, 0.0  ;;  %v2863_v24 = vmax.f32 %v8286_v10, 0.0  ;;  %v9135_v9 = vld [vmem:[%s12431_s5 + $0xe4] ss:$16 sps:$4 sm:$0xff]  }
 0x20d   : > { %v8257_v21 = vadd.f32 %v2348_v19, %v10792_v40  ;;  %v8289_v22 = vadd.f32 %v2800_v20, %v10795_v41  ;;  %v2862_v27 = vmax.f32 %v8255_v13, 0.0  ;;  %v2864_v28 = vmax.f32 %v8287_v14, 0.0  ;;  %v9141_v10 = vld [vmem:[%s12431_s5 + $0xec] ss:$16 sps:$4 sm:$0xff]   ;;  %3618 = vmatprep.subr.bf16.mxu0 %v9135_v9  ;;  %v9144_v13 = vld [vmem:[%s12433_s7 + $0x4] ss:$28 sps:$4 sm:$0xff]  }
 0x20e   : > { %v2865_v25 = vmax.f32 %v8256_v17, 0.0  ;;  %v2867_v26 = vmax.f32 %v8288_v18, 0.0  ;;  %3619 = vmatpush1.bf16.msra.mxu0 %v9133_v11  ;;  %v9147_v14 = vld [vmem:[%s12433_s7 + $0xc] ss:$28 sps:$4 sm:$0xff]   ;;  %v10962_v17 = vld [vmem:[%s12430_s4] ss:$0 sm:$0xff] }
 0x20f   : > { %v2866_v29 = vmax.f32 %v8257_v21, 0.0  ;;  %v2868_v30 = vmax.f32 %v8289_v22, 0.0  ;;  %5371 = vmatprep.subr.bf16.mxu0 %v9144_v13 }
 0x210   : > { %v2901_v31 = vpack.c.bf16 %v2865_v25, %v2861_v23  ;;  %v2903_v35 = vpack.c.bf16 %v2867_v26, %v2863_v24 }
 0x211   : > { %v2902_v42 = vpack.c.bf16 %v2866_v29, %v2862_v27  ;;  %v2904_v43 = vpack.c.bf16 %v2868_v30, %v2864_v28  ;;  %v2352_v44 = vpop.f32.mrb[28].mxu0  ;;  %v2804_v45 = vpop.f32.mrb[28].mxu1 }
 0x212   : > { %v8258_v46 = vadd.f32 %v2352_v44, %v10786_v38  ;;  %v8290_v47 = vadd.f32 %v2804_v45, %v10789_v39  ;;  %v2354_v48 = vpop.f32.mrb[29].mxu0  ;;  %v2806_v49 = vpop.f32.mrb[29].mxu1 }
 0x213   : > { %v8259_v50 = vadd.f32 %v2354_v48, %v10792_v40  ;;  %v8291_v51 = vadd.f32 %v2806_v49, %v10795_v41  ;;  %v2356_v52 = vpop.f32.mrb[30].mxu0  ;;  %v2808_v53 = vpop.f32.mrb[30].mxu1  ;;  %3252 = vmatprep.mubr.bf16.mxu0 %v2902_v42  ;;  %3349 = vmatprep.mubr.bf16.mxu1 %v2904_v43 }
 0x214   : > { %v8260_v55 = vadd.f32 %v2356_v52, %v10786_v38  ;;  %v8292_v56 = vadd.f32 %v2808_v53, %v10789_v39  ;;  %v2358_v57 = vpop.f32.mrb[31].mxu0  ;;  %v2810_v58 = vpop.f32.mrb[31].mxu1  ;;  %3253 = vmatmul.mubr.bf16.gmra.mrb[56].mxu0 %v2901_v31  ;;  %3350 = vmatmul.mubr.bf16.gmra.mrb[56].mxu1 %v2903_v35  ;;  %v2869_v61 = vmax.f32 %v8258_v46, 0.0  ;;  %v2871_v62 = vmax.f32 %v8290_v47, 0.0 }
 0x215   : > { %v8261_v59 = vadd.f32 %v2358_v57, %v10792_v40  ;;  %v8293_v60 = vadd.f32 %v2810_v58, %v10795_v41  ;;  %v2870_v1 = vmax.f32 %v8259_v50, 0.0  ;;  %v2872_v2 = vmax.f32 %v8291_v51, 0.0  ;;  %v9132_v40 = vld [vmem:[%s12431_s5 + $0xac] ss:$16 sps:$4 sm:$0xff]   ;;  %v9130_v41 = vld [vmem:[%s12431_s5 + $0xa8] ss:$16 sps:$4 sm:$0xff]  }
 0x216   : > { %v2873_v63 = vmax.f32 %v8260_v55, 0.0  ;;  %v2875_v0 = vmax.f32 %v8292_v56, 0.0  ;;  %3727 = vmatprep.subr.bf16.mxu1 %v9132_v40  ;;  %v9142_v58 = vld [vmem:[%s12433_s7] ss:$28 sps:$4 sm:$0xff]  }
 0x217   : > { %v2874_v3 = vmax.f32 %v8261_v59, 0.0  ;;  %v2876_v4 = vmax.f32 %v8293_v60, 0.0  ;;  %3728 = vmatpush1.bf16.msra.mxu1 %v9130_v41  ;;  %v9145_v59 = vld [vmem:[%s12433_s7 + $0x8] ss:$28 sps:$4 sm:$0xff]   ;;  %v9150_v60 = vld [vmem:[%s12433_s7 + $0x3c] ss:$28 sps:$4 sm:$0xff]  }
 0x218   : > { %v2905_v5 = vpack.c.bf16 %v2873_v63, %v2869_v61  ;;  %v2907_v38 = vpack.c.bf16 %v2875_v0, %v2871_v62  ;;  %3729 = vmatprep.subr.bf16.mxu1 %v9138_v7  ;;  %v9153_v61 = vld [vmem:[%s12433_s7 + $0x44] ss:$28 sps:$4 sm:$0xff]  }
 0x219   : > { %v2906_v6 = vpack.c.bf16 %v2874_v3, %v2870_v1  ;;  %v2908_v39 = vpack.c.bf16 %v2876_v4, %v2872_v2  ;;  %v9148_v3 = vld [vmem:[%s12433_s7 + $0x38] ss:$28 sps:$4 sm:$0xff]  }
 0x21b   : > { %3260 = vmatprep.mubr.bf16.mxu0 %v2906_v6  ;;  %3357 = vmatprep.mubr.bf16.mxu1 %v2908_v39  ;;  %v9156_v6 = vld [vmem:[%s12433_s7 + $0x74] ss:$28 sps:$4 sm:$0xff]  }
 0x21c   : > { %3261 = vmatmul.mubr.bf16.gmra.mrb[60].mxu0 %v2905_v5  ;;  %3358 = vmatmul.mubr.bf16.gmra.mrb[60].mxu1 %v2907_v38  ;;  %v9151_v38 = vld [vmem:[%s12433_s7 + $0x40] ss:$28 sps:$4 sm:$0xff]  }
 0x21d   : > { %3636 = vmatprep.mubr.bf16.mxu0 %v9919_v54  ;;  %3749 = vmatprep.mubr.bf16.mxu1 %v9919_v54 }
 0x21e   : > { %3730 = vmatpush1.bf16.msra.mxu1 %v9136_v8 }
 0x21f   : > { %3731 = vmatprep.subr.bf16.mxu1 %v9141_v10 }
 0x222   : > { %3732 = vmatpush1.bf16.msra.mxu1 %v9139_v12 }
 0x223   : > { %5597 = vmatprep.subr.bf16.mxu1 %v9147_v14 }
 0x2b7   : > { %v7990_v15 = vpop.f32.mrb[32].mxu0  ;;  %v8054_v16 = vpop.f32.mrb[32].mxu1 }
 0x2b8   : > { %v7991_v18 = vpop.f32.mrb[33].mxu0  ;;  %v8055_v19 = vpop.f32.mrb[33].mxu1 }
 0x2b9   : > { %v7992_v20 = vadd.f32 %v7991_v18, %v7990_v15  ;;  %v8056_v21 = vadd.f32 %v8055_v19, %v8054_v16  ;;  %v7993_v22 = vpop.f32.mrb[34].mxu0  ;;  %v8057_v23 = vpop.f32.mrb[34].mxu1  ;;  %v9154_v16 = vld [vmem:[%s12433_s7 + $0x70] ss:$28 sps:$4 sm:$0xff]   ;;  %v9159_v18 = vld [vmem:[%s12433_s7 + $0x7c] ss:$28 sps:$4 sm:$0xff]  }
 0x2ba   : > { %v7994_v24 = vpop.f32.mrb[35].mxu0  ;;  %v8058_v25 = vpop.f32.mrb[35].mxu1  ;;  %v9157_v19 = vld [vmem:[%s12433_s7 + $0x78] ss:$28 sps:$4 sm:$0xff]  }
 0x2bb   : > { %v3207_v26 = vadd.f32 %v7992_v20, %v10962_v17  ;;  %v7995_v27 = vadd.f32 %v7994_v24, %v7993_v22  ;;  %v8059_v28 = vadd.f32 %v8058_v25, %v8057_v23  ;;  %v9162_v20 = vld [vmem:[%s12433_s7 + $0xac] ss:$28 sps:$4 sm:$0xff]   ;;  %v9165_v23 = vld [vmem:[%s12433_s7 + $0xb4] ss:$28 sps:$4 sm:$0xff]  }
 0x2bd   : > { %v3304_v29 = vadd.f32 %v8056_v21, %v3207_v26  ;;  %v3210_v30 = vadd.f32 %v7995_v27, %v10962_v17  ;;  %v9160_v27 = vld [vmem:[%s12433_s7 + $0xa8] ss:$28 sps:$4 sm:$0xff]  }
 0x2bf   : > { %v3307_v31 = vadd.f32 %v8059_v28, %v3210_v30  ;;  %v7996_v35 = vpop.f32.mrb[36].mxu0  ;;  %v8060_v42 = vpop.f32.mrb[36].mxu1  ;;  %v3366_v45 = vmax.f32 %v3304_v29, 0.0  ;;  %v9163_v30 = vld [vmem:[%s12433_s7 + $0xb0] ss:$28 sps:$4 sm:$0xff]  }
 0x2c0   : > { %v7997_v43 = vpop.f32.mrb[37].mxu0  ;;  %v8061_v44 = vpop.f32.mrb[37].mxu1 }
 0x2c1   : > { %v3367_v46 = vmax.f32 %v3307_v31, 0.0  ;;  %v7998_v47 = vadd.f32 %v7997_v43, %v7996_v35  ;;  %v8062_v48 = vadd.f32 %v8061_v44, %v8060_v42  ;;  %v7999_v49 = vpop.f32.mrb[38].mxu0  ;;  %v8063_v50 = vpop.f32.mrb[38].mxu1  ;;  %v9168_v31 = vld [vmem:[%s12433_s7 + $0xe4] ss:$28 sps:$4 sm:$0xff]  }
 0x2c2   : > { %v8000_v51 = vpop.f32.mrb[39].mxu0  ;;  %v8064_v52 = vpop.f32.mrb[39].mxu1 }
 0x2c3   : > { %v3382_v53 = vpack.c.bf16 %v3367_v46, %v3366_v45  ;;  %v3215_v55 = vadd.f32 %v7998_v47, %v10962_v17  ;;  %v8001_v56 = vadd.f32 %v8000_v51, %v7999_v49  ;;  %v8065_v57 = vadd.f32 %v8064_v52, %v8063_v50 }
 0x2c5   : > { %v3312_v62 = vadd.f32 %v8062_v48, %v3215_v55  ;;  %v3218_v63 = vadd.f32 %v8001_v56, %v10962_v17  ;;  %3637 = vmatmul.mubr.bf16.vlgmr.msra.gmra.mrb[64].mxu0 %v3382_v53  ;;  %3750 = vmatmul.mubr.bf16.vlgmr.msra.gmra.mrb[64].mxu1 %v3382_v53  ;;  %v9166_v53 = vld [vmem:[%s12433_s7 + $0xe0] ss:$28 sps:$4 sm:$0xff]   ;;  %v9171_v55 = vld [vmem:[%s12433_s7 + $0xec] ss:$28 sps:$4 sm:$0xff]  }
 0x2c6   : > { %3646 = vmatprep.mubr.bf16.mxu0 %v9919_v54  ;;  %3759 = vmatprep.mubr.bf16.mxu1 %v9919_v54  ;;  %v9169_v56 = vld [vmem:[%s12433_s7 + $0xe8] ss:$28 sps:$4 sm:$0xff]  }
 0x2c7   : > { %v3315_v0 = vadd.f32 %v8065_v57, %v3218_v63  ;;  %v8002_v1 = vpop.f32.mrb[40].mxu0  ;;  %v8066_v2 = vpop.f32.mrb[40].mxu1  ;;  %5372 = vmatpush1.bf16.msra.mxu0 %v9142_v58  ;;  %5598 = vmatpush1.bf16.msra.mxu1 %v9145_v59  ;;  %v3368_v39 = vmax.f32 %v3312_v62, 0.0  ;;  %v9174_v57 = vld [vmem:[%s12433_s7 + $0x11c] ss:$28 sps:$4 sm:$0xff]  }
 0x2c8   : > { %v8003_v4 = vpop.f32.mrb[41].mxu0  ;;  %v8067_v5 = vpop.f32.mrb[41].mxu1  ;;  %5373 = vmatprep.subr.bf16.mxu0 %v9150_v60  ;;  %5599 = vmatprep.subr.bf16.mxu1 %v9153_v61  ;;  %v9177_v60 = vld [vmem:[%s12433_s7 + $0x124] ss:$28 sps:$4 sm:$0xff]  }
 0x2c9   : > { %v3369_v40 = vmax.f32 %v3315_v0, 0.0  ;;  %v8004_v41 = vadd.f32 %v8003_v4, %v8002_v1  ;;  %v8068_v7 = vadd.f32 %v8067_v5, %v8066_v2  ;;  %v8005_v8 = vpop.f32.mrb[42].mxu0  ;;  %v8069_v9 = vpop.f32.mrb[42].mxu1  ;;  %v9172_v0 = vld [vmem:[%s12433_s7 + $0x118] ss:$28 sps:$4 sm:$0xff]  }
 0x2ca   : > { %v8006_v10 = vpop.f32.mrb[43].mxu0  ;;  %v8070_v11 = vpop.f32.mrb[43].mxu1  ;;  %v9180_v4 = vld [vmem:[%s12433_s7 + $0x154] ss:$28 sps:$4 sm:$0xff]  }
 0x2cb   : > { %v3223_v12 = vadd.f32 %v8004_v41, %v10962_v17  ;;  %v8007_v13 = vadd.f32 %v8006_v10, %v8005_v8  ;;  %v8071_v14 = vadd.f32 %v8070_v11, %v8069_v9  ;;  %v3383_v15 = vpack.c.bf16 %v3369_v40, %v3368_v39  ;;  %5374 = vmatpush1.bf16.msra.mxu0 %v9148_v3  ;;  %v9175_v3 = vld [vmem:[%s12433_s7 + $0x120] ss:$28 sps:$4 sm:$0xff]  }
 0x2cc   : > { %5600 = vmatpush1.bf16.msra.mxu1 %v9151_v38  ;;  %5375 = vmatprep.subr.bf16.mxu0 %v9156_v6 }
 0x2cd   : > { %v3320_v21 = vadd.f32 %v8068_v7, %v3223_v12  ;;  %v3226_v22 = vadd.f32 %v8007_v13, %v10962_v17  ;;  %3647 = vmatmul.mubr.bf16.gmra.mrb[68].mxu0 %v3383_v15  ;;  %3760 = vmatmul.mubr.bf16.gmra.mrb[68].mxu1 %v3383_v15  ;;  %v9178_v13 = vld [vmem:[%s12433_s7 + $0x150] ss:$28 sps:$4 sm:$0xff]   ;;  %v9181_v15 = vld [vmem:[%s12433_s7 + $0x158] ss:$28 sps:$4 sm:$0xff]  }
 0x2ce   : > { %3656 = vmatprep.mubr.bf16.mxu0 %v9919_v54  ;;  %3769 = vmatprep.mubr.bf16.mxu1 %v9919_v54 }
 0x2cf   : > { %v3323_v24 = vadd.f32 %v8071_v14, %v3226_v22  ;;  %v8008_v25 = vpop.f32.mrb[44].mxu0  ;;  %v8072_v26 = vpop.f32.mrb[44].mxu1  ;;  %5601 = vmatprep.subr.bf16.mxu1 %v9159_v18  ;;  %5376 = vmatpush1.bf16.msra.mxu0 %v9154_v16  ;;  %v3370_v35 = vmax.f32 %v3320_v21, 0.0  ;;  %v9183_v14 = vld [vmem:[%s12433_s7 + $0x15c] ss:$28 sps:$4 sm:$0xff]  }
 0x2d0   : > { %v8009_v28 = vpop.f32.mrb[45].mxu0  ;;  %v8073_v29 = vpop.f32.mrb[45].mxu1  ;;  %5602 = vmatpush1.bf16.msra.mxu1 %v9157_v19  ;;  %5377 = vmatprep.subr.bf16.mxu0 %v9162_v20  ;;  %v9186_v16 = vld [vmem:[%s12433_s7 + $0x18c] ss:$28 sps:$4 sm:$0xff]   ;;  %v9189_v20 = vld [vmem:[%s12433_s7 + $0x194] ss:$28 sps:$4 sm:$0xff]  }
 0x2d1   : > { %v3371_v42 = vmax.f32 %v3323_v24, 0.0  ;;  %v8010_v43 = vadd.f32 %v8009_v28, %v8008_v25  ;;  %v8074_v44 = vadd.f32 %v8073_v29, %v8072_v26  ;;  %v8011_v45 = vpop.f32.mrb[46].mxu0  ;;  %v8075_v46 = vpop.f32.mrb[46].mxu1  ;;  %5603 = vmatprep.subr.bf16.mxu1 %v9165_v23  ;;  %v9184_v24 = vld [vmem:[%s12433_s7 + $0x188] ss:$28 sps:$4 sm:$0xff]  }
 0x2d2   : > { %v8012_v47 = vpop.f32.mrb[47].mxu0  ;;  %v8076_v48 = vpop.f32.mrb[47].mxu1  ;;  %v9192_v28 = vld [vmem:[%s12433_s7 + $0x1c4] ss:$28 sps:$4 sm:$0xff]  }
 0x2d3   : > { %v3231_v49 = vadd.f32 %v8010_v43, %v10962_v17  ;;  %v8013_v50 = vadd.f32 %v8012_v47, %v8011_v45  ;;  %v8077_v51 = vadd.f32 %v8076_v48, %v8075_v46  ;;  %v3384_v52 = vpack.c.bf16 %v3371_v42, %v3370_v35  ;;  %5378 = vmatpush1.bf16.msra.mxu0 %v9160_v27  ;;  %v9187_v27 = vld [vmem:[%s12433_s7 + $0x190] ss:$28 sps:$4 sm:$0xff]  }
 0x2d4   : > { %5604 = vmatpush1.bf16.msra.mxu1 %v9163_v30  ;;  %5379 = vmatprep.subr.bf16.mxu0 %v9168_v31 }
 0x2d5   : > { %v3328_v58 = vadd.f32 %v8074_v44, %v3231_v49  ;;  %v3234_v59 = vadd.f32 %v8013_v50, %v10962_v17  ;;  %3657 = vmatmul.mubr.bf16.gmra.mrb[72].mxu0 %v3384_v52  ;;  %3770 = vmatmul.mubr.bf16.gmra.mrb[72].mxu1 %v3384_v52  ;;  %v9190_v50 = vld [vmem:[%s12433_s7 + $0x1c0] ss:$28 sps:$4 sm:$0xff]   ;;  %v9193_v52 = vld [vmem:[%s12433_s7 + $0x1c8] ss:$28 sps:$4 sm:$0xff]  }
 0x2d6   : > { %3666 = vmatprep.mubr.bf16.mxu0 %v9919_v54  ;;  %3779 = vmatprep.mubr.bf16.mxu1 %v9919_v54 }
 0x2d7   : > { %v3331_v61 = vadd.f32 %v8077_v51, %v3234_v59  ;;  %v8014_v62 = vpop.f32.mrb[48].mxu0  ;;  %v8078_v63 = vpop.f32.mrb[48].mxu1  ;;  %5605 = vmatprep.subr.bf16.mxu1 %v9171_v55  ;;  %5380 = vmatpush1.bf16.msra.mxu0 %v9166_v53  ;;  %v3372_v5 = vmax.f32 %v3328_v58, 0.0  ;;  %v9195_v51 = vld [vmem:[%s12433_s7 + $0x1cc] ss:$28 sps:$4 sm:$0xff]  }
 0x2d8   : > { %v8015_v1 = vpop.f32.mrb[49].mxu0  ;;  %v8079_v2 = vpop.f32.mrb[49].mxu1  ;;  %5606 = vmatpush1.bf16.msra.mxu1 %v9169_v56  ;;  %5381 = vmatprep.subr.bf16.mxu0 %v9174_v57  ;;  %v9198_v53 = vld [vmem:[%s12433_s7 + $0x1fc] ss:$28 sps:$4 sm:$0xff]   ;;  %v9201_v57 = vld [vmem:[%s12433_s7 + $0x204] ss:$28 sps:$4 sm:$0xff]  }
 0x2d9   : > { %v3373_v38 = vmax.f32 %v3331_v61, 0.0  ;;  %v8016_v6 = vadd.f32 %v8015_v1, %v8014_v62  ;;  %v8080_v39 = vadd.f32 %v8079_v2, %v8078_v63  ;;  %v8017_v40 = vpop.f32.mrb[50].mxu0  ;;  %v8081_v41 = vpop.f32.mrb[50].mxu1  ;;  %5607 = vmatprep.subr.bf16.mxu1 %v9177_v60  ;;  %v9196_v61 = vld [vmem:[%s12433_s7 + $0x1f8] ss:$28 sps:$4 sm:$0xff]  }
 0x2da   : > { %v8018_v7 = vpop.f32.mrb[51].mxu0  ;;  %v8082_v8 = vpop.f32.mrb[51].mxu1  ;;  %v9204_v1 = vld [vmem:[%s12433_s7 + $0x234] ss:$28 sps:$4 sm:$0xff]  }
 0x2db   : > { %v3239_v9 = vadd.f32 %v8016_v6, %v10962_v17  ;;  %v8019_v10 = vadd.f32 %v8018_v7, %v8017_v40  ;;  %v8083_v11 = vadd.f32 %v8082_v8, %v8081_v41  ;;  %v3385_v12 = vpack.c.bf16 %v3373_v38, %v3372_v5  ;;  %5382 = vmatpush1.bf16.msra.mxu0 %v9172_v0  ;;  %v9199_v0 = vld [vmem:[%s12433_s7 + $0x200] ss:$28 sps:$4 sm:$0xff]  }
 0x2dc   : > { %5608 = vmatpush1.bf16.msra.mxu1 %v9175_v3  ;;  %5383 = vmatprep.subr.bf16.mxu0 %v9180_v4 }
 0x2dd   : > { %v3336_v18 = vadd.f32 %v8080_v39, %v3239_v9  ;;  %v3242_v19 = vadd.f32 %v8019_v10, %v10962_v17  ;;  %3667 = vmatmul.mubr.bf16.gmra.mrb[76].mxu0 %v3385_v12  ;;  %3780 = vmatmul.mubr.bf16.gmra.mrb[76].mxu1 %v3385_v12  ;;  %v9202_v10 = vld [vmem:[%s12433_s7 + $0x230] ss:$28 sps:$4 sm:$0xff]   ;;  %v9205_v12 = vld [vmem:[%s12433_s7 + $0x238] ss:$28 sps:$4 sm:$0xff]  }
 0x2de   : > { %3676 = vmatprep.mubr.bf16.mxu0 %v9919_v54  ;;  %3789 = vmatprep.mubr.bf16.mxu1 %v9919_v54 }
 0x2df   : > { %v3339_v21 = vadd.f32 %v8083_v11, %v3242_v19  ;;  %v8020_v22 = vpop.f32.mrb[52].mxu0  ;;  %v8084_v23 = vpop.f32.mrb[52].mxu1  ;;  %5609 = vmatprep.subr.bf16.mxu1 %v9183_v14  ;;  %5384 = vmatpush1.bf16.msra.mxu0 %v9178_v13  ;;  %v3374_v29 = vmax.f32 %v3336_v18, 0.0  ;;  %v9207_v11 = vld [vmem:[%s12433_s7 + $0x23c] ss:$28 sps:$4 sm:$0xff]  }
 0x2e0   : > { %v8021_v25 = vpop.f32.mrb[53].mxu0  ;;  %v8085_v26 = vpop.f32.mrb[53].mxu1  ;;  %5610 = vmatpush1.bf16.msra.mxu1 %v9181_v15  ;;  %5385 = vmatprep.subr.bf16.mxu0 %v9186_v16  ;;  %v9210_v13 = vld [vmem:[%s12433_s7 + $0x26c] ss:$28 sps:$4 sm:$0xff]   ;;  %v9213_v16 = vld [vmem:[%s12433_s7 + $0x274] ss:$28 sps:$4 sm:$0xff]  }
 0x2e1   : > { %v3375_v30 = vmax.f32 %v3339_v21, 0.0  ;;  %v8022_v31 = vadd.f32 %v8021_v25, %v8020_v22  ;;  %v8086_v35 = vadd.f32 %v8085_v26, %v8084_v23  ;;  %v8023_v42 = vpop.f32.mrb[54].mxu0  ;;  %v8087_v43 = vpop.f32.mrb[54].mxu1  ;;  %5611 = vmatprep.subr.bf16.mxu1 %v9189_v20  ;;  %v9208_v21 = vld [vmem:[%s12433_s7 + $0x268] ss:$28 sps:$4 sm:$0xff]  }
 0x2e2   : > { %v8024_v44 = vpop.f32.mrb[55].mxu0  ;;  %v8088_v45 = vpop.f32.mrb[55].mxu1  ;;  %v9216_v25 = vld [vmem:[%s12433_s7 + $0x2a4] ss:$28 sps:$4 sm:$0xff]  }
 0x2e3   : > { %v3247_v46 = vadd.f32 %v8022_v31, %v10962_v17  ;;  %v8025_v47 = vadd.f32 %v8024_v44, %v8023_v42  ;;  %v8089_v48 = vadd.f32 %v8088_v45, %v8087_v43  ;;  %v3386_v49 = vpack.c.bf16 %v3375_v30, %v3374_v29  ;;  %5386 = vmatpush1.bf16.msra.mxu0 %v9184_v24  ;;  %v9211_v24 = vld [vmem:[%s12433_s7 + $0x270] ss:$28 sps:$4 sm:$0xff]  }
 0x2e4   : > { %5612 = vmatpush1.bf16.msra.mxu1 %v9187_v27  ;;  %5387 = vmatprep.subr.bf16.mxu0 %v9192_v28 }
 0x2e5   : > { %v3344_v55 = vadd.f32 %v8086_v35, %v3247_v46  ;;  %v3250_v56 = vadd.f32 %v8025_v47, %v10962_v17  ;;  %3677 = vmatmul.mubr.bf16.gmra.mrb[80].mxu0 %v3386_v49  ;;  %3790 = vmatmul.mubr.bf16.gmra.mrb[80].mxu1 %v3386_v49  ;;  %v9214_v47 = vld [vmem:[%s12433_s7 + $0x2a0] ss:$28 sps:$4 sm:$0xff]   ;;  %v9217_v49 = vld [vmem:[%s12433_s7 + $0x2a8] ss:$28 sps:$4 sm:$0xff]  }
 0x2e6   : > { %3686 = vmatprep.mubr.bf16.mxu0 %v9919_v54  ;;  %3799 = vmatprep.mubr.bf16.mxu1 %v9919_v54 }
 0x2e7   : > { %v3347_v58 = vadd.f32 %v8089_v48, %v3250_v56  ;;  %v8026_v59 = vpop.f32.mrb[56].mxu0  ;;  %v8090_v60 = vpop.f32.mrb[56].mxu1  ;;  %5613 = vmatprep.subr.bf16.mxu1 %v9195_v51  ;;  %5388 = vmatpush1.bf16.msra.mxu0 %v9190_v50  ;;  %v3376_v2 = vmax.f32 %v3344_v55, 0.0  ;;  %v9219_v48 = vld [vmem:[%s12433_s7 + $0x2ac] ss:$28 sps:$4 sm:$0xff]  }
 0x2e8   : > { %v8027_v62 = vpop.f32.mrb[57].mxu0  ;;  %v8091_v63 = vpop.f32.mrb[57].mxu1  ;;  %5614 = vmatpush1.bf16.msra.mxu1 %v9193_v52  ;;  %5389 = vmatprep.subr.bf16.mxu0 %v9198_v53  ;;  %v9222_v50 = vld [vmem:[%s12433_s7 + $0x2dc] ss:$28 sps:$4 sm:$0xff]   ;;  %v9225_v53 = vld [vmem:[%s12433_s7 + $0x2e4] ss:$28 sps:$4 sm:$0xff]  }
 0x2e9   : > { %v3377_v3 = vmax.f32 %v3347_v58, 0.0  ;;  %v8028_v4 = vadd.f32 %v8027_v62, %v8026_v59  ;;  %v8092_v5 = vadd.f32 %v8091_v63, %v8090_v60  ;;  %v8029_v38 = vpop.f32.mrb[58].mxu0  ;;  %v8093_v6 = vpop.f32.mrb[58].mxu1  ;;  %5615 = vmatprep.subr.bf16.mxu1 %v9201_v57  ;;  %v9220_v56 = vld [vmem:[%s12433_s7 + $0x2d8] ss:$28 sps:$4 sm:$0xff]  }
 0x2ea   : > { %v8030_v39 = vpop.f32.mrb[59].mxu0  ;;  %v8094_v40 = vpop.f32.mrb[59].mxu1  ;;  %v9231_v60 = vld [vmem:[%s12433_s7 + $0x31c] ss:$28 sps:$4 sm:$0xff]   ;;  %v9234_v63 = vld [vmem:[%s12433_s7 + $0x34c] ss:$28 sps:$4 sm:$0xff]  }
 0x2eb   : > { %v3255_v41 = vadd.f32 %v8028_v4, %v10962_v17  ;;  %v8031_v7 = vadd.f32 %v8030_v39, %v8029_v38  ;;  %v8095_v8 = vadd.f32 %v8094_v40, %v8093_v6  ;;  %v3387_v9 = vpack.c.bf16 %v3377_v3, %v3376_v2  ;;  %5390 = vmatpush1.bf16.msra.mxu0 %v9196_v61  ;;  %v9226_v61 = vld [vmem:[%s12433_s7 + $0x310] ss:$28 sps:$4 sm:$0xff]   ;;  %v9229_v62 = vld [vmem:[%s12433_s7 + $0x318] ss:$28 sps:$4 sm:$0xff]   ;;  %v9240_v3 = vld [vmem:[%s12433_s7 + $0x384] ss:$28 sps:$4 sm:$0xff]  }
 0x2ec   : > { %5616 = vmatpush1.bf16.msra.mxu1 %v9199_v0  ;;  %5391 = vmatprep.subr.bf16.mxu0 %v9204_v1  ;;  %v9237_v0 = vld [vmem:[%s12433_s7 + $0x354] ss:$28 sps:$4 sm:$0xff]   ;;  %v9232_v1 = vld [vmem:[%s12433_s7 + $0x348] ss:$28 sps:$4 sm:$0xff]  }
 0x2ed   : > { %v3352_v14 = vadd.f32 %v8092_v5, %v3255_v41  ;;  %v3258_v15 = vadd.f32 %v8031_v7, %v10962_v17  ;;  %3687 = vmatmul.mubr.bf16.gmra.mrb[84].mxu0 %v3387_v9  ;;  %3800 = vmatmul.mubr.bf16.gmra.mrb[84].mxu1 %v3387_v9  ;;  %v9235_v2 = vld [vmem:[%s12433_s7 + $0x350] ss:$28 sps:$4 sm:$0xff]   ;;  %v3422_v5 = vld [vmem:[%s12432_s6] sm:$0xf] }
 0x2ee   : > { %3696 = vmatprep.mubr.bf16.mxu0 %v9919_v54  ;;  %3809 = vmatprep.mubr.bf16.mxu1 %v9919_v54  ;;  %v9243_v4 = vld [vmem:[%s12433_s7 + $0x38c] ss:$28 sps:$4 sm:$0xff]   ;;  %v11190_v38 = vrot.slane %v3422_v5, %v10771_v33  ;;  %v11193_v6 = vrot.slane %v3422_v5, %v10774_v34  ;;  %v11196_v39 = vrot.slane %v3422_v5, %v10780_v36 }
 0x2ef   : > { %v3355_v18 = vadd.f32 %v8095_v8, %v3258_v15  ;;  %v8032_v19 = vpop.f32.mrb[60].mxu0  ;;  %v8096_v20 = vpop.f32.mrb[60].mxu1  ;;  %5617 = vmatprep.subr.bf16.mxu1 %v9207_v11  ;;  %5392 = vmatpush1.bf16.msra.mxu0 %v9202_v10  ;;  %v3378_v26 = vmax.f32 %v3352_v14, 0.0  ;;  %v11199_v40 = vrot.slane %v3422_v5, %v10783_v37 }
 0x2f0   : > { %v8033_v22 = vpop.f32.mrb[61].mxu0  ;;  %v8097_v23 = vpop.f32.mrb[61].mxu1  ;;  %5618 = vmatpush1.bf16.msra.mxu1 %v9205_v12  ;;  %5393 = vmatprep.subr.bf16.mxu0 %v9210_v13 }
 0x2f1   : > { %v3379_v27 = vmax.f32 %v3355_v18, 0.0  ;;  %v8034_v28 = vadd.f32 %v8033_v22, %v8032_v19  ;;  %v8098_v29 = vadd.f32 %v8097_v23, %v8096_v20  ;;  %v8035_v30 = vpop.f32.mrb[62].mxu0  ;;  %v8099_v31 = vpop.f32.mrb[62].mxu1  ;;  %5619 = vmatprep.subr.bf16.mxu1 %v9213_v16 }
 0x2f2   : > { %v8036_v35 = vpop.f32.mrb[63].mxu0  ;;  %v8100_v42 = vpop.f32.mrb[63].mxu1 }
 0x2f3   : > { %v3263_v43 = vadd.f32 %v8034_v28, %v10962_v17  ;;  %v8037_v44 = vadd.f32 %v8036_v35, %v8035_v30  ;;  %v8101_v45 = vadd.f32 %v8100_v42, %v8099_v31  ;;  %v3388_v46 = vpack.c.bf16 %v3379_v27, %v3378_v26  ;;  %5394 = vmatpush1.bf16.msra.mxu0 %v9208_v21 }
 0x2f4   : > { %5620 = vmatpush1.bf16.msra.mxu1 %v9211_v24  ;;  %5395 = vmatprep.subr.bf16.mxu0 %v9216_v25 }
 0x2f5   : > { %v3360_v51 = vadd.f32 %v8098_v29, %v3263_v43  ;;  %v3266_v52 = vadd.f32 %v8037_v44, %v10962_v17  ;;  %3697 = vmatmul.mubr.bf16.gmra.mrb[88].mxu0 %v3388_v46  ;;  %3810 = vmatmul.mubr.bf16.gmra.mrb[88].mxu1 %v3388_v46  ;;  %v9223_v17 = vld [vmem:[%s12433_s7 + $0x2e0] ss:$28 sps:$4 sm:$0xff]  }
 0x2f6   : > { %3706 = vmatprep.mubr.bf16.mxu0 %v9919_v54  ;;  %3819 = vmatprep.mubr.bf16.mxu1 %v9919_v54  ;;  %v9228_v54 = vld [vmem:[%s12433_s7 + $0x314] ss:$28 sps:$4 sm:$0xff]   ;;  %v9238_v46 = vld [vmem:[%s12433_s7 + $0x380] ss:$28 sps:$4 sm:$0xff]  }
 0x2f7   : > { %v3363_v55 = vadd.f32 %v8101_v45, %v3266_v52  ;;  %5621 = vmatprep.subr.bf16.mxu1 %v9219_v48  ;;  %5396 = vmatpush1.bf16.msra.mxu0 %v9214_v47  ;;  %v3380_v57 = vmax.f32 %v3360_v51, 0.0  ;;  %v9241_v47 = vld [vmem:[%s12433_s7 + $0x388] ss:$28 sps:$4 sm:$0xff]   ;;  %v9246_v52 = vld [vmem:[%s12433_s7 + $0x3bc] ss:$28 sps:$4 sm:$0xff]  }
 0x2f8   : > { %5622 = vmatpush1.bf16.msra.mxu1 %v9217_v49  ;;  %5397 = vmatprep.subr.bf16.mxu0 %v9222_v50 }
 0x2f9   : > { %v3381_v58 = vmax.f32 %v3363_v55, 0.0  ;;  %5623 = vmatprep.subr.bf16.mxu1 %v9225_v53  ;;  %v9249_v53 = vld [vmem:[%s12433_s7 + $0x3c4] ss:$28 sps:$4 sm:$0xff]  }
 0x2fb   : > { %v3389_v59 = vpack.c.bf16 %v3381_v58, %v3380_v57  ;;  %5398 = vmatpush1.bf16.msra.mxu0 %v9220_v56 }
 0x2fc   : > { %5624 = vmatpush1.bf16.msra.mxu1 %v9223_v17  ;;  %5399 = vmatprep.subr.bf16.mxu0 %v9228_v54 }
 0x2fd   : > { %3707 = vmatmul.mubr.bf16.gmra.mrb[92].mxu0 %v3389_v59  ;;  %3820 = vmatmul.mubr.bf16.gmra.mrb[92].mxu1 %v3389_v59 }
 0x2fe   : > { %5625 = vmatprep.subr.bf16.mxu1 %v9231_v60 }
 0x2ff   : > { %5400 = vmatpush1.bf16.msra.mxu0 %v9226_v61 }
 0x300   : > { %5626 = vmatpush1.bf16.msra.mxu1 %v9229_v62  ;;  %5401 = vmatprep.subr.bf16.mxu0 %v9234_v63  ;;  %v9244_v63 = vld [vmem:[%s12433_s7 + $0x3b8] ss:$28 sps:$4 sm:$0xff]  }
 0x301   : > { %5627 = vmatprep.subr.bf16.mxu1 %v9237_v0  ;;  %v9247_v0 = vld [vmem:[%s12433_s7 + $0x3c0] ss:$28 sps:$4 sm:$0xff]  }
 0x303   : > { %5402 = vmatpush1.bf16.msra.mxu0 %v9232_v1  ;;  %v9252_v1 = vld [vmem:[%s12433_s7 + $0x3f4] ss:$28 sps:$4 sm:$0xff]  }
 0x304   : > { %5628 = vmatpush1.bf16.msra.mxu1 %v9235_v2  ;;  %5484 = vmatprep.subr.bf16.mxu0 %v9240_v3 }
 0x305   : > { %5710 = vmatprep.subr.bf16.mxu1 %v9243_v4 }
 0x398   : > { %v3638_v41 = vpop.f32.mrb[64].mxu0  ;;  %v3751_v7 = vpop.f32.mrb[64].mxu1 }
 0x399   : > { %v3639_v8 = vadd.f32 %v3638_v41, %v11190_v38  ;;  %v3752_v9 = vadd.f32 %v3751_v7, %v11193_v6  ;;  %v3640_v10 = vpop.f32.mrb[65].mxu0  ;;  %v3753_v11 = vpop.f32.mrb[65].mxu1  ;;  %v9255_v41 = vld [vmem:[%s12433_s7 + $0x3fc] ss:$28 sps:$4 sm:$0xff]  }
 0x39a   : > { %v3641_v12 = vadd.f32 %v3640_v10, %v11196_v39  ;;  %v3754_v13 = vadd.f32 %v3753_v11, %v11199_v40  ;;  %v3642_v14 = vpop.f32.mrb[66].mxu0  ;;  %v3755_v15 = vpop.f32.mrb[66].mxu1 }
 0x39b   : > { %v3643_v16 = vadd.f32 %v3642_v14, %v11190_v38  ;;  %v3756_v18 = vadd.f32 %v3755_v15, %v11193_v6  ;;  %v3644_v19 = vpop.f32.mrb[67].mxu0  ;;  %v3757_v20 = vpop.f32.mrb[67].mxu1  ;;  %v3830_v23 = vmax.f32 %v3639_v8, 0.0  ;;  %v3832_v24 = vmax.f32 %v3752_v9, 0.0 }
 0x39c   : > { %v3645_v21 = vadd.f32 %v3644_v19, %v11196_v39  ;;  %v3758_v22 = vadd.f32 %v3757_v20, %v11199_v40  ;;  %v3831_v27 = vmax.f32 %v3641_v12, 0.0  ;;  %v3833_v28 = vmax.f32 %v3754_v13, 0.0  ;;  %v9253_v19 = vld [vmem:[%s12433_s7 + $0x3f8] ss:$28 sps:$4 sm:$0xff]  }
 0x39d   : > { %v3834_v25 = vmax.f32 %v3643_v16, 0.0  ;;  %v3836_v26 = vmax.f32 %v3756_v18, 0.0  ;;  %v9250_v18 = vld [vmem:[%s12433_s7 + $0x3f0] ss:$28 sps:$4 sm:$0xff]  }
 0x39e   : > { %v3835_v29 = vmax.f32 %v3645_v21, 0.0  ;;  %v3837_v30 = vmax.f32 %v3758_v22, 0.0 }
 0x39f   : > { %v11209_v31 = vpack.c.bf16 %v3834_v25, %v3830_v23  ;;  %v11211_v35 = vpack.c.bf16 %v3836_v26, %v3832_v24  ;;  %v9258_v24 = vld [vmem:[%s12433_s7 + $0x42c] ss:$28 sps:$4 sm:$0xff]   ;;  %v9261_v25 = vld [vmem:[%s12433_s7 + $0x434] ss:$28 sps:$4 sm:$0xff]  }
 0x3a0   : > { %v11213_v42 = vpack.c.bf16 %v3835_v29, %v3831_v27  ;;  %v11215_v43 = vpack.c.bf16 %v3837_v30, %v3833_v28  ;;  %v3648_v44 = vpop.f32.mrb[68].mxu0  ;;  %v3761_v45 = vpop.f32.mrb[68].mxu1 }
 0x3a1   : > { %v3649_v48 = vadd.f32 %v3648_v44, %v11190_v38  ;;  %v3762_v49 = vadd.f32 %v3761_v45, %v11193_v6  ;;  %v3650_v50 = vpop.f32.mrb[69].mxu0  ;;  %v3763_v51 = vpop.f32.mrb[69].mxu1 }
 0x3a2   : > { %v3651_v55 = vadd.f32 %v3650_v50, %v11196_v39  ;;  %v3764_v56 = vadd.f32 %v3763_v51, %v11199_v40  ;;  %v3652_v17 = vpop.f32.mrb[70].mxu0  ;;  %v3765_v57 = vpop.f32.mrb[70].mxu1  ;;  %5403 = vmatprep.mubr.bf16.mxu0 %v11213_v42  ;;  %5629 = vmatprep.mubr.bf16.mxu1 %v11213_v42  ;;  %v9259_v50 = vld [vmem:[%s12433_s7 + $0x430] ss:$28 sps:$4 sm:$0xff]   ;;  %v9264_v51 = vld [vmem:[%s12433_s7 + $0x464] ss:$28 sps:$4 sm:$0xff]  }
 0x3a3   : > { %v3653_v58 = vadd.f32 %v3652_v17, %v11190_v38  ;;  %v3766_v59 = vadd.f32 %v3765_v57, %v11193_v6  ;;  %v3654_v54 = vpop.f32.mrb[71].mxu0  ;;  %v3767_v60 = vpop.f32.mrb[71].mxu1  ;;  %5404 = vmatmul.mubr.bf16.vlgmr.msra.gmra.mrb[96].mxu0 %v11209_v31  ;;  %5630 = vmatmul.mubr.bf16.vlgmr.msra.gmra.mrb[96].mxu1 %v11209_v31  ;;  %v3838_v2 = vmax.f32 %v3649_v48, 0.0  ;;  %v3840_v3 = vmax.f32 %v3762_v49, 0.0  ;;  %v9256_v49 = vld [vmem:[%s12433_s7 + $0x428] ss:$28 sps:$4 sm:$0xff]  }
 0x3a4   : > { %v3655_v61 = vadd.f32 %v3654_v54, %v11196_v39  ;;  %v3768_v62 = vadd.f32 %v3767_v60, %v11199_v40  ;;  %5485 = vmatpush1.bf16.msra.mxu0 %v9238_v46  ;;  %5711 = vmatpush1.bf16.msra.mxu1 %v9241_v47  ;;  %v3839_v7 = vmax.f32 %v3651_v55, 0.0  ;;  %v3841_v8 = vmax.f32 %v3764_v56, 0.0  ;;  %v9267_v17 = vld [vmem:[%s12433_s7 + $0x46c] ss:$28 sps:$4 sm:$0xff]  }
 0x3a5   : > { %v3842_v4 = vmax.f32 %v3653_v58, 0.0  ;;  %v3844_v5 = vmax.f32 %v3766_v59, 0.0  ;;  %5486 = vmatprep.subr.bf16.mxu0 %v9246_v52  ;;  %5712 = vmatprep.subr.bf16.mxu1 %v9249_v53 }
 0x3a6   : > { %v3843_v9 = vmax.f32 %v3655_v61, 0.0  ;;  %v3845_v10 = vmax.f32 %v3768_v62, 0.0 }
 0x3a7   : > { %v11253_v11 = vpack.c.bf16 %v3842_v4, %v3838_v2  ;;  %v11255_v12 = vpack.c.bf16 %v3844_v5, %v3840_v3  ;;  %v9262_v2 = vld [vmem:[%s12433_s7 + $0x460] ss:$28 sps:$4 sm:$0xff]   ;;  %v9265_v3 = vld [vmem:[%s12433_s7 + $0x468] ss:$28 sps:$4 sm:$0xff]  }
 0x3a8   : > { %v11257_v13 = vpack.c.bf16 %v3843_v9, %v3839_v7  ;;  %v11259_v14 = vpack.c.bf16 %v3845_v10, %v3841_v8  ;;  %v3658_v15 = vpop.f32.mrb[72].mxu0  ;;  %v3771_v16 = vpop.f32.mrb[72].mxu1  ;;  %5487 = vmatpush1.bf16.msra.mxu0 %v9244_v63  ;;  %5713 = vmatpush1.bf16.msra.mxu1 %v9247_v0  ;;  %v9270_v8 = vld [vmem:[%s12433_s7 + $0x49c] ss:$28 sps:$4 sm:$0xff]   ;;  %v9273_v9 = vld [vmem:[%s12433_s7 + $0x4a4] ss:$28 sps:$4 sm:$0xff]  }
 0x3a9   : > { %v3659_v20 = vadd.f32 %v3658_v15, %v11190_v38  ;;  %v3772_v21 = vadd.f32 %v3771_v16, %v11193_v6  ;;  %v3660_v22 = vpop.f32.mrb[73].mxu0  ;;  %v3773_v23 = vpop.f32.mrb[73].mxu1  ;;  %5488 = vmatprep.subr.bf16.mxu0 %v9252_v1  ;;  %5714 = vmatprep.subr.bf16.mxu1 %v9255_v41 }
 0x3aa   : > { %v3661_v26 = vadd.f32 %v3660_v22, %v11196_v39  ;;  %v3774_v27 = vadd.f32 %v3773_v23, %v11199_v40  ;;  %v3662_v28 = vpop.f32.mrb[74].mxu0  ;;  %v3775_v29 = vpop.f32.mrb[74].mxu1  ;;  %5413 = vmatprep.mubr.bf16.mxu0 %v11257_v13  ;;  %5639 = vmatprep.mubr.bf16.mxu1 %v11257_v13 }
 0x3ab   : > { %v3663_v30 = vadd.f32 %v3662_v28, %v11190_v38  ;;  %v3776_v44 = vadd.f32 %v3775_v29, %v11193_v6  ;;  %v3664_v45 = vpop.f32.mrb[75].mxu0  ;;  %v3777_v46 = vpop.f32.mrb[75].mxu1  ;;  %5414 = vmatmul.mubr.bf16.gmra.mrb[100].mxu0 %v11253_v11  ;;  %5640 = vmatmul.mubr.bf16.gmra.mrb[100].mxu1 %v11253_v11  ;;  %v3846_v52 = vmax.f32 %v3659_v20, 0.0  ;;  %v3848_v53 = vmax.f32 %v3772_v21, 0.0 }
 0x3ac   : > { %v3665_v47 = vadd.f32 %v3664_v45, %v11196_v39  ;;  %v3778_v48 = vadd.f32 %v3777_v46, %v11199_v40  ;;  %5489 = vmatpush1.bf16.msra.mxu0 %v9250_v18  ;;  %5715 = vmatpush1.bf16.msra.mxu1 %v9253_v19  ;;  %v3847_v57 = vmax.f32 %v3661_v26, 0.0  ;;  %v3849_v58 = vmax.f32 %v3774_v27, 0.0  ;;  %v9271_v26 = vld [vmem:[%s12433_s7 + $0x4a0] ss:$28 sps:$4 sm:$0xff]   ;;  %v9276_v27 = vld [vmem:[%s12433_s7 + $0x4d4] ss:$28 sps:$4 sm:$0xff]  }
 0x3ad   : > { %v3850_v55 = vmax.f32 %v3663_v30, 0.0  ;;  %v3852_v56 = vmax.f32 %v3776_v44, 0.0  ;;  %5490 = vmatprep.subr.bf16.mxu0 %v9258_v24  ;;  %5716 = vmatprep.subr.bf16.mxu1 %v9261_v25  ;;  %v9268_v25 = vld [vmem:[%s12433_s7 + $0x498] ss:$28 sps:$4 sm:$0xff]  }
 0x3ae   : > { %v3851_v59 = vmax.f32 %v3665_v47, 0.0  ;;  %v3853_v54 = vmax.f32 %v3778_v48, 0.0  ;;  %v9279_v45 = vld [vmem:[%s12433_s7 + $0x4dc] ss:$28 sps:$4 sm:$0xff]  }
 0x3af   : > { %v11297_v60 = vpack.c.bf16 %v3850_v55, %v3846_v52  ;;  %v11299_v61 = vpack.c.bf16 %v3852_v56, %v3848_v53 }
 0x3b0   : > { %v11301_v62 = vpack.c.bf16 %v3851_v59, %v3847_v57  ;;  %v11303_v63 = vpack.c.bf16 %v3853_v54, %v3849_v58  ;;  %v3668_v0 = vpop.f32.mrb[76].mxu0  ;;  %v3781_v1 = vpop.f32.mrb[76].mxu1  ;;  %5491 = vmatpush1.bf16.msra.mxu0 %v9256_v49  ;;  %5717 = vmatpush1.bf16.msra.mxu1 %v9259_v50  ;;  %v9277_v57 = vld [vmem:[%s12433_s7 + $0x4d8] ss:$28 sps:$4 sm:$0xff]  }
 0x3b1   : > { %v3669_v4 = vadd.f32 %v3668_v0, %v11190_v38  ;;  %v3782_v5 = vadd.f32 %v3781_v1, %v11193_v6  ;;  %v3670_v41 = vpop.f32.mrb[77].mxu0  ;;  %v3783_v7 = vpop.f32.mrb[77].mxu1  ;;  %5492 = vmatprep.subr.bf16.mxu0 %v9264_v51  ;;  %5718 = vmatprep.subr.bf16.mxu1 %v9267_v17  ;;  %v9274_v17 = vld [vmem:[%s12433_s7 + $0x4d0] ss:$28 sps:$4 sm:$0xff]  }
 0x3b2   : > { %v3671_v10 = vadd.f32 %v3670_v41, %v11196_v39  ;;  %v3784_v15 = vadd.f32 %v3783_v7, %v11199_v40  ;;  %v3672_v16 = vpop.f32.mrb[78].mxu0  ;;  %v3785_v18 = vpop.f32.mrb[78].mxu1  ;;  %5423 = vmatprep.mubr.bf16.mxu0 %v11301_v62  ;;  %5649 = vmatprep.mubr.bf16.mxu1 %v11301_v62  ;;  %v9282_v1 = vld [vmem:[%s12433_s7 + $0x50c] ss:$28 sps:$4 sm:$0xff]  }
 0x3b3   : > { %v3673_v19 = vadd.f32 %v3672_v16, %v11190_v38  ;;  %v3786_v20 = vadd.f32 %v3785_v18, %v11193_v6  ;;  %v3674_v21 = vpop.f32.mrb[79].mxu0  ;;  %v3787_v22 = vpop.f32.mrb[79].mxu1  ;;  %5424 = vmatmul.mubr.bf16.gmra.mrb[104].mxu0 %v11297_v60  ;;  %5650 = vmatmul.mubr.bf16.gmra.mrb[104].mxu1 %v11297_v60  ;;  %v3854_v28 = vmax.f32 %v3669_v4, 0.0  ;;  %v3856_v29 = vmax.f32 %v3782_v5, 0.0  ;;  %v9280_v18 = vld [vmem:[%s12433_s7 + $0x508] ss:$28 sps:$4 sm:$0xff]  }
 0x3b4   : > { %v3675_v23 = vadd.f32 %v3674_v21, %v11196_v39  ;;  %v3788_v24 = vadd.f32 %v3787_v22, %v11199_v40  ;;  %5493 = vmatpush1.bf16.msra.mxu0 %v9262_v2  ;;  %5719 = vmatpush1.bf16.msra.mxu1 %v9265_v3  ;;  %v3855_v46 = vmax.f32 %v3671_v10, 0.0  ;;  %v3857_v47 = vmax.f32 %v3784_v15, 0.0  ;;  %v9285_v2 = vld [vmem:[%s12433_s7 + $0x514] ss:$28 sps:$4 sm:$0xff]  }
 0x3b5   : > { %v3858_v30 = vmax.f32 %v3673_v19, 0.0  ;;  %v3860_v44 = vmax.f32 %v3786_v20, 0.0  ;;  %5494 = vmatprep.subr.bf16.mxu0 %v9270_v8  ;;  %5720 = vmatprep.subr.bf16.mxu1 %v9273_v9  ;;  %v9283_v19 = vld [vmem:[%s12433_s7 + $0x510] ss:$28 sps:$4 sm:$0xff]   ;;  %v9288_v20 = vld [vmem:[%s12433_s7 + $0x544] ss:$28 sps:$4 sm:$0xff]  }
 0x3b6   : > { %v3859_v48 = vmax.f32 %v3675_v23, 0.0  ;;  %v3861_v49 = vmax.f32 %v3788_v24, 0.0 }
 0x3b7   : > { %v11341_v50 = vpack.c.bf16 %v3858_v30, %v3854_v28  ;;  %v11343_v51 = vpack.c.bf16 %v3860_v44, %v3856_v29 }
 0x3b8   : > { %v11345_v52 = vpack.c.bf16 %v3859_v48, %v3855_v46  ;;  %v11347_v53 = vpack.c.bf16 %v3861_v49, %v3857_v47  ;;  %v3678_v55 = vpop.f32.mrb[80].mxu0  ;;  %v3791_v56 = vpop.f32.mrb[80].mxu1  ;;  %5495 = vmatpush1.bf16.msra.mxu0 %v9268_v25  ;;  %5721 = vmatpush1.bf16.msra.mxu1 %v9271_v26  ;;  %v9291_v25 = vld [vmem:[%s12433_s7 + $0x54c] ss:$28 sps:$4 sm:$0xff]   ;;  %v9286_v49 = vld [vmem:[%s12433_s7 + $0x540] ss:$28 sps:$4 sm:$0xff]  }
 0x3b9   : > { %v3679_v58 = vadd.f32 %v3678_v55, %v11190_v38  ;;  %v3792_v59 = vadd.f32 %v3791_v56, %v11193_v6  ;;  %v3680_v54 = vpop.f32.mrb[81].mxu0  ;;  %v3793_v0 = vpop.f32.mrb[81].mxu1  ;;  %5496 = vmatprep.subr.bf16.mxu0 %v9276_v27  ;;  %5722 = vmatprep.subr.bf16.mxu1 %v9279_v45  ;;  %v9289_v55 = vld [vmem:[%s12433_s7 + $0x548] ss:$28 sps:$4 sm:$0xff]  }
 0x3ba   : > { %v3681_v3 = vadd.f32 %v3680_v54, %v11196_v39  ;;  %v3794_v4 = vadd.f32 %v3793_v0, %v11199_v40  ;;  %v3682_v5 = vpop.f32.mrb[82].mxu0  ;;  %v3795_v41 = vpop.f32.mrb[82].mxu1  ;;  %5433 = vmatprep.mubr.bf16.mxu0 %v11345_v52  ;;  %5659 = vmatprep.mubr.bf16.mxu1 %v11345_v52  ;;  %v9297_v54 = vld [vmem:[%s12433_s7 + $0x584] ss:$28 sps:$4 sm:$0xff]  }
 0x3bb   : > { %v3683_v7 = vadd.f32 %v3682_v5, %v11190_v38  ;;  %v3796_v8 = vadd.f32 %v3795_v41, %v11193_v6  ;;  %v3684_v9 = vpop.f32.mrb[83].mxu0  ;;  %v3797_v10 = vpop.f32.mrb[83].mxu1  ;;  %5434 = vmatmul.mubr.bf16.gmra.mrb[108].mxu0 %v11341_v50  ;;  %5660 = vmatmul.mubr.bf16.gmra.mrb[108].mxu1 %v11341_v50  ;;  %v3862_v21 = vmax.f32 %v3679_v58, 0.0  ;;  %v3864_v22 = vmax.f32 %v3792_v59, 0.0  ;;  %v9294_v59 = vld [vmem:[%s12433_s7 + $0x57c] ss:$28 sps:$4 sm:$0xff]  }
 0x3bc   : > { %v3685_v15 = vadd.f32 %v3684_v9, %v11196_v39  ;;  %v3798_v16 = vadd.f32 %v3797_v10, %v11199_v40  ;;  %5497 = vmatpush1.bf16.msra.mxu0 %v9274_v17  ;;  %5723 = vmatpush1.bf16.msra.mxu1 %v9277_v57  ;;  %v3863_v26 = vmax.f32 %v3681_v3, 0.0  ;;  %v3865_v27 = vmax.f32 %v3794_v4, 0.0  ;;  %v9292_v10 = vld [vmem:[%s12433_s7 + $0x578] ss:$28 sps:$4 sm:$0xff]  }
 0x3bd   : > { %v3866_v23 = vmax.f32 %v3683_v7, 0.0  ;;  %v3868_v24 = vmax.f32 %v3796_v8, 0.0  ;;  %5498 = vmatprep.subr.bf16.mxu0 %v9282_v1  ;;  %5724 = vmatprep.subr.bf16.mxu1 %v9285_v2 }
 0x3be   : > { %v3867_v28 = vmax.f32 %v3685_v15, 0.0  ;;  %v3869_v29 = vmax.f32 %v3798_v16, 0.0  ;;  %v9295_v15 = vld [vmem:[%s12433_s7 + $0x580] ss:$28 sps:$4 sm:$0xff]   ;;  %v9300_v16 = vld [vmem:[%s12433_s7 + $0x5b4] ss:$28 sps:$4 sm:$0xff]  }
 0x3bf   : > { %v11385_v30 = vpack.c.bf16 %v3866_v23, %v3862_v21  ;;  %v11387_v44 = vpack.c.bf16 %v3868_v24, %v3864_v22  ;;  %v9303_v22 = vld [vmem:[%s12433_s7 + $0x5bc] ss:$28 sps:$4 sm:$0xff]  }
 0x3c0   : > { %v11389_v45 = vpack.c.bf16 %v3867_v28, %v3863_v26  ;;  %v11391_v46 = vpack.c.bf16 %v3869_v29, %v3865_v27  ;;  %v3688_v47 = vpop.f32.mrb[84].mxu0  ;;  %v3801_v48 = vpop.f32.mrb[84].mxu1  ;;  %5499 = vmatpush1.bf16.msra.mxu0 %v9280_v18  ;;  %5725 = vmatpush1.bf16.msra.mxu1 %v9283_v19 }
 0x3c1   : > { %v3689_v56 = vadd.f32 %v3688_v47, %v11190_v38  ;;  %v3802_v17 = vadd.f32 %v3801_v48, %v11193_v6  ;;  %v3690_v57 = vpop.f32.mrb[85].mxu0  ;;  %v3803_v58 = vpop.f32.mrb[85].mxu1  ;;  %5500 = vmatprep.subr.bf16.mxu0 %v9288_v20  ;;  %5726 = vmatprep.subr.bf16.mxu1 %v9291_v25 }
 0x3c2   : > { %v3691_v0 = vadd.f32 %v3690_v57, %v11196_v39  ;;  %v3804_v1 = vadd.f32 %v3803_v58, %v11199_v40  ;;  %v3692_v2 = vpop.f32.mrb[86].mxu0  ;;  %v3805_v3 = vpop.f32.mrb[86].mxu1  ;;  %5443 = vmatprep.mubr.bf16.mxu0 %v11389_v45  ;;  %5669 = vmatprep.mubr.bf16.mxu1 %v11389_v45 }
 0x3c3   : > { %v3693_v4 = vadd.f32 %v3692_v2, %v11190_v38  ;;  %v3806_v5 = vadd.f32 %v3805_v3, %v11193_v6  ;;  %v3694_v41 = vpop.f32.mrb[87].mxu0  ;;  %v3807_v7 = vpop.f32.mrb[87].mxu1  ;;  %5444 = vmatmul.mubr.bf16.gmra.mrb[112].mxu0 %v11385_v30  ;;  %5670 = vmatmul.mubr.bf16.gmra.mrb[112].mxu1 %v11385_v30  ;;  %v3870_v18 = vmax.f32 %v3689_v56, 0.0  ;;  %v3872_v19 = vmax.f32 %v3802_v17, 0.0  ;;  %v9301_v56 = vld [vmem:[%s12433_s7 + $0x5b8] ss:$28 sps:$4 sm:$0xff]  }
 0x3c4   : > { %v3695_v8 = vadd.f32 %v3694_v41, %v11196_v39  ;;  %v3808_v9 = vadd.f32 %v3807_v7, %v11199_v40  ;;  %5501 = vmatpush1.bf16.msra.mxu0 %v9286_v49  ;;  %5727 = vmatpush1.bf16.msra.mxu1 %v9289_v55  ;;  %v3871_v23 = vmax.f32 %v3691_v0, 0.0  ;;  %v3873_v24 = vmax.f32 %v3804_v1, 0.0  ;;  %v9298_v55 = vld [vmem:[%s12433_s7 + $0x5b0] ss:$28 sps:$4 sm:$0xff]  }
 0x3c5   : > { %v3874_v20 = vmax.f32 %v3693_v4, 0.0  ;;  %v3876_v21 = vmax.f32 %v3806_v5, 0.0  ;;  %5502 = vmatprep.subr.bf16.mxu0 %v9294_v59  ;;  %5728 = vmatprep.subr.bf16.mxu1 %v9297_v54  ;;  %v9306_v54 = vld [vmem:[%s12433_s7 + $0x5ec] ss:$28 sps:$4 sm:$0xff]   ;;  %v9309_v0 = vld [vmem:[%s12433_s7 + $0x5f4] ss:$28 sps:$4 sm:$0xff]  }
 0x3c6   : > { %v3875_v25 = vmax.f32 %v3695_v8, 0.0  ;;  %v3877_v26 = vmax.f32 %v3808_v9, 0.0 }
 0x3c7   : > { %v11429_v27 = vpack.c.bf16 %v3874_v20, %v3870_v18  ;;  %v11431_v28 = vpack.c.bf16 %v3876_v21, %v3872_v19  ;;  %v9312_v18 = vld [vmem:[%s12433_s7 + $0x624] ss:$28 sps:$4 sm:$0xff]  }
 0x3c8   : > { %v11433_v29 = vpack.c.bf16 %v3875_v25, %v3871_v23  ;;  %v11435_v47 = vpack.c.bf16 %v3877_v26, %v3873_v24  ;;  %v3698_v48 = vpop.f32.mrb[88].mxu0  ;;  %v3811_v49 = vpop.f32.mrb[88].mxu1  ;;  %5503 = vmatpush1.bf16.msra.mxu0 %v9292_v10  ;;  %5729 = vmatpush1.bf16.msra.mxu1 %v9295_v15  ;;  %v9304_v15 = vld [vmem:[%s12433_s7 + $0x5e8] ss:$28 sps:$4 sm:$0xff]  }
 0x3c9   : > { %v3699_v17 = vadd.f32 %v3698_v48, %v11190_v38  ;;  %v3812_v57 = vadd.f32 %v3811_v49, %v11193_v6  ;;  %v3700_v58 = vpop.f32.mrb[89].mxu0  ;;  %v3813_v59 = vpop.f32.mrb[89].mxu1  ;;  %5504 = vmatprep.subr.bf16.mxu0 %v9300_v16  ;;  %5730 = vmatprep.subr.bf16.mxu1 %v9303_v22  ;;  %v9307_v16 = vld [vmem:[%s12433_s7 + $0x5f0] ss:$28 sps:$4 sm:$0xff]  }
 0x3ca   : > { %v3701_v1 = vadd.f32 %v3700_v58, %v11196_v39  ;;  %v3814_v2 = vadd.f32 %v3813_v59, %v11199_v40  ;;  %v3702_v3 = vpop.f32.mrb[90].mxu0  ;;  %v3815_v4 = vpop.f32.mrb[90].mxu1  ;;  %5453 = vmatprep.mubr.bf16.mxu0 %v11433_v29  ;;  %5679 = vmatprep.mubr.bf16.mxu1 %v11433_v29  ;;  %v9315_v23 = vld [vmem:[%s12433_s7 + $0x62c] ss:$28 sps:$4 sm:$0xff]   ;;  %v9310_v59 = vld [vmem:[%s12433_s7 + $0x620] ss:$28 sps:$4 sm:$0xff]  }
 0x3cb   : > { %v3703_v5 = vadd.f32 %v3702_v3, %v11190_v38  ;;  %v3816_v41 = vadd.f32 %v3815_v4, %v11193_v6  ;;  %v3704_v7 = vpop.f32.mrb[91].mxu0  ;;  %v3817_v8 = vpop.f32.mrb[91].mxu1  ;;  %5454 = vmatmul.mubr.bf16.gmra.mrb[116].mxu0 %v11429_v27  ;;  %5680 = vmatmul.mubr.bf16.gmra.mrb[116].mxu1 %v11429_v27  ;;  %v3878_v19 = vmax.f32 %v3699_v17, 0.0  ;;  %v3880_v20 = vmax.f32 %v3812_v57, 0.0  ;;  %v9318_v4 = vld [vmem:[%s12433_s7 + $0x65c] ss:$28 sps:$4 sm:$0xff]  }
 0x3cc   : > { %v3705_v9 = vadd.f32 %v3704_v7, %v11196_v39  ;;  %v3818_v10 = vadd.f32 %v3817_v8, %v11199_v40  ;;  %5505 = vmatpush1.bf16.msra.mxu0 %v9298_v55  ;;  %5731 = vmatpush1.bf16.msra.mxu1 %v9301_v56  ;;  %v3879_v24 = vmax.f32 %v3701_v1, 0.0  ;;  %v3881_v25 = vmax.f32 %v3814_v2, 0.0 }
 0x3cd   : > { %v3882_v21 = vmax.f32 %v3703_v5, 0.0  ;;  %v3884_v22 = vmax.f32 %v3816_v41, 0.0  ;;  %5506 = vmatprep.subr.bf16.mxu0 %v9306_v54  ;;  %5732 = vmatprep.subr.bf16.mxu1 %v9309_v0  ;;  %v9313_v54 = vld [vmem:[%s12433_s7 + $0x628] ss:$28 sps:$4 sm:$0xff]  }
 0x3ce   : > { %v3883_v26 = vmax.f32 %v3705_v9, 0.0  ;;  %v3885_v48 = vmax.f32 %v3818_v10, 0.0  ;;  %v9321_v5 = vld [vmem:[%s12433_s7 + $0x664] ss:$28 sps:$4 sm:$0xff]  }
 0x3cf   : > { %v11473_v49 = vpack.c.bf16 %v3882_v21, %v3878_v19  ;;  %v11475_v55 = vpack.c.bf16 %v3884_v22, %v3880_v20  ;;  %v9316_v21 = vld [vmem:[%s12433_s7 + $0x658] ss:$28 sps:$4 sm:$0xff]  }
 0x3d0   : > { %v11477_v56 = vpack.c.bf16 %v3883_v26, %v3879_v24  ;;  %v11479_v17 = vpack.c.bf16 %v3885_v48, %v3881_v25  ;;  %v3708_v57 = vpop.f32.mrb[92].mxu0  ;;  %v3821_v58 = vpop.f32.mrb[92].mxu1  ;;  %5507 = vmatpush1.bf16.msra.mxu0 %v9304_v15  ;;  %5733 = vmatpush1.bf16.msra.mxu1 %v9307_v16 }
 0x3d1   : > { %v3709_v0 = vadd.f32 %v3708_v57, %v11190_v38  ;;  %v3822_v1 = vadd.f32 %v3821_v58, %v11193_v6  ;;  %v3710_v2 = vpop.f32.mrb[93].mxu0  ;;  %v3823_v3 = vpop.f32.mrb[93].mxu1  ;;  %5508 = vmatprep.subr.bf16.mxu0 %v9312_v18  ;;  %5734 = vmatprep.subr.bf16.mxu1 %v9315_v23 }
 0x3d2   : > { %v3711_v41 = vadd.f32 %v3710_v2, %v11196_v39  ;;  %v3824_v7 = vadd.f32 %v3823_v3, %v11199_v40  ;;  %v3712_v8 = vpop.f32.mrb[94].mxu0  ;;  %v3825_v9 = vpop.f32.mrb[94].mxu1  ;;  %5463 = vmatprep.mubr.bf16.mxu0 %v11477_v56  ;;  %5689 = vmatprep.mubr.bf16.mxu1 %v11477_v56  ;;  %v9325_v2 = vld [vmem:[%s12433_s7 + $0x698] ss:$28 sps:$4 sm:$0xff]   ;;  %v9330_v3 = vld [vmem:[%s12433_s7 + $0x6cc] ss:$28 sps:$4 sm:$0xff]  }
 0x3d3   : > { %v3713_v10 = vadd.f32 %v3712_v8, %v11190_v38  ;;  %v3826_v15 = vadd.f32 %v3825_v9, %v11193_v6  ;;  %v3714_v16 = vpop.f32.mrb[95].mxu0  ;;  %v3827_v18 = vpop.f32.mrb[95].mxu1  ;;  %5464 = vmatmul.mubr.bf16.gmra.mrb[120].mxu0 %v11473_v49  ;;  %5690 = vmatmul.mubr.bf16.gmra.mrb[120].mxu1 %v11473_v49  ;;  %v9319_v38 = vld [vmem:[%s12433_s7 + $0x660] ss:$28 sps:$4 sm:$0xff]   ;;  %v9324_v6 = vld [vmem:[%s12433_s7 + $0x694] ss:$28 sps:$4 sm:$0xff]  }
 0x3d4   : > { %v3715_v19 = vadd.f32 %v3714_v16, %v11196_v39  ;;  %v3828_v20 = vadd.f32 %v3827_v18, %v11199_v40  ;;  %5509 = vmatpush1.bf16.msra.mxu0 %v9310_v59  ;;  %5735 = vmatpush1.bf16.msra.mxu1 %v9313_v54  ;;  %v3886_v22 = vmax.f32 %v3709_v0, 0.0  ;;  %v3888_v23 = vmax.f32 %v3822_v1, 0.0  ;;  %v9327_v40 = vld [vmem:[%s12433_s7 + $0x69c] ss:$28 sps:$4 sm:$0xff]   ;;  %v9322_v1 = vld [vmem:[%s12433_s7 + $0x690] ss:$28 sps:$4 sm:$0xff]  }
 0x3d5   : > { %v3890_v24 = vmax.f32 %v3713_v10, 0.0  ;;  %v3892_v39 = vmax.f32 %v3826_v15, 0.0  ;;  %5510 = vmatprep.subr.bf16.mxu0 %v9318_v4  ;;  %5736 = vmatprep.subr.bf16.mxu1 %v9321_v5  ;;  %v3887_v25 = vmax.f32 %v3711_v41, 0.0  ;;  %v3889_v26 = vmax.f32 %v3824_v7, 0.0  ;;  %v9333_v4 = vld [vmem:[%s12433_s7 + $0x6d4] ss:$28 sps:$4 sm:$0xff]  }
 0x3d6   : > { %v3891_v48 = vmax.f32 %v3715_v19, 0.0  ;;  %v3893_v57 = vmax.f32 %v3828_v20, 0.0  ;;  %v9328_v5 = vld [vmem:[%s12433_s7 + $0x6c8] ss:$28 sps:$4 sm:$0xff]   ;;  %v9331_v41 = vld [vmem:[%s12433_s7 + $0x6d0] ss:$28 sps:$4 sm:$0xff]  }
 0x3d7   : > { %v11517_v58 = vpack.c.bf16 %v3890_v24, %v3886_v22  ;;  %v11519_v59 = vpack.c.bf16 %v3892_v39, %v3888_v23  ;;  %v9336_v7 = vld [vmem:[%s12433_s7 + $0x14] ss:$28 sps:$4 sm:$0xff]   ;;  %v9341_v15 = vld [vmem:[%s12433_s7 + $0x4c] ss:$28 sps:$4 sm:$0xff]   ;;  %v9344_v19 = vld [vmem:[%s12433_s7 + $0x84] ss:$28 sps:$4 sm:$0xff]  }
 0x3d8   : > { %v11521_v54 = vpack.c.bf16 %v3891_v48, %v3887_v25  ;;  %v11523_v0 = vpack.c.bf16 %v3893_v57, %v3889_v26  ;;  %5511 = vmatpush1.bf16.msra.mxu0 %v9316_v21  ;;  %5737 = vmatpush1.bf16.msra.mxu1 %v9319_v38  ;;  %v9337_v8 = vld [vmem:[%s12433_s7 + $0x1d8] ss:$28 sps:$4 sm:$0xff]   ;;  %v9334_v9 = vld [vmem:[%s12433_s7 + $0x10] ss:$28 sps:$4 sm:$0xff]   ;;  %v9339_v18 = vld [vmem:[%s12433_s7 + $0x48] ss:$28 sps:$4 sm:$0xff]  }
 0x3d9   : > { %5512 = vmatprep.subr.bf16.mxu0 %v9324_v6  ;;  %5738 = vmatprep.subr.bf16.mxu1 %v9327_v40  ;;  %v9338_v10 = vld [vmem:[%s12433_s7 + $0x18] ss:$28 sps:$4 sm:$0xff]   ;;  %v9345_v16 = vld [vmem:[%s12433_s7 + $0x210] ss:$28 sps:$4 sm:$0xff]   ;;  %v9353_v21 = vld [vmem:[%s12433_s7 + $0x248] ss:$28 sps:$4 sm:$0xff]  }
 0x3da   : > { %5473 = vmatprep.mubr.bf16.mxu0 %v11521_v54  ;;  %5699 = vmatprep.mubr.bf16.mxu1 %v11521_v54  ;;  %v9346_v20 = vld [vmem:[%s12433_s7 + $0x50] ss:$28 sps:$4 sm:$0xff]   ;;  %v9342_v38 = vld [vmem:[%s12433_s7 + $0x80] ss:$28 sps:$4 sm:$0xff]   ;;  %v9354_v22 = vld [vmem:[%s12433_s7 + $0x88] ss:$28 sps:$4 sm:$0xff]  }
 0x3db   : > { %5474 = vmatmul.mubr.bf16.gmra.mrb[124].mxu0 %v11517_v58  ;;  %5700 = vmatmul.mubr.bf16.gmra.mrb[124].mxu1 %v11517_v58  ;;  %v9349_v6 = vld [vmem:[%s12433_s7 + $0xbc] ss:$28 sps:$4 sm:$0xff]   ;;  %v9352_v39 = vld [vmem:[%s12433_s7 + $0xf4] ss:$28 sps:$4 sm:$0xff]   ;;  %v9357_v48 = vld [vmem:[%s12433_s7 + $0x12c] ss:$28 sps:$4 sm:$0xff]  }
 0x3dc   : > { %5513 = vmatpush1.bf16.msra.mxu0 %v9322_v1  ;;  %5516 = vmatprep.mubr.bf16.mxu0 %v11215_v43  ;;  %v9361_v23 = vld [vmem:[%s12433_s7 + $0x280] ss:$28 sps:$4 sm:$0xff]   ;;  %v9347_v24 = vld [vmem:[%s12433_s7 + $0xb8] ss:$28 sps:$4 sm:$0xff]   ;;  %v9350_v26 = vld [vmem:[%s12433_s7 + $0xf0] ss:$28 sps:$4 sm:$0xff]  }
 0x3dd   : > { %5739 = vmatpush1.bf16.msra.mxu1 %v9325_v2  ;;  %5742 = vmatprep.mubr.bf16.mxu1 %v11215_v43  ;;  %v9362_v40 = vld [vmem:[%s12433_s7 + $0xc0] ss:$28 sps:$4 sm:$0xff]   ;;  %v9369_v25 = vld [vmem:[%s12433_s7 + $0x2b8] ss:$28 sps:$4 sm:$0xff]   ;;  %v9377_v1 = vld [vmem:[%s12433_s7 + $0x2f0] ss:$28 sps:$4 sm:$0xff]  }
 0x3de   : > { %5514 = vmatprep.subr.bf16.mxu0 %v9330_v3  ;;  %5740 = vmatprep.subr.bf16.mxu1 %v9333_v4  ;;  %v9370_v57 = vld [vmem:[%s12433_s7 + $0xf8] ss:$28 sps:$4 sm:$0xff]   ;;  %v9355_v2 = vld [vmem:[%s12433_s7 + $0x128] ss:$28 sps:$4 sm:$0xff]   ;;  %v9378_v4 = vld [vmem:[%s12433_s7 + $0x130] ss:$28 sps:$4 sm:$0xff]  }
 0x3df   : > { %v9360_v3 = vld [vmem:[%s12433_s7 + $0x164] ss:$28 sps:$4 sm:$0xff]  }
 0x3e0   : > { %5515 = vmatpush1.bf16.msra.mxu0 %v9328_v5  ;;  %v9385_v5 = vld [vmem:[%s12433_s7 + $0x328] ss:$28 sps:$4 sm:$0xff]  }
 0x3e1   : > { %5741 = vmatpush1.bf16.msra.mxu1 %v9331_v41  ;;  %5823 = vmatprep.subr.bf16.mxu0 %v9336_v7  ;;  %v9358_v41 = vld [vmem:[%s12433_s7 + $0x160] ss:$28 sps:$4 sm:$0xff]  }
 0x3e2   : > { %8102 = vmatprep.subr.bf16.mxu1 %v9337_v8  ;;  %v9365_v7 = vld [vmem:[%s12433_s7 + $0x19c] ss:$28 sps:$4 sm:$0xff]   ;;  %v9386_v8 = vld [vmem:[%s12433_s7 + $0x168] ss:$28 sps:$4 sm:$0xff]  }
 0x3e3   : > { %5517 = vmatmul.mubr.bf16.vlgmr.msra.gmra.mrb[96].mxu0 %v11211_v35 }
 0x3e4   : > { %5743 = vmatmul.mubr.bf16.vlgmr.msra.gmra.mrb[96].mxu1 %v11211_v35  ;;  %5526 = vmatprep.mubr.bf16.mxu0 %v11259_v14 }
 0x3e5   : > { %5752 = vmatprep.mubr.bf16.mxu1 %v11259_v14  ;;  %5824 = vmatpush1.bf16.msra.mxu0 %v9334_v9  ;;  %v9393_v9 = vld [vmem:[%s12433_s7 + $0x360] ss:$28 sps:$4 sm:$0xff]  }
 0x3e6   : > { %8103 = vmatpush3.bf16.msra.mxu1 %v9338_v10  ;;  %5825 = vmatprep.subr.bf16.mxu0 %v9341_v15  ;;  %v9363_v10 = vld [vmem:[%s12433_s7 + $0x198] ss:$28 sps:$4 sm:$0xff]  }
 0x3e7   : > { %8104 = vmatprep.subr.bf16.mxu1 %v9345_v16  ;;  %v9368_v15 = vld [vmem:[%s12433_s7 + $0x1d4] ss:$28 sps:$4 sm:$0xff]   ;;  %v9394_v16 = vld [vmem:[%s12433_s7 + $0x1a0] ss:$28 sps:$4 sm:$0xff]  }
 0x3e9   : > { %5826 = vmatpush1.bf16.msra.mxu0 %v9339_v18  ;;  %v9401_v18 = vld [vmem:[%s12433_s7 + $0x558] ss:$28 sps:$4 sm:$0xff]  }
 0x3ea   : > { %5827 = vmatprep.subr.bf16.mxu0 %v9344_v19  ;;  %8105 = vmatpush3.bf16.msra.mxu1 %v9346_v20  ;;  %v9366_v19 = vld [vmem:[%s12433_s7 + $0x1d0] ss:$28 sps:$4 sm:$0xff]  }
 0x3eb   : > { %5527 = vmatmul.mubr.bf16.gmra.mrb[100].mxu0 %v11255_v12  ;;  %8106 = vmatprep.subr.bf16.mxu1 %v9353_v21  ;;  %v9373_v20 = vld [vmem:[%s12433_s7 + $0x20c] ss:$28 sps:$4 sm:$0xff]  }
 0x3ec   : > { %5753 = vmatmul.mubr.bf16.gmra.mrb[100].mxu1 %v11255_v12  ;;  %5536 = vmatprep.mubr.bf16.mxu0 %v11303_v63  ;;  %v9371_v21 = vld [vmem:[%s12433_s7 + $0x208] ss:$28 sps:$4 sm:$0xff]  }
 0x3ed   : > { %5762 = vmatprep.mubr.bf16.mxu1 %v11303_v63  ;;  %5828 = vmatpush1.bf16.msra.mxu0 %v9342_v38  ;;  %v9376_v38 = vld [vmem:[%s12433_s7 + $0x244] ss:$28 sps:$4 sm:$0xff]  }
 0x3ee   : > { %5829 = vmatprep.subr.bf16.mxu0 %v9349_v6  ;;  %8107 = vmatpush3.bf16.msra.mxu1 %v9354_v22  ;;  %v9374_v6 = vld [vmem:[%s12433_s7 + $0x240] ss:$28 sps:$4 sm:$0xff]  }
 0x3ef   : > { %8108 = vmatprep.subr.bf16.mxu1 %v9361_v23  ;;  %v9381_v22 = vld [vmem:[%s12433_s7 + $0x27c] ss:$28 sps:$4 sm:$0xff]  }
 0x3f0   : > { %v9379_v23 = vld [vmem:[%s12433_s7 + $0x278] ss:$28 sps:$4 sm:$0xff]  }
 0x3f1   : > { %5830 = vmatpush1.bf16.msra.mxu0 %v9347_v24  ;;  %v9384_v24 = vld [vmem:[%s12433_s7 + $0x2b4] ss:$28 sps:$4 sm:$0xff]  }
 0x3f2   : > { %5831 = vmatprep.subr.bf16.mxu0 %v9352_v39  ;;  %8109 = vmatpush3.bf16.msra.mxu1 %v9362_v40  ;;  %v9382_v39 = vld [vmem:[%s12433_s7 + $0x2b0] ss:$28 sps:$4 sm:$0xff]  }
 0x3f3   : > { %5537 = vmatmul.mubr.bf16.gmra.mrb[104].mxu0 %v11299_v61  ;;  %8110 = vmatprep.subr.bf16.mxu1 %v9369_v25  ;;  %v9389_v40 = vld [vmem:[%s12433_s7 + $0x2ec] ss:$28 sps:$4 sm:$0xff]  }
 0x3f4   : > { %5763 = vmatmul.mubr.bf16.gmra.mrb[104].mxu1 %v11299_v61  ;;  %5546 = vmatprep.mubr.bf16.mxu0 %v11347_v53  ;;  %v9387_v25 = vld [vmem:[%s12433_s7 + $0x2e8] ss:$28 sps:$4 sm:$0xff]  }
 0x3f5   : > { %5772 = vmatprep.mubr.bf16.mxu1 %v11347_v53  ;;  %5832 = vmatpush1.bf16.msra.mxu0 %v9350_v26  ;;  %v9392_v26 = vld [vmem:[%s12433_s7 + $0x324] ss:$28 sps:$4 sm:$0xff]  }
 0x3f6   : > { %5833 = vmatprep.subr.bf16.mxu0 %v9357_v48  ;;  %8111 = vmatpush3.bf16.msra.mxu1 %v9370_v57  ;;  %v9390_v48 = vld [vmem:[%s12433_s7 + $0x320] ss:$28 sps:$4 sm:$0xff]  }
 0x3f7   : > { %8112 = vmatprep.subr.bf16.mxu1 %v9377_v1  ;;  %v9397_v57 = vld [vmem:[%s12433_s7 + $0x35c] ss:$28 sps:$4 sm:$0xff]  }
 0x3f8   : > { %v9395_v1 = vld [vmem:[%s12433_s7 + $0x358] ss:$28 sps:$4 sm:$0xff]  }
 0x3f9   : > { %5834 = vmatpush1.bf16.msra.mxu0 %v9355_v2  ;;  %v9400_v2 = vld [vmem:[%s12433_s7 + $0x394] ss:$28 sps:$4 sm:$0xff]  }
 0x3fa   : > { %5835 = vmatprep.subr.bf16.mxu0 %v9360_v3  ;;  %8113 = vmatpush3.bf16.msra.mxu1 %v9378_v4  ;;  %v9398_v3 = vld [vmem:[%s12433_s7 + $0x390] ss:$28 sps:$4 sm:$0xff]   ;;  %v9402_v4 = vld [vmem:[%s12433_s7 + $0x398] ss:$28 sps:$4 sm:$0xff]  }
 0x3fb   : > { %5547 = vmatmul.mubr.bf16.gmra.mrb[108].mxu0 %v11343_v51  ;;  %8114 = vmatprep.subr.bf16.mxu1 %v9385_v5  ;;  %v9409_v5 = vld [vmem:[%s12433_s7 + $0x590] ss:$28 sps:$4 sm:$0xff]  }
 0x3fc   : > { %5773 = vmatmul.mubr.bf16.gmra.mrb[108].mxu1 %v11343_v51  ;;  %5556 = vmatprep.mubr.bf16.mxu0 %v11391_v46 }
 0x3fd   : > { %5782 = vmatprep.mubr.bf16.mxu1 %v11391_v46  ;;  %5836 = vmatpush1.bf16.msra.mxu0 %v9358_v41  ;;  %v9403_v41 = vld [vmem:[%s12433_s7 + $0x3c8] ss:$28 sps:$4 sm:$0xff]  }
 0x3fe   : > { %5837 = vmatprep.subr.bf16.mxu0 %v9365_v7  ;;  %8115 = vmatpush3.bf16.msra.mxu1 %v9386_v8  ;;  %v9408_v7 = vld [vmem:[%s12433_s7 + $0x404] ss:$28 sps:$4 sm:$0xff]   ;;  %v9410_v8 = vld [vmem:[%s12433_s7 + $0x3d0] ss:$28 sps:$4 sm:$0xff]  }
 0x3ff   : > { %8116 = vmatprep.subr.bf16.mxu1 %v9393_v9  ;;  %v9413_v9 = vld [vmem:[%s12433_s7 + $0x43c] ss:$28 sps:$4 sm:$0xff]  }
 0x401   : > { %5838 = vmatpush1.bf16.msra.mxu0 %v9363_v10  ;;  %v9418_v10 = vld [vmem:[%s12433_s7 + $0x408] ss:$28 sps:$4 sm:$0xff]  }
 0x402   : > { %5839 = vmatprep.subr.bf16.mxu0 %v9368_v15  ;;  %8117 = vmatpush3.bf16.msra.mxu1 %v9394_v16  ;;  %v9425_v15 = vld [vmem:[%s12433_s7 + $0x600] ss:$28 sps:$4 sm:$0xff]   ;;  %v9411_v16 = vld [vmem:[%s12433_s7 + $0x438] ss:$28 sps:$4 sm:$0xff]  }
 0x403   : > { %5557 = vmatmul.mubr.bf16.gmra.mrb[112].mxu0 %v11387_v44  ;;  %8166 = vmatprep.subr.bf16.mxu1 %v9401_v18  ;;  %v9416_v18 = vld [vmem:[%s12433_s7 + $0x474] ss:$28 sps:$4 sm:$0xff]  }
 0x404   : > { %5783 = vmatmul.mubr.bf16.gmra.mrb[112].mxu1 %v11387_v44  ;;  %5566 = vmatprep.mubr.bf16.mxu0 %v11435_v47 }
 0x405   : > { %5792 = vmatprep.mubr.bf16.mxu1 %v11435_v47  ;;  %5840 = vmatpush1.bf16.msra.mxu0 %v9366_v19  ;;  %v9414_v19 = vld [vmem:[%s12433_s7 + $0x470] ss:$28 sps:$4 sm:$0xff]  }
 0x406   : > { %5841 = vmatprep.subr.bf16.mxu0 %v9373_v20  ;;  %v9433_v20 = vld [vmem:[%s12433_s7 + $0x638] ss:$28 sps:$4 sm:$0xff]  }
 0x409   : > { %5842 = vmatpush1.bf16.msra.mxu0 %v9371_v21  ;;  %v9434_v21 = vld [vmem:[%s12433_s7 + $0x478] ss:$28 sps:$4 sm:$0xff]  }
 0x40a   : > { %5843 = vmatprep.subr.bf16.mxu0 %v9376_v38  ;;  %v9419_v38 = vld [vmem:[%s12433_s7 + $0x4a8] ss:$28 sps:$4 sm:$0xff]  }
 0x40b   : > { %5567 = vmatmul.mubr.bf16.gmra.mrb[116].mxu0 %v11431_v28 }
 0x40c   : > { %5793 = vmatmul.mubr.bf16.gmra.mrb[116].mxu1 %v11431_v28  ;;  %5576 = vmatprep.mubr.bf16.mxu0 %v11479_v17 }
 0x40d   : > { %5802 = vmatprep.mubr.bf16.mxu1 %v11479_v17  ;;  %5844 = vmatpush1.bf16.msra.mxu0 %v9374_v6  ;;  %v9441_v6 = vld [vmem:[%s12433_s7 + $0x670] ss:$28 sps:$4 sm:$0xff]  }
 0x40e   : > { %5845 = vmatprep.subr.bf16.mxu0 %v9381_v22  ;;  %v9422_v22 = vld [vmem:[%s12433_s7 + $0x4e0] ss:$28 sps:$4 sm:$0xff]  }
 0x411   : > { %5846 = vmatpush1.bf16.msra.mxu0 %v9379_v23  ;;  %v9429_v23 = vld [vmem:[%s12433_s7 + $0x51c] ss:$28 sps:$4 sm:$0xff]  }
 0x412   : > { %5847 = vmatprep.subr.bf16.mxu0 %v9384_v24  ;;  %v9449_v24 = vld [vmem:[%s12433_s7 + $0x6a8] ss:$28 sps:$4 sm:$0xff]  }
 0x413   : > { %5577 = vmatmul.mubr.bf16.gmra.mrb[120].mxu0 %v11475_v55 }
 0x414   : > { %5803 = vmatmul.mubr.bf16.gmra.mrb[120].mxu1 %v11475_v55  ;;  %5586 = vmatprep.mubr.bf16.mxu0 %v11523_v0 }
 0x415   : > { %5812 = vmatprep.mubr.bf16.mxu1 %v11523_v0  ;;  %5848 = vmatpush1.bf16.msra.mxu0 %v9382_v39  ;;  %v9427_v39 = vld [vmem:[%s12433_s7 + $0x518] ss:$28 sps:$4 sm:$0xff]  }
 0x416   : > { %5849 = vmatprep.subr.bf16.mxu0 %v9389_v40  ;;  %v9432_v40 = vld [vmem:[%s12433_s7 + $0x554] ss:$28 sps:$4 sm:$0xff]  }
 0x419   : > { %5850 = vmatpush1.bf16.msra.mxu0 %v9387_v25  ;;  %v9430_v25 = vld [vmem:[%s12433_s7 + $0x550] ss:$28 sps:$4 sm:$0xff]  }
 0x41a   : > { %5851 = vmatprep.subr.bf16.mxu0 %v9392_v26  ;;  %v9457_v26 = vld [vmem:[%s12433_s7 + $0x6e0] ss:$28 sps:$4 sm:$0xff]  }
 0x41b   : > { %5587 = vmatmul.mubr.bf16.gmra.mrb[124].mxu0 %v11519_v59 }
 0x41c   : > { %5813 = vmatmul.mubr.bf16.gmra.mrb[124].mxu1 %v11519_v59  ;;  %5855 = vmatprep.mubr.bf16.mxu0 %v11213_v42 }
 0x41d   : > { %5852 = vmatpush1.bf16.msra.mxu0 %v9390_v48  ;;  %6081 = vmatprep.mubr.bf16.mxu1 %v11213_v42  ;;  %v9405_v42 = vld [vmem:[%s12433_s7 + $0x3cc] ss:$28 sps:$4 sm:$0xff]   ;;  %v9458_v48 = vld [vmem:[%s12433_s7 + $0x520] ss:$28 sps:$4 sm:$0xff]  }
 0x41e   : > { %5853 = vmatprep.subr.bf16.mxu0 %v9397_v57  ;;  %v9435_v57 = vld [vmem:[%s12433_s7 + $0x588] ss:$28 sps:$4 sm:$0xff]  }
 0x421   : > { %5854 = vmatpush1.bf16.msra.mxu0 %v9395_v1  ;;  %v9440_v1 = vld [vmem:[%s12433_s7 + $0x5c4] ss:$28 sps:$4 sm:$0xff]  }
 0x422   : > { %5936 = vmatprep.subr.bf16.mxu0 %v9400_v2  ;;  %v9445_v2 = vld [vmem:[%s12433_s7 + $0x5fc] ss:$28 sps:$4 sm:$0xff]  }
 0x424   : > { %5856 = vmatmul.mubr.bf16.vlgmr.msra.gmra.mrb[128].mxu0 %v11209_v31  ;;  %6082 = vmatmul.mubr.bf16.vlgmr.msra.gmra.mrb[128].mxu1 %v11209_v31  ;;  %v9417_v31 = vld [vmem:[%s12433_s7 + $0x5c8] ss:$28 sps:$4 sm:$0xff]  }
 0x425   : > { %5865 = vmatprep.mubr.bf16.mxu0 %v11257_v13  ;;  %5937 = vmatpush1.bf16.msra.mxu0 %v9398_v3  ;;  %v9448_v3 = vld [vmem:[%s12433_s7 + $0x634] ss:$28 sps:$4 sm:$0xff]  }
 0x426   : > { %6089 = vmatprep.mubr.bf16.mxu1 %v11257_v13  ;;  %8167 = vmatpush3.bf16.msra.mxu1 %v9402_v4  ;;  %v9406_v13 = vld [vmem:[%s12433_s7 + $0x400] ss:$28 sps:$4 sm:$0xff]   ;;  %v9446_v4 = vld [vmem:[%s12433_s7 + $0x630] ss:$28 sps:$4 sm:$0xff]  }
 0x427   : > { %5938 = vmatprep.subr.bf16.mxu0 %v9405_v42  ;;  %8168 = vmatprep.subr.bf16.mxu1 %v9409_v5  ;;  %v9456_v42 = vld [vmem:[%s12433_s7 + $0x6a4] ss:$28 sps:$4 sm:$0xff]  }
 0x428   : > { %v9454_v5 = vld [vmem:[%s12433_s7 + $0x6a0] ss:$28 sps:$4 sm:$0xff]  }
 0x429   : > { %5939 = vmatpush1.bf16.msra.mxu0 %v9403_v41 }
 0x42a   : > { %5940 = vmatprep.subr.bf16.mxu0 %v9408_v7  ;;  %8169 = vmatpush3.bf16.msra.mxu1 %v9410_v8 }
 0x42b   : > { %8170 = vmatprep.subr.bf16.mxu1 %v9417_v31 }
 0x42c   : > { %5866 = vmatmul.mubr.bf16.gmra.mrb[132].mxu0 %v11253_v11  ;;  %6090 = vmatmul.mubr.bf16.gmra.mrb[132].mxu1 %v11253_v11  ;;  %v9426_v11 = vld [vmem:[%s12433_s7 + $0x440] ss:$28 sps:$4 sm:$0xff]  }
 0x42d   : > { %5875 = vmatprep.mubr.bf16.mxu0 %v11301_v62  ;;  %5941 = vmatpush1.bf16.msra.mxu0 %v9406_v13 }
 0x42e   : > { %6097 = vmatprep.mubr.bf16.mxu1 %v11301_v62  ;;  %5942 = vmatprep.subr.bf16.mxu0 %v9413_v9  ;;  %v9421_v62 = vld [vmem:[%s12433_s7 + $0x4ac] ss:$28 sps:$4 sm:$0xff]  }
 0x42f   : > { %8171 = vmatpush3.bf16.msra.mxu1 %v9418_v10 }
 0x430   : > { %8172 = vmatprep.subr.bf16.mxu1 %v9425_v15 }
 0x431   : > { %5943 = vmatpush1.bf16.msra.mxu0 %v9411_v16 }
 0x432   : > { %5944 = vmatprep.subr.bf16.mxu0 %v9416_v18 }
 0x433   : > { %8173 = vmatpush3.bf16.msra.mxu1 %v9426_v11 }
 0x434   : > { %5876 = vmatmul.mubr.bf16.gmra.mrb[136].mxu0 %v11297_v60  ;;  %6098 = vmatmul.mubr.bf16.gmra.mrb[136].mxu1 %v11297_v60  ;;  %v9424_v60 = vld [vmem:[%s12433_s7 + $0x4e4] ss:$28 sps:$4 sm:$0xff]  }
 0x435   : > { %5885 = vmatprep.mubr.bf16.mxu0 %v11345_v52  ;;  %5945 = vmatpush1.bf16.msra.mxu0 %v9414_v19 }
 0x436   : > { %6105 = vmatprep.mubr.bf16.mxu1 %v11345_v52  ;;  %5946 = vmatprep.subr.bf16.mxu0 %v9421_v62  ;;  %v9442_v52 = vld [vmem:[%s12433_s7 + $0x4b0] ss:$28 sps:$4 sm:$0xff]  }
 0x437   : > { %8174 = vmatprep.subr.bf16.mxu1 %v9433_v20 }
 0x438   : > { %8175 = vmatpush3.bf16.msra.mxu1 %v9434_v21 }
 0x439   : > { %5947 = vmatpush1.bf16.msra.mxu0 %v9419_v38  ;;  %8176 = vmatprep.subr.bf16.mxu1 %v9441_v6 }
 0x43a   : > { %5948 = vmatprep.subr.bf16.mxu0 %v9424_v60 }
 0x43c   : > { %5886 = vmatmul.mubr.bf16.gmra.mrb[140].mxu0 %v11341_v50  ;;  %6106 = vmatmul.mubr.bf16.gmra.mrb[140].mxu1 %v11341_v50  ;;  %v9450_v50 = vld [vmem:[%s12433_s7 + $0x4e8] ss:$28 sps:$4 sm:$0xff]  }
 0x43d   : > { %5895 = vmatprep.mubr.bf16.mxu0 %v11389_v45  ;;  %5949 = vmatpush1.bf16.msra.mxu0 %v9422_v22 }
 0x43e   : > { %6113 = vmatprep.mubr.bf16.mxu1 %v11389_v45  ;;  %5950 = vmatprep.subr.bf16.mxu0 %v9429_v23  ;;  %v9437_v45 = vld [vmem:[%s12433_s7 + $0x58c] ss:$28 sps:$4 sm:$0xff]  }
 0x43f   : > { %8177 = vmatpush3.bf16.msra.mxu1 %v9442_v52 }
 0x440   : > { %8178 = vmatprep.subr.bf16.mxu1 %v9449_v24 }
 0x441   : > { %5951 = vmatpush1.bf16.msra.mxu0 %v9427_v39 }
 0x442   : > { %5952 = vmatprep.subr.bf16.mxu0 %v9432_v40 }
 0x443   : > { %8179 = vmatpush3.bf16.msra.mxu1 %v9450_v50 }
 0x444   : > { %5896 = vmatmul.mubr.bf16.gmra.mrb[144].mxu0 %v11385_v30  ;;  %6114 = vmatmul.mubr.bf16.gmra.mrb[144].mxu1 %v11385_v30  ;;  %v9438_v30 = vld [vmem:[%s12433_s7 + $0x5c0] ss:$28 sps:$4 sm:$0xff]  }
 0x445   : > { %5905 = vmatprep.mubr.bf16.mxu0 %v11433_v29  ;;  %5953 = vmatpush1.bf16.msra.mxu0 %v9430_v25 }
 0x446   : > { %6121 = vmatprep.mubr.bf16.mxu1 %v11433_v29  ;;  %5954 = vmatprep.subr.bf16.mxu0 %v9437_v45  ;;  %v9443_v29 = vld [vmem:[%s12433_s7 + $0x5f8] ss:$28 sps:$4 sm:$0xff]  }
 0x447   : > { %8180 = vmatprep.subr.bf16.mxu1 %v9457_v26 }
 0x448   : > { %8181 = vmatpush3.bf16.msra.mxu1 %v9458_v48 }
 0x449   : > { %5955 = vmatpush1.bf16.msra.mxu0 %v9435_v57 }
 0x44a   : > { %5956 = vmatprep.subr.bf16.mxu0 %v9440_v1 }
 0x44c   : > { %5906 = vmatmul.mubr.bf16.gmra.mrb[148].mxu0 %v11429_v27  ;;  %6122 = vmatmul.mubr.bf16.gmra.mrb[148].mxu1 %v11429_v27  ;;  %v9453_v27 = vld [vmem:[%s12433_s7 + $0x66c] ss:$28 sps:$4 sm:$0xff]  }
 0x44d   : > { %5915 = vmatprep.mubr.bf16.mxu0 %v11477_v56  ;;  %5957 = vmatpush1.bf16.msra.mxu0 %v9438_v30 }
 0x44e   : > { %6129 = vmatprep.mubr.bf16.mxu1 %v11477_v56  ;;  %5958 = vmatprep.subr.bf16.mxu0 %v9445_v2  ;;  %v9451_v56 = vld [vmem:[%s12433_s7 + $0x668] ss:$28 sps:$4 sm:$0xff]  }
 0x451   : > { %5959 = vmatpush1.bf16.msra.mxu0 %v9443_v29 }
 0x452   : > { %5960 = vmatprep.subr.bf16.mxu0 %v9448_v3 }
 0x454   : > { %5916 = vmatmul.mubr.bf16.gmra.mrb[152].mxu0 %v11473_v49  ;;  %6130 = vmatmul.mubr.bf16.gmra.mrb[152].mxu1 %v11473_v49  ;;  %v9461_v49 = vld [vmem:[%s12433_s7 + $0x6dc] ss:$28 sps:$4 sm:$0xff]  }
 0x455   : > { %5925 = vmatprep.mubr.bf16.mxu0 %v11521_v54  ;;  %5961 = vmatpush1.bf16.msra.mxu0 %v9446_v4 }
 0x456   : > { %6137 = vmatprep.mubr.bf16.mxu1 %v11521_v54  ;;  %5962 = vmatprep.subr.bf16.mxu0 %v9453_v27  ;;  %v9459_v54 = vld [vmem:[%s12433_s7 + $0x6d8] ss:$28 sps:$4 sm:$0xff]  }
 0x459   : > { %5963 = vmatpush1.bf16.msra.mxu0 %v9451_v56 }
 0x45a   : > { %5964 = vmatprep.subr.bf16.mxu0 %v9456_v42 }
 0x45c   : > { %5926 = vmatmul.mubr.bf16.gmra.mrb[156].mxu0 %v11517_v58  ;;  %6138 = vmatmul.mubr.bf16.gmra.mrb[156].mxu1 %v11517_v58 }
 0x45d   : > { %5965 = vmatpush1.bf16.msra.mxu0 %v9454_v5  ;;  %5968 = vmatprep.mubr.bf16.mxu0 %v11215_v43 }
 0x45e   : > { %6178 = vmatprep.mubr.bf16.mxu1 %v11215_v43  ;;  %5966 = vmatprep.subr.bf16.mxu0 %v9461_v49 }
 0x461   : > { %5967 = vmatpush1.bf16.msra.mxu0 %v9459_v54 }
 0x464   : > { %5969 = vmatmul.mubr.bf16.vlgmr.msra.gmra.mrb[128].mxu0 %v11211_v35  ;;  %6179 = vmatmul.mubr.bf16.vlgmr.msra.gmra.mrb[160].mxu1 %v11211_v35  ;;  %v4182_v35 = vld [vmem:[%s12434_s8] sm:$0x7f] }
 0x465   : > { %5978 = vmatprep.mubr.bf16.mxu0 %v11259_v14  ;;  %6186 = vmatprep.mubr.bf16.mxu1 %v11259_v14  ;;  %v11935_v43 = vrot.slane %v4182_v35, %v10771_v33  ;;  %v11941_v14 = vrot.slane %v4182_v35, %v10780_v36 }
 0x46c   : > { %5979 = vmatmul.mubr.bf16.gmra.mrb[132].mxu0 %v11255_v12  ;;  %6187 = vmatmul.mubr.bf16.gmra.mrb[164].mxu1 %v11255_v12  ;;  %v11938_v12 = vrot.slane %v4182_v35, %v10774_v34 }
 0x46d   : > { %5988 = vmatprep.mubr.bf16.mxu0 %v11303_v63  ;;  %6194 = vmatprep.mubr.bf16.mxu1 %v11303_v63 }
 0x474   : > { %5989 = vmatmul.mubr.bf16.gmra.mrb[136].mxu0 %v11299_v61  ;;  %6195 = vmatmul.mubr.bf16.gmra.mrb[168].mxu1 %v11299_v61  ;;  %v11944_v61 = vrot.slane %v4182_v35, %v10783_v37 }
 0x475   : > { %5998 = vmatprep.mubr.bf16.mxu0 %v11347_v53  ;;  %6202 = vmatprep.mubr.bf16.mxu1 %v11347_v53 }
 0x47c   : > { %5999 = vmatmul.mubr.bf16.gmra.mrb[140].mxu0 %v11343_v51  ;;  %6203 = vmatmul.mubr.bf16.gmra.mrb[172].mxu1 %v11343_v51 }
 0x47d   : > { %6008 = vmatprep.mubr.bf16.mxu0 %v11391_v46  ;;  %6210 = vmatprep.mubr.bf16.mxu1 %v11391_v46 }
 0x484   : > { %6009 = vmatmul.mubr.bf16.gmra.mrb[144].mxu0 %v11387_v44  ;;  %6211 = vmatmul.mubr.bf16.gmra.mrb[176].mxu1 %v11387_v44 }
 0x485   : > { %6018 = vmatprep.mubr.bf16.mxu0 %v11435_v47  ;;  %6218 = vmatprep.mubr.bf16.mxu1 %v11435_v47 }
 0x48c   : > { %6019 = vmatmul.mubr.bf16.gmra.mrb[148].mxu0 %v11431_v28  ;;  %6219 = vmatmul.mubr.bf16.gmra.mrb[180].mxu1 %v11431_v28 }
 0x48d   : > { %6028 = vmatprep.mubr.bf16.mxu0 %v11479_v17  ;;  %6226 = vmatprep.mubr.bf16.mxu1 %v11479_v17 }
 0x494   : > { %6029 = vmatmul.mubr.bf16.gmra.mrb[152].mxu0 %v11475_v55  ;;  %6227 = vmatmul.mubr.bf16.gmra.mrb[184].mxu1 %v11475_v55 }
 0x495   : > { %6038 = vmatprep.mubr.bf16.mxu0 %v11523_v0  ;;  %6234 = vmatprep.mubr.bf16.mxu1 %v11523_v0 }
 0x49c   : > { %6039 = vmatmul.mubr.bf16.gmra.mrb[156].mxu0 %v11519_v59  ;;  %6235 = vmatmul.mubr.bf16.gmra.mrb[188].mxu1 %v11519_v59 }
 0x4b6   : > { %v5518_v63 = vpop.f32.mrb[96].mxu0 }
 0x4b7   : > { %v8294_v51 = vadd.f32 %v5518_v63, %v11935_v43  ;;  %v5744_v53 = vpop.f32.mrb[96].mxu1  ;;  %v5520_v44 = vpop.f32.mrb[97].mxu0 }
 0x4b8   : > { %v8326_v46 = vadd.f32 %v5744_v53, %v11938_v12  ;;  %v8295_v28 = vadd.f32 %v5520_v44, %v11941_v14  ;;  %v5746_v33 = vpop.f32.mrb[97].mxu1  ;;  %v5522_v47 = vpop.f32.mrb[98].mxu0 }
 0x4b9   : > { %v6243_v55 = vsub.f32 0.0, %v8294_v51  ;;  %v8327_v34 = vadd.f32 %v5746_v33, %v11944_v61  ;;  %v8296_v36 = vadd.f32 %v5522_v47, %v11935_v43  ;;  %v5748_v17 = vpop.f32.mrb[98].mxu1  ;;  %v5524_v58 = vpop.f32.mrb[99].mxu0 }
 0x4ba   : > { %v6245_v37 = vsub.f32 0.0, %v8326_v46  ;;  %v6244_v59 = vsub.f32 0.0, %v8295_v28  ;;  %v8328_v0 = vadd.f32 %v5748_v17, %v11938_v12  ;;  %v8297_v41 = vadd.f32 %v5524_v58, %v11941_v14  ;;  %v5750_v7 = vpop.f32.mrb[99].mxu1 }
 0x4bb   : > { %v6355_v8 = vmul.f32 1.442695, %v6243_v55  ;;  %v6246_v31 = vsub.f32 0.0, %v8327_v34  ;;  %v6250_v13 = vsub.f32 0.0, %v8296_v36  ;;  %v8329_v9 = vadd.f32 %v5750_v7, %v11944_v61 }
 0x4bc   : > { %v6359_v10 = vmul.f32 1.442695, %v6245_v37  ;;  %v6357_v15 = vmul.f32 1.442695, %v6244_v59  ;;  %v6252_v16 = vsub.f32 0.0, %v8328_v0  ;;  %v6251_v18 = vsub.f32 0.0, %v8297_v41 }
 0x4bd   : > { %9462 = vpow2.f32 %v6355_v8  ;;  %v6361_v11 = vmul.f32 1.442695, %v6246_v31  ;;  %v6369_v19 = vmul.f32 1.442695, %v6250_v13  ;;  %v6253_v62 = vsub.f32 0.0, %v8329_v9 }
 0x4be   : > { %9464 = vpow2.f32 %v6359_v10  ;;  %v6373_v20 = vmul.f32 1.442695, %v6252_v16  ;;  %v5528_v21 = vpop.f32.mrb[100].mxu0  ;;  %v6371_v38 = vmul.f32 1.442695, %v6251_v18 }
 0x4bf   : > { %9466 = vpow2.f32 %v6357_v15  ;;  %v8298_v6 = vadd.f32 %v5528_v21, %v11935_v43  ;;  %v5754_v60 = vpop.f32.mrb[100].mxu1  ;;  %v5530_v22 = vpop.f32.mrb[101].mxu0  ;;  %v6375_v23 = vmul.f32 1.442695, %v6253_v62 }
 0x4c0   : > { %9468 = vpow2.f32 %v6361_v11  ;;  %v8330_v52 = vadd.f32 %v5754_v60, %v11938_v12  ;;  %v8299_v24 = vadd.f32 %v5530_v22, %v11941_v14  ;;  %v5756_v39 = vpop.f32.mrb[101].mxu1  ;;  %v5532_v40 = vpop.f32.mrb[102].mxu0 }
 0x4c1   : > { %9470 = vpow2.f32 %v6369_v19  ;;  %v6257_v50 = vsub.f32 0.0, %v8298_v6  ;;  %v8331_v25 = vadd.f32 %v5756_v39, %v11944_v61  ;;  %v8300_v45 = vadd.f32 %v5532_v40, %v11935_v43  ;;  %v5758_v26 = vpop.f32.mrb[102].mxu1  ;;  %v5534_v48 = vpop.f32.mrb[103].mxu0 }
 0x4c2   : > { %9472 = vpow2.f32 %v6373_v20  ;;  %v6259_v57 = vsub.f32 0.0, %v8330_v52  ;;  %v6258_v1 = vsub.f32 0.0, %v8299_v24  ;;  %v5760_v30 = vpop.f32.mrb[103].mxu1  ;;  %v8332_v54 = vadd.f32 %v5758_v26, %v11938_v12 }
 0x4c3   : > { %9474 = vpow2.f32 %v6371_v38  ;;  %v6383_v2 = vmul.f32 1.442695, %v6257_v50  ;;  %v6260_v29 = vsub.f32 0.0, %v8331_v25  ;;  %v6264_v3 = vsub.f32 0.0, %v8300_v45 }
 0x4c4   : > { %9476 = vpow2.f32 %v6375_v23  ;;  %v6387_v4 = vmul.f32 1.442695, %v6259_v57  ;;  %v6385_v27 = vmul.f32 1.442695, %v6258_v1  ;;  %v8301_v44 = vadd.f32 %v5534_v48, %v11941_v14 }
 0x4c5   : > { %9478 = vpow2.f32 %v6383_v2  ;;  %v6389_v56 = vmul.f32 1.442695, %v6260_v29  ;;  %v6397_v42 = vmul.f32 1.442695, %v6264_v3  ;;  %v6266_v0 = vsub.f32 0.0, %v8332_v54 }
 0x4c6   : > { %9480 = vpow2.f32 %v6387_v4  ;;  %v5538_v5 = vpop.f32.mrb[104].mxu0  ;;  %v8333_v41 = vadd.f32 %v5760_v30, %v11944_v61  ;;  %v6265_v31 = vsub.f32 0.0, %v8301_v44 }
 0x4c7   : > { %v9463_v49 = vpop.eup %9462  ;;  %9482 = vpow2.f32 %v6385_v27  ;;  %v5764_v35 = vpop.f32.mrb[104].mxu1  ;;  %v8302_v10 = vadd.f32 %v5538_v5, %v11935_v43  ;;  %v6401_v20 = vmul.f32 1.442695, %v6266_v0 }
 0x4c8   : > { %v5540_v63 = vpop.f32.mrb[105].mxu0  ;;  %v9465_v51 = vpop.eup %9464  ;;  %v6579_v53 = vadd.f32 1.0, %v9463_v49  ;;  %9484 = vpow2.f32 %v6389_v56  ;;  %v8334_v18 = vadd.f32 %v5764_v35, %v11938_v12  ;;  %v6267_v21 = vsub.f32 0.0, %v8333_v41 }
 0x4c9   : > { %v5766_v46 = vpop.f32.mrb[105].mxu1  ;;  %v5542_v28 = vpop.f32.mrb[106].mxu0  ;;  %v6581_v47 = vadd.f32 1.0, %v9465_v51  ;;  %9486 = vpow2.f32 %v6397_v42  ;;  %v6399_v23 = vmul.f32 1.442695, %v6265_v31  ;;  %v8303_v52 = vadd.f32 %v5540_v63, %v11941_v14 }
 0x4ca   : > { %v9467_v33 = vpop.eup %9466  ;;  %v5768_v55 = vpop.f32.mrb[106].mxu1  ;;  %9488 = vrcp.f32 %v6579_v53  ;;  %v6271_v25 = vsub.f32 0.0, %v8302_v10  ;;  %v8335_v45 = vadd.f32 %v5766_v46, %v11944_v61  ;;  %v6273_v30 = vsub.f32 0.0, %v8334_v18 }
 0x4cb   : > { %v5544_v34 = vpop.f32.mrb[107].mxu0  ;;  %v9469_v36 = vpop.eup %9468  ;;  %v6580_v17 = vadd.f32 1.0, %v9467_v33  ;;  %9490 = vrcp.f32 %v6581_v47  ;;  %v8304_v2 = vadd.f32 %v5542_v28, %v11935_v43  ;;  %v6403_v27 = vmul.f32 1.442695, %v6267_v21 }
 0x4cc   : > { %v5770_v58 = vpop.f32.mrb[107].mxu1  ;;  %v9471_v37 = vpop.eup %9470  ;;  %v6582_v59 = vadd.f32 1.0, %v9469_v36  ;;  %v8336_v56 = vadd.f32 %v5768_v55, %v11938_v12  ;;  %v6272_v49 = vsub.f32 0.0, %v8303_v52  ;;  %v8305_v54 = vadd.f32 %v5544_v34, %v11941_v14 }
 0x4cd   : > { %v9473_v7 = vpop.eup %9472  ;;  %9492 = vrcp.f32 %v6580_v17  ;;  %v6586_v8 = vadd.f32 1.0, %v9471_v37  ;;  %v6411_v63 = vmul.f32 1.442695, %v6271_v25  ;;  %v6274_v51 = vsub.f32 0.0, %v8335_v45 }
 0x4ce   : > { %v9475_v13 = vpop.eup %9474  ;;  %9494 = vrcp.f32 %v6582_v59  ;;  %v6588_v9 = vadd.f32 1.0, %v9473_v7  ;;  %v5548_v11 = vpop.f32.mrb[108].mxu0  ;;  %v8337_v53 = vadd.f32 %v5770_v58, %v11944_v61  ;;  %v6415_v46 = vmul.f32 1.442695, %v6273_v30 }
 0x4cf   : > { %v9477_v15 = vpop.eup %9476  ;;  %9496 = vrcp.f32 %v6586_v8  ;;  %v6587_v16 = vadd.f32 1.0, %v9475_v13  ;;  %v5774_v38 = vpop.f32.mrb[108].mxu1  ;;  %v6278_v28 = vsub.f32 0.0, %v8304_v2  ;;  %v8306_v33 = vadd.f32 %v5548_v11, %v11935_v43 }
 0x4d0   : > { %v9479_v19 = vpop.eup %9478  ;;  %9498 = vrcp.f32 %v6588_v9  ;;  %v6589_v62 = vadd.f32 1.0, %v9477_v15  ;;  %v11964_v6 = vpop.f32.mrb[109].mxu0  ;;  %v6280_v36 = vsub.f32 0.0, %v8336_v56  ;;  %v8338_v17 = vadd.f32 %v5774_v38, %v11938_v12 }
 0x4d1   : > { %v9481_v60 = vpop.eup %9480  ;;  %9500 = vrcp.f32 %v6587_v16  ;;  %v6593_v22 = vadd.f32 1.0, %v9479_v19  ;;  %v11967_v24 = vpop.f32.mrb[109].mxu1  ;;  %v6413_v41 = vmul.f32 1.442695, %v6272_v49  ;;  %v6279_v7 = vsub.f32 0.0, %v8305_v54 }
 0x4d2   : > { %v11969_v39 = vpop.f32.mrb[110].mxu0  ;;  %v9483_v40 = vpop.eup %9482  ;;  %9502 = vrcp.f32 %v6589_v62  ;;  %v6595_v50 = vadd.f32 1.0, %v9481_v60  ;;  %v6417_v9 = vmul.f32 1.442695, %v6274_v51  ;;  %v6281_v10 = vsub.f32 0.0, %v8337_v53 }
 0x4d3   : > { %v11972_v26 = vpop.f32.mrb[110].mxu1  ;;  %v11974_v48 = vpop.f32.mrb[111].mxu0  ;;  %9504 = vrcp.f32 %v6593_v22  ;;  %v6594_v1 = vadd.f32 1.0, %v9483_v40  ;;  %v6425_v11 = vmul.f32 1.442695, %v6278_v28  ;;  %v6285_v19 = vsub.f32 0.0, %v8306_v33 }
 0x4d4   : > { %v9485_v57 = vpop.eup %9484  ;;  %v11977_v29 = vpop.f32.mrb[111].mxu1  ;;  %9506 = vrcp.f32 %v6595_v50  ;;  %v6429_v38 = vmul.f32 1.442695, %v6280_v36  ;;  %v6287_v60 = vsub.f32 0.0, %v8338_v17  ;;  %v6427_v52 = vmul.f32 1.442695, %v6279_v7 }
 0x4d5   : > { %v9487_v3 = vpop.eup %9486  ;;  %v6596_v4 = vadd.f32 1.0, %v9485_v57  ;;  %9508 = vrcp.f32 %v6594_v1  ;;  %v6431_v50 = vmul.f32 1.442695, %v6281_v10  ;;  %v6439_v45 = vmul.f32 1.442695, %v6285_v19 }
 0x4d6   : > { %v9489_v42 = vpop.eup %9488  ;;  %v6600_v5 = vadd.f32 1.0, %v9487_v3  ;;  %v11990_v47 = vpop.f32.mrb[112].mxu0  ;;  %v6443_v2 = vmul.f32 1.442695, %v6287_v60  ;;  %v8307_v54 = vadd.f32 %v11964_v6, %v11941_v14 }
 0x4d7   : > { %v9491_v35 = vpop.eup %9490  ;;  %9510 = vrcp.f32 %v6596_v4  ;;  %v11993_v58 = vpop.f32.mrb[112].mxu1 }
 0x4d8   : > { %v9493_v44 = vpop.eup %9492  ;;  %9512 = vrcp.f32 %v6600_v5  ;;  %v11995_v37 = vpop.f32.mrb[113].mxu0  ;;  %v6286_v17 = vsub.f32 0.0, %v8307_v54 }
 0x4d9   : > { %v9495_v55 = vpop.eup %9494  ;;  %v7910_v34 = vpack.c.bf16 %v9493_v44, %v9489_v42  ;;  %9514 = vpow2.f32 %v6401_v20  ;;  %v11997_v8 = vpop.f32.mrb[113].mxu1  ;;  %v8339_v44 = vadd.f32 %v11967_v24, %v11944_v61  ;;  %v8340_v24 = vadd.f32 %v11972_v26, %v11938_v12 }
 0x4da   : > { %v9497_v59 = vpop.eup %9496  ;;  %v7911_v0 = vpack.c.bf16 %v9495_v55, %v9491_v35  ;;  %9516 = vpow2.f32 %v6399_v23  ;;  %v11999_v31 = vpop.f32.mrb[114].mxu0 }
 0x4db   : > { %v9499_v13 = vpop.eup %9498  ;;  %7155 = vst [vmem:[%s11987_s28] sm:$0xff] %v7910_v34  ;;  %9518 = vpow2.f32 %v6403_v27  ;;  %v12002_v15 = vpop.f32.mrb[114].mxu1  ;;  %v6288_v7 = vsub.f32 0.0, %v8339_v44  ;;  %v8342_v44 = vadd.f32 %v11993_v58, %v11938_v12 }
 0x4dc   : > { %v12004_v16 = vpop.f32.mrb[115].mxu0  ;;  %v9501_v18 = vpop.eup %9500  ;;  %7156 = vst [vmem:[%s11987_s28 + $0x8] sm:$0xff] %v7911_v0  ;;  %9520 = vpow2.f32 %v6411_v63 }
 0x4dd   : > { %v12007_v62 = vpop.f32.mrb[115].mxu1  ;;  %v9503_v20 = vpop.eup %9502  ;;  %v7914_v21 = vpack.c.bf16 %v9501_v18, %v9497_v59  ;;  %9522 = vpow2.f32 %v6415_v46  ;;  %v8308_v59 = vadd.f32 %v11969_v39, %v11935_v43  ;;  %v8309_v18 = vadd.f32 %v11974_v48, %v11941_v14 }
 0x4de   : > { %v9505_v22 = vpop.eup %9504  ;;  %v7915_v23 = vpack.c.bf16 %v9503_v20, %v9499_v13  ;;  %9524 = vpow2.f32 %v6413_v41  ;;  %v12011_v57 = vpop.f32.mrb[116].mxu0 }
 0x4df   : > { %v9507_v40 = vpop.eup %9506  ;;  %7160 = vst [vmem:[%s11987_s28 + $0x1c] sm:$0xff] %v7914_v21  ;;  %9526 = vpow2.f32 %v6417_v9  ;;  %v12013_v3 = vpop.f32.mrb[116].mxu1  ;;  %v8341_v21 = vadd.f32 %v11977_v29, %v11944_v61 }
 0x4e0   : > { %v9509_v25 = vpop.eup %9508  ;;  %7161 = vst [vmem:[%s11987_s28 + $0x24] sm:$0xff] %v7915_v23  ;;  %9528 = vpow2.f32 %v6425_v11  ;;  %v12015_v4 = vpop.f32.mrb[117].mxu0  ;;  %v6441_v23 = vmul.f32 1.442695, %v6286_v17 }
 0x4e1   : > { %v9511_v1 = vpop.eup %9510  ;;  %v7918_v30 = vpack.c.bf16 %v9509_v25, %v9505_v22  ;;  %9530 = vpow2.f32 %v6429_v38  ;;  %v12019_v42 = vpop.f32.mrb[117].mxu1 }
 0x4e2   : > { %v12017_v27 = vpop.eup %9512  ;;  %v7919_v56 = vpack.c.bf16 %v9511_v1, %v9507_v40  ;;  %9532 = vpow2.f32 %v6427_v52  ;;  %v12021_v5 = vpop.f32.mrb[118].mxu0  ;;  %v6292_v52 = vsub.f32 0.0, %v8308_v59  ;;  %v6294_v1 = vsub.f32 0.0, %v8340_v24 }
 0x4e3   : > { %v9515_v49 = vpop.eup %9514  ;;  %7164 = vst [vmem:[%s11987_s28 + $0x38] sm:$0xff] %v7918_v30  ;;  %9534 = vpow2.f32 %v6431_v50  ;;  %v12026_v35 = vpop.f32.mrb[118].mxu1 }
 0x4e4   : > { %v12028_v63 = vpop.f32.mrb[119].mxu0  ;;  %v9517_v51 = vpop.eup %9516  ;;  %7165 = vst [vmem:[%s11987_s28 + $0x40] sm:$0xff] %v7919_v56  ;;  %v6602_v53 = vadd.f32 1.0, %v9515_v49  ;;  %9536 = vpow2.f32 %v6439_v45  ;;  %v6445_v45 = vmul.f32 1.442695, %v6288_v7  ;;  %v6293_v56 = vsub.f32 0.0, %v8309_v18 }
 0x4e5   : > { %v12033_v46 = vpop.f32.mrb[119].mxu1  ;;  %v9519_v28 = vpop.eup %9518  ;;  %v6601_v33 = vadd.f32 1.0, %v9517_v51  ;;  %9538 = vpow2.f32 %v6443_v2  ;;  %v8310_v49 = vadd.f32 %v11990_v47, %v11935_v43  ;;  %v6457_v17 = vmul.f32 1.442695, %v6294_v1 }
 0x4e6   : > { %v9521_v55 = vpop.eup %9520  ;;  %9540 = vrcp.f32 %v6602_v53  ;;  %v6603_v34 = vadd.f32 1.0, %v9519_v28  ;;  %v12039_v13 = vpop.f32.mrb[120].mxu0  ;;  %v6295_v53 = vsub.f32 0.0, %v8341_v21  ;;  %v8343_v47 = vadd.f32 %v11997_v8, %v11944_v61 }
 0x4e7   : > { %v9523_v6 = vpop.eup %9522  ;;  %9542 = vrcp.f32 %v6601_v33  ;;  %v6607_v36 = vadd.f32 1.0, %v9521_v55  ;;  %v12043_v11 = vpop.f32.mrb[120].mxu1  ;;  %v6453_v55 = vmul.f32 1.442695, %v6292_v52  ;;  %v6299_v58 = vsub.f32 0.0, %v8310_v49 }
 0x4e8   : > { %v9525_v0 = vpop.eup %9524  ;;  %9544 = vrcp.f32 %v6603_v34  ;;  %v6609_v41 = vadd.f32 1.0, %v9523_v6  ;;  %v12045_v19 = vpop.f32.mrb[121].mxu0  ;;  %v8311_v34 = vadd.f32 %v11995_v37, %v11941_v14  ;;  %v8312_v7 = vadd.f32 %v11999_v31, %v11935_v43 }
 0x4e9   : > { %v9527_v9 = vpop.eup %9526  ;;  %9546 = vrcp.f32 %v6607_v36  ;;  %v6608_v10 = vadd.f32 1.0, %v9525_v0  ;;  %v12049_v38 = vpop.f32.mrb[121].mxu1  ;;  %v6301_v18 = vsub.f32 0.0, %v8342_v44  ;;  %v8344_v8 = vadd.f32 %v12002_v15, %v11938_v12 }
 0x4ea   : > { %v9529_v39 = vpop.eup %9528  ;;  %9548 = vrcp.f32 %v6609_v41  ;;  %v6610_v20 = vadd.f32 1.0, %v9527_v9  ;;  %v12051_v26 = vpop.f32.mrb[122].mxu0  ;;  %v6455_v41 = vmul.f32 1.442695, %v6293_v56  ;;  %v6459_v15 = vmul.f32 1.442695, %v6295_v53 }
 0x4eb   : > { %v9531_v60 = vpop.eup %9530  ;;  %9550 = vrcp.f32 %v6608_v10  ;;  %v6614_v22 = vadd.f32 1.0, %v9529_v39  ;;  %v12053_v48 = vpop.f32.mrb[122].mxu1  ;;  %v6471_v49 = vmul.f32 1.442695, %v6301_v18  ;;  %v8345_v18 = vadd.f32 %v12007_v62, %v11944_v61 }
 0x4ec   : > { %v12055_v40 = vpop.f32.mrb[123].mxu0  ;;  %v9533_v50 = vpop.eup %9532  ;;  %9552 = vrcp.f32 %v6610_v20  ;;  %v6616_v25 = vadd.f32 1.0, %v9531_v60  ;;  %v6300_v60 = vsub.f32 0.0, %v8311_v34  ;;  %v8315_v62 = vadd.f32 %v12015_v4, %v11941_v14 }
 0x4ed   : > { %v12057_v30 = vpop.f32.mrb[123].mxu1  ;;  %v9535_v29 = vpop.eup %9534  ;;  %9554 = vrcp.f32 %v6614_v22  ;;  %v6615_v2 = vadd.f32 1.0, %v9533_v50  ;;  %v8313_v22 = vadd.f32 %v12004_v16, %v11941_v14 }
 0x4ee   : > { %v9537_v54 = vpop.eup %9536  ;;  %9556 = vrcp.f32 %v6616_v25  ;;  %v6617_v51 = vadd.f32 1.0, %v9535_v29  ;;  %v12067_v59 = vpop.f32.mrb[124].mxu0  ;;  %v6302_v25 = vsub.f32 0.0, %v8343_v47 }
 0x4ef   : > { %v9539_v28 = vpop.eup %9538  ;;  %9558 = vrcp.f32 %v6615_v2  ;;  %v6621_v33 = vadd.f32 1.0, %v9537_v54  ;;  %v12071_v24 = vpop.f32.mrb[124].mxu1  ;;  %v6306_v2 = vsub.f32 0.0, %v8312_v7  ;;  %v6308_v54 = vsub.f32 0.0, %v8344_v8 }
 0x4f0   : > { %v9541_v6 = vpop.eup %9540  ;;  %9560 = vrcp.f32 %v6617_v51  ;;  %v6623_v36 = vadd.f32 1.0, %v9539_v28  ;;  %v12073_v9 = vpop.f32.mrb[125].mxu0  ;;  %v6307_v53 = vsub.f32 0.0, %v8313_v22 }
 0x4f1   : > { %v9543_v0 = vpop.eup %9542  ;;  %9562 = vrcp.f32 %v6621_v33  ;;  %v12078_v39 = vpop.f32.mrb[125].mxu1  ;;  %v6473_v33 = vmul.f32 1.442695, %v6302_v25  ;;  %v6485_v47 = vmul.f32 1.442695, %v6308_v54 }
 0x4f2   : > { %v9545_v37 = vpop.eup %9544  ;;  %v7922_v10 = vpack.c.bf16 %v9543_v0, %v12017_v27  ;;  %9564 = vrcp.f32 %v6623_v36  ;;  %v12080_v20 = vpop.f32.mrb[126].mxu0  ;;  %v6483_v7 = vmul.f32 1.442695, %v6307_v53 }
 0x4f3   : > { %v9547_v21 = vpop.eup %9546  ;;  %v7923_v31 = vpack.c.bf16 %v9545_v37, %v9541_v6  ;;  %9566 = vpow2.f32 %v6441_v23  ;;  %v12084_v52 = vpop.f32.mrb[126].mxu1  ;;  %v6467_v23 = vmul.f32 1.442695, %v6299_v58 }
 0x4f4   : > { %v12086_v27 = vpop.f32.mrb[127].mxu0  ;;  %v9549_v50 = vpop.eup %9548  ;;  %7168 = vst [vmem:[%s11987_s28 + $0x54] sm:$0xff] %v7922_v10  ;;  %9568 = vpow2.f32 %v6445_v45  ;;  %v6469_v45 = vmul.f32 1.442695, %v6300_v60 }
 0x4f5   : > { %v12089_v1 = vpop.f32.mrb[127].mxu1  ;;  %v9551_v29 = vpop.eup %9550  ;;  %7169 = vst [vmem:[%s11987_s28 + $0x5c] sm:$0xff] %v7923_v31  ;;  %9570 = vpow2.f32 %v6453_v55  ;;  %v6481_v55 = vmul.f32 1.442695, %v6306_v2  ;;  %v8314_v31 = vadd.f32 %v12011_v57, %v11935_v43  ;;  %v8316_v57 = vadd.f32 %v12021_v5, %v11935_v43 }
 0x4f6   : > { %v9553_v56 = vpop.eup %9552  ;;  %v7926_v16 = vpack.c.bf16 %v9551_v29, %v9547_v21  ;;  %9572 = vpow2.f32 %v6457_v17  ;;  %v8347_v29 = vadd.f32 %v12019_v42, %v11944_v61 }
 0x4f7   : > { %v9555_v51 = vpop.eup %9554  ;;  %v7927_v44 = vpack.c.bf16 %v9553_v56, %v9549_v50  ;;  %9574 = vpow2.f32 %v6455_v41  ;;  %v12094_v6 = vpop.f32.mrb[128].mxu1  ;;  %v8346_v50 = vadd.f32 %v12013_v3, %v11938_v12  ;;  %v6309_v56 = vsub.f32 0.0, %v8345_v18 }
 0x4f8   : > { %v9557_v28 = vpop.eup %9556  ;;  %7172 = vst [vmem:[%s11987_s28 + $0x70] sm:$0xff] %v7926_v16  ;;  %9576 = vpow2.f32 %v6459_v15  ;;  %v12096_v0 = vpop.f32.mrb[129].mxu1  ;;  %v6313_v3 = vsub.f32 0.0, %v8314_v31 }
 0x4f9   : > { %v9559_v34 = vpop.eup %9558  ;;  %7173 = vst [vmem:[%s11987_s28 + $0x78] sm:$0xff] %v7927_v44  ;;  %9578 = vpow2.f32 %v6467_v23  ;;  %v12100_v37 = vpop.f32.mrb[130].mxu1  ;;  %v6315_v4 = vsub.f32 0.0, %v8346_v50  ;;  %v8317_v50 = vadd.f32 %v12028_v63, %v11941_v14 }
 0x4fa   : > { %v9561_v36 = vpop.eup %9560  ;;  %v7930_v17 = vpack.c.bf16 %v9559_v34, %v9555_v51  ;;  %9580 = vpow2.f32 %v6471_v49  ;;  %v12107_v8 = vpop.f32.mrb[131].mxu1  ;;  %v6495_v18 = vmul.f32 1.442695, %v6313_v3  ;;  %v12130_v3 = vadd.f32 %v12096_v0, %v12094_v6 }
 0x4fb   : > { %v12098_v41 = vpop.eup %9562  ;;  %v7931_v58 = vpack.c.bf16 %v9561_v36, %v9557_v28  ;;  %9582 = vpow2.f32 %v6469_v45  ;;  %v6314_v28 = vsub.f32 0.0, %v8315_v62  ;;  %v6487_v36 = vmul.f32 1.442695, %v6309_v56 }
 0x4fc   : > { %v12102_v10 = vpop.eup %9564  ;;  %7176 = vst [vmem:[%s11987_s28 + $0x8c] sm:$0xff] %v7930_v17  ;;  %9584 = vpow2.f32 %v6473_v33  ;;  %v6316_v33 = vsub.f32 0.0, %v8347_v29  ;;  %v6320_v17 = vsub.f32 0.0, %v8316_v57  ;;  %v8349_v57 = vadd.f32 %v12033_v46, %v11944_v61 }
 0x4fd   : > { %v9567_v21 = vpop.eup %9566  ;;  %7177 = vst [vmem:[%s11987_s28 + $0x94] sm:$0xff] %v7931_v58  ;;  %9586 = vpow2.f32 %v6481_v55  ;;  %v6497_v62 = vmul.f32 1.442695, %v6314_v28  ;;  %v8319_v6 = vadd.f32 %v12045_v19, %v11941_v14 }
 0x4fe   : > { %v9569_v60 = vpop.eup %9568  ;;  %v6622_v22 = vadd.f32 1.0, %v9567_v21  ;;  %9588 = vpow2.f32 %v6485_v47  ;;  %v8348_v21 = vadd.f32 %v12026_v35, %v11938_v12  ;;  %v6501_v29 = vmul.f32 1.442695, %v6316_v33 }
 0x4ff   : > { %v9571_v15 = vpop.eup %9570  ;;  %v6624_v25 = vadd.f32 1.0, %v9569_v60  ;;  %9590 = vpow2.f32 %v6483_v7  ;;  %v12120_v54 = vpop.f32.mrb[132].mxu1  ;;  %v6509_v56 = vmul.f32 1.442695, %v6320_v17  ;;  %v8350_v33 = vadd.f32 %v12043_v11, %v11938_v12 }
 0x500   : > { %v9573_v23 = vpop.eup %9572  ;;  %9592 = vrcp.f32 %v6622_v22  ;;  %v6628_v2 = vadd.f32 1.0, %v9571_v15  ;;  %v8125_v45 = vpop.f32.mrb[133].mxu1  ;;  %v6499_v22 = vmul.f32 1.442695, %v6315_v4  ;;  %v6321_v4 = vsub.f32 0.0, %v8317_v50 }
 0x501   : > { %v9575_v16 = vpop.eup %9574  ;;  %9594 = vrcp.f32 %v6624_v25  ;;  %v6630_v49 = vadd.f32 1.0, %v9573_v23  ;;  %v8127_v34 = vpop.f32.mrb[134].mxu1  ;;  %v6323_v17 = vsub.f32 0.0, %v8349_v57  ;;  %v12145_v11 = vadd.f32 %v12107_v8, %v12100_v37 }
 0x502   : > { %v9577_v51 = vpop.eup %9576  ;;  %9596 = vrcp.f32 %v6628_v2  ;;  %v6629_v44 = vadd.f32 1.0, %v9575_v16  ;;  %v8128_v47 = vpop.f32.mrb[135].mxu1  ;;  %v6329_v8 = vsub.f32 0.0, %v8350_v33 }
 0x503   : > { %v9579_v53 = vpop.eup %9578  ;;  %9598 = vrcp.f32 %v6630_v49  ;;  %v6631_v42 = vadd.f32 1.0, %v9577_v51  ;;  %v6322_v49 = vsub.f32 0.0, %v8348_v21  ;;  %v12150_v19 = vadd.f32 %v8128_v47, %v8127_v34 }
 0x504   : > { %v9581_v55 = vpop.eup %9580  ;;  %9600 = vrcp.f32 %v6629_v44  ;;  %v6635_v5 = vadd.f32 1.0, %v9579_v53  ;;  %v8318_v53 = vadd.f32 %v12039_v13, %v11935_v43  ;;  %v8351_v13 = vadd.f32 %v12049_v38, %v11944_v61 }
 0x505   : > { %v9583_v58 = vpop.eup %9582  ;;  %9602 = vrcp.f32 %v6631_v42  ;;  %v6637_v7 = vadd.f32 1.0, %v9581_v55  ;;  %v6513_v37 = vmul.f32 1.442695, %v6322_v49  ;;  %v6328_v34 = vsub.f32 0.0, %v8319_v6 }
 0x506   : > { %v9585_v31 = vpop.eup %9584  ;;  %9604 = vrcp.f32 %v6635_v5  ;;  %v6636_v60 = vadd.f32 1.0, %v9583_v58 }
 0x507   : > { %v9587_v15 = vpop.eup %9586  ;;  %9606 = vrcp.f32 %v6637_v7  ;;  %v6638_v25 = vadd.f32 1.0, %v9585_v31  ;;  %v8130_v63 = vpop.f32.mrb[136].mxu1 }
 0x508   : > { %v9589_v23 = vpop.eup %9588  ;;  %9608 = vrcp.f32 %v6636_v60  ;;  %v6642_v2 = vadd.f32 1.0, %v9587_v15  ;;  %v8131_v42 = vpop.f32.mrb[137].mxu1  ;;  %v6330_v15 = vsub.f32 0.0, %v8351_v13  ;;  %v8321_v13 = vadd.f32 %v12055_v40, %v11941_v14 }
 0x509   : > { %v9591_v35 = vpop.eup %9590  ;;  %9610 = vrcp.f32 %v6638_v25  ;;  %v6644_v16 = vadd.f32 1.0, %v9589_v23  ;;  %v8133_v0 = vpop.f32.mrb[138].mxu1  ;;  %v12153_v31 = vadd.f32 %v8131_v42, %v8130_v63  ;;  %v8322_v40 = vadd.f32 %v12067_v59, %v11935_v43 }
 0x50a   : > { %v9593_v51 = vpop.eup %9592  ;;  %9612 = vrcp.f32 %v6642_v2  ;;  %v6643_v44 = vadd.f32 1.0, %v9591_v35  ;;  %v8134_v58 = vpop.f32.mrb[139].mxu1 }
 0x50b   : > { %v9595_v28 = vpop.eup %9594  ;;  %v7934_v46 = vpack.c.bf16 %v9593_v51, %v12098_v41  ;;  %9614 = vrcp.f32 %v6644_v16  ;;  %v12148_v41 = vadd.f32 %v8125_v45, %v12120_v54  ;;  %v12155_v38 = vadd.f32 %v8134_v58, %v8133_v0 }
 0x50c   : > { %v9597_v55 = vpop.eup %9596  ;;  %v7935_v5 = vpack.c.bf16 %v9595_v28, %v12102_v10  ;;  %9616 = vrcp.f32 %v6643_v44  ;;  %v6327_v10 = vsub.f32 0.0, %v8318_v53  ;;  %v6511_v45 = vmul.f32 1.442695, %v6321_v4 }
 0x50d   : > { %v9599_v7 = vpop.eup %9598  ;;  %7180 = vst [vmem:[%s11987_s28 + $0xa8] sm:$0xff] %v7934_v46  ;;  %9618 = vpow2.f32 %v6487_v36  ;;  %v6527_v16 = vmul.f32 1.442695, %v6329_v8  ;;  %v8320_v28 = vadd.f32 %v12051_v26, %v11935_v43 }
 0x50e   : > { %v9601_v21 = vpop.eup %9600  ;;  %7181 = vst [vmem:[%s11987_s28 + $0xb0] sm:$0xff] %v7935_v5  ;;  %9620 = vpow2.f32 %v6495_v18  ;;  %v6515_v18 = vmul.f32 1.442695, %v6323_v17  ;;  %v6523_v2 = vmul.f32 1.442695, %v6327_v10 }
 0x50f   : > { %v9603_v60 = vpop.eup %9602  ;;  %v7938_v36 = vpack.c.bf16 %v9601_v21, %v9597_v55  ;;  %9622 = vpow2.f32 %v6499_v22  ;;  %v8136_v25 = vpop.f32.mrb[140].mxu1  ;;  %v8352_v55 = vadd.f32 %v12053_v48, %v11938_v12  ;;  %v6334_v21 = vsub.f32 0.0, %v8320_v28 }
 0x510   : > { %v9605_v50 = vpop.eup %9604  ;;  %v7939_v54 = vpack.c.bf16 %v9603_v60, %v9599_v7  ;;  %9624 = vpow2.f32 %v6497_v62  ;;  %v8137_v57 = vpop.f32.mrb[141].mxu1  ;;  %v8323_v28 = vadd.f32 %v12073_v9, %v11941_v14 }
 0x511   : > { %v9607_v47 = vpop.eup %9606  ;;  %7184 = vst [vmem:[%s11987_s28 + $0xc4] sm:$0xff] %v7938_v36  ;;  %9626 = vpow2.f32 %v6501_v29  ;;  %v12159_v62 = vadd.f32 %v8137_v57, %v8136_v25  ;;  %v8139_v49 = vpop.f32.mrb[142].mxu1  ;;  %v6525_v29 = vmul.f32 1.442695, %v6328_v34  ;;  %v4210_v57 = vsub.s32 6, %v10768_v32 }
 0x512   : > { %v9609_v23 = vpop.eup %9608  ;;  %7185 = vst [vmem:[%s11987_s28 + $0xcc] sm:$0xff] %v7939_v54  ;;  %9628 = vpow2.f32 %v6509_v56  ;;  %v8140_v44 = vpop.f32.mrb[143].mxu1  ;;  %v6529_v56 = vmul.f32 1.442695, %v6330_v15  ;;  %v6335_v15 = vsub.f32 0.0, %v8321_v13  ;;  %v8324_v13 = vadd.f32 %v12080_v20, %v11935_v43 }
 0x513   : > { %v9611_v22 = vpop.eup %9610  ;;  %v7942_v35 = vpack.c.bf16 %v9609_v23, %v9605_v50  ;;  %9630 = vpow2.f32 %v6513_v37  ;;  %v12164_v53 = vadd.f32 %v8140_v44, %v8139_v49  ;;  %v8353_v37 = vadd.f32 %v12057_v30, %v11944_v61 }
 0x514   : > { %v9613_v63 = vpop.eup %9612  ;;  %v7943_v51 = vpack.c.bf16 %v9611_v22, %v9607_v47  ;;  %9632 = vpow2.f32 %v6511_v45  ;;  %v6336_v45 = vsub.f32 0.0, %v8352_v55 }
 0x515   : > { %v12161_v4 = vpop.eup %9614  ;;  %7188 = vst [vmem:[%s11987_s28 + $0xe0] sm:$0xff] %v7942_v35  ;;  %9634 = vpow2.f32 %v6515_v18  ;;  %v6337_v59 = vsub.f32 0.0, %v8353_v37  ;;  %v6342_v37 = vsub.f32 0.0, %v8323_v28 }
 0x516   : > { %v9617_v42 = vpop.eup %9616  ;;  %7189 = vst [vmem:[%s11987_s28 + $0xe8] sm:$0xff] %v7943_v51  ;;  %9636 = vpow2.f32 %v6523_v2  ;;  %v8354_v2 = vadd.f32 %v12071_v24, %v11938_v12  ;;  %v6541_v51 = vmul.f32 1.442695, %v6336_v45 }
 0x517   : > { %v9619_v46 = vpop.eup %9618  ;;  %v7946_v33 = vpack.c.bf16 %v9617_v42, %v9613_v63  ;;  %9638 = vpow2.f32 %v6527_v16  ;;  %v8142_v58 = vpop.f32.mrb[144].mxu1  ;;  %v6537_v16 = vmul.f32 1.442695, %v6334_v21  ;;  %v6539_v42 = vmul.f32 1.442695, %v6335_v15 }
 0x518   : > { %v9621_v6 = vpop.eup %9620  ;;  %v6645_v0 = vadd.f32 1.0, %v9619_v46  ;;  %9640 = vpow2.f32 %v6525_v29  ;;  %v8143_v10 = vpop.f32.mrb[145].mxu1  ;;  %v6341_v29 = vsub.f32 0.0, %v8322_v40  ;;  %v8356_v21 = vadd.f32 %v12084_v52, %v11938_v12 }
 0x519   : > { %v9623_v5 = vpop.eup %9622  ;;  %7192 = vst [vmem:[%s11987_s28 + $0xfc] sm:$0xff] %v7946_v33  ;;  %v6649_v17 = vadd.f32 1.0, %v9621_v6  ;;  %9642 = vpow2.f32 %v6529_v56  ;;  %v12176_v48 = vadd.f32 %v8143_v10, %v8142_v58  ;;  %v8145_v8 = vpop.f32.mrb[146].mxu1  ;;  %v6343_v6 = vsub.f32 0.0, %v8354_v2 }
 0x51a   : > { %v9625_v7 = vpop.eup %9624  ;;  %9644 = vrcp.f32 %v6645_v0  ;;  %v6651_v26 = vadd.f32 1.0, %v9623_v5  ;;  %v8146_v34 = vpop.f32.mrb[147].mxu1  ;;  %v8355_v0 = vadd.f32 %v12078_v39, %v11944_v61  ;;  %v8325_v39 = vadd.f32 %v12086_v27, %v11941_v14 }
 0x51b   : > { %v9627_v60 = vpop.eup %9626  ;;  %9646 = vrcp.f32 %v6649_v17  ;;  %v6650_v36 = vadd.f32 1.0, %v9625_v7  ;;  %v12180_v25 = vadd.f32 %v8146_v34, %v8145_v8  ;;  %v6543_v8 = vmul.f32 1.442695, %v6337_v59 }
 0x51c   : > { %v9629_v50 = vpop.eup %9628  ;;  %9648 = vrcp.f32 %v6651_v26  ;;  %v6652_v54 = vadd.f32 1.0, %v9627_v60  ;;  %v6551_v12 = vmul.f32 1.442695, %v6341_v29  ;;  %v6555_v14 = vmul.f32 1.442695, %v6343_v6 }
 0x51d   : > { %v9631_v47 = vpop.eup %9630  ;;  %9650 = vrcp.f32 %v6650_v36  ;;  %v6656_v18 = vadd.f32 1.0, %v9629_v50  ;;  %v6344_v50 = vsub.f32 0.0, %v8355_v0  ;;  %v6348_v52 = vsub.f32 0.0, %v8324_v13 }
 0x51e   : > { %v9633_v23 = vpop.eup %9632  ;;  %9652 = vrcp.f32 %v6652_v54  ;;  %v6658_v30 = vadd.f32 1.0, %v9631_v47  ;;  %v8357_v54 = vadd.f32 %v12089_v1, %v11944_v61  ;;  %v6350_v40 = vsub.f32 0.0, %v8356_v21 }
 0x51f   : > { %v9635_v22 = vpop.eup %9634  ;;  %9654 = vrcp.f32 %v6656_v18  ;;  %v6657_v35 = vadd.f32 1.0, %v9633_v23  ;;  %v8148_v24 = vpop.f32.mrb[148].mxu1  ;;  %v6349_v34 = vsub.f32 0.0, %v8325_v39  ;;  %v6553_v15 = vmul.f32 1.442695, %v6342_v37 }
 0x520   : > { %v9637_v49 = vpop.eup %9636  ;;  %9656 = vrcp.f32 %v6658_v30  ;;  %v6659_v63 = vadd.f32 1.0, %v9635_v22  ;;  %v8149_v55 = vpop.f32.mrb[149].mxu1  ;;  %v6557_v61 = vmul.f32 1.442695, %v6344_v50  ;;  %v6351_v1 = vsub.f32 0.0, %v8357_v54 }
 0x521   : > { %v9639_v44 = vpop.eup %9638  ;;  %9658 = vrcp.f32 %v6657_v35  ;;  %v6663_v56 = vadd.f32 1.0, %v9637_v49  ;;  %v12191_v58 = vadd.f32 %v8149_v55, %v8148_v24  ;;  %v8151_v7 = vpop.f32.mrb[150].mxu1  ;;  %v6565_v35 = vmul.f32 1.442695, %v6348_v52 }
 0x522   : > { %v9641_v46 = vpop.eup %9640  ;;  %9660 = vrcp.f32 %v6659_v63  ;;  %v6665_v33 = vadd.f32 1.0, %v9639_v44  ;;  %v8152_v10 = vpop.f32.mrb[151].mxu1  ;;  %v6569_v44 = vmul.f32 1.442695, %v6350_v40 }
 0x523   : > { %v9643_v5 = vpop.eup %9642  ;;  %9662 = vrcp.f32 %v6663_v56  ;;  %v6664_v17 = vadd.f32 1.0, %v9641_v46  ;;  %v12198_v43 = vadd.f32 %v8152_v10, %v8151_v7  ;;  %v6567_v56 = vmul.f32 1.442695, %v6349_v34 }
 0x524   : > { %v9645_v26 = vpop.eup %9644  ;;  %9664 = vrcp.f32 %v6665_v33  ;;  %v6666_v9 = vadd.f32 1.0, %v9643_v5  ;;  %v4202_v10 = vsub.s32 4, %v10768_v32 }
 0x525   : > { %v9647_v60 = vpop.eup %9646  ;;  %v7947_v36 = vpack.c.bf16 %v9645_v26, %v12161_v4  ;;  %9666 = vrcp.f32 %v6664_v17 }
 0x526   : > { %v9649_v20 = vpop.eup %9648  ;;  %9668 = vrcp.f32 %v6666_v9 }
 0x527   : > { %v9651_v45 = vpop.eup %9650  ;;  %7193 = vst [vmem:[%s11987_s28 + $0x104] sm:$0xff] %v7947_v36  ;;  %9670 = vpow2.f32 %v6537_v16  ;;  %v8154_v23 = vpop.f32.mrb[152].mxu1  ;;  %v9910_v16 = vld [vmem:[%s12434_s8] sm:$0x7f] }
 0x528   : > { %v9653_v27 = vpop.eup %9652  ;;  %v7950_v4 = vpack.c.bf16 %v9651_v45, %v9647_v60  ;;  %9672 = vpow2.f32 %v6541_v51  ;;  %v8155_v2 = vpop.f32.mrb[153].mxu1  ;;  %v12210_v59 = vrot.slane %v9910_v16, %v4210_v57  ;;  %v6571_v57 = vmul.f32 1.442695, %v6351_v1 }
 0x529   : > { %v9655_v47 = vpop.eup %9654  ;;  %v7951_v18 = vpack.c.bf16 %v9653_v27, %v9649_v20  ;;  %9674 = vpow2.f32 %v6539_v42  ;;  %v8156_v49 = vadd.f32 %v8155_v2, %v8154_v23  ;;  %v8157_v63 = vpop.f32.mrb[154].mxu1  ;;  %v12227_v34 = vrot.slane %v9910_v16, %v4202_v10 }
 0x52a   : > { %v9657_v30 = vpop.eup %9656  ;;  %7196 = vst [vmem:[%s11987_s28 + $0x118] sm:$0xff] %v7950_v4  ;;  %9676 = vpow2.f32 %v6543_v8  ;;  %v8158_v42 = vpop.f32.mrb[155].mxu1  ;;  %v4206_v8 = vsub.s32 5, %v10768_v32  ;;  %v6084_v2 = vadd.f32 %v12130_v3, %v12210_v59 }
 0x52b   : > { %v9659_v22 = vpop.eup %9658  ;;  %7197 = vst [vmem:[%s11987_s28 + $0x120] sm:$0xff] %v7951_v18  ;;  %9678 = vpow2.f32 %v6551_v12  ;;  %v12213_v46 = vadd.f32 %v8156_v49, %v12210_v59  ;;  %v8159_v33 = vadd.f32 %v8158_v42, %v8157_v63 }
 0x52c   : > { %v9661_v51 = vpop.eup %9660  ;;  %v7954_v29 = vpack.c.bf16 %v9659_v22, %v9655_v47  ;;  %9680 = vpow2.f32 %v6555_v14 }
 0x52d   : > { %v9663_v28 = vpop.eup %9662  ;;  %v7955_v24 = vpack.c.bf16 %v9661_v51, %v9657_v30  ;;  %9682 = vpow2.f32 %v6553_v15  ;;  %v12218_v55 = vadd.f32 %v8159_v33, %v12210_v59  ;;  %v12232_v15 = vrot.slane %v9910_v16, %v4206_v8 }
 0x52e   : > { %v9665_v6 = vpop.eup %9664  ;;  %7200 = vst [vmem:[%s11987_s28 + $0x134] sm:$0xff] %v7954_v29  ;;  %9684 = vpow2.f32 %v6557_v61  ;;  %v6087_v51 = vadd.f32 %v12145_v11, %v12210_v59 }
 0x52f   : > { %v9667_v0 = vpop.eup %9666  ;;  %7201 = vst [vmem:[%s11987_s28 + $0x13c] sm:$0xff] %v7955_v24  ;;  %9686 = vpow2.f32 %v6565_v35  ;;  %v8160_v26 = vpop.f32.mrb[156].mxu1 }
 0x530   : > { %v9669_v5 = vpop.eup %9668  ;;  %v7958_v17 = vpack.c.bf16 %v9667_v0, %v9663_v28  ;;  %9688 = vpow2.f32 %v6569_v44  ;;  %v8161_v39 = vpop.f32.mrb[157].mxu1 }
 0x531   : > { %v9671_v13 = vpop.eup %9670  ;;  %v7959_v7 = vpack.c.bf16 %v9669_v5, %v9665_v6  ;;  %9690 = vpow2.f32 %v6567_v56  ;;  %v8162_v37 = vadd.f32 %v8161_v39, %v8160_v26  ;;  %v8163_v20 = vpop.f32.mrb[158].mxu1 }
 0x532   : > { %v9673_v9 = vpop.eup %9672  ;;  %7204 = vst [vmem:[%s11987_s28 + $0x150] sm:$0xff] %v7958_v17  ;;  %v6670_v21 = vadd.f32 1.0, %v9671_v13  ;;  %9692 = vpow2.f32 %v6571_v57  ;;  %v8164_v45 = vpop.f32.mrb[159].mxu1 }
 0x533   : > { %v9675_v60 = vpop.eup %9674  ;;  %7205 = vst [vmem:[%s11987_s28 + $0x158] sm:$0xff] %v7959_v7  ;;  %v6672_v36 = vadd.f32 1.0, %v9673_v9  ;;  %v12225_v52 = vadd.f32 %v8162_v37, %v12210_v59  ;;  %v8165_v27 = vadd.f32 %v8164_v45, %v8163_v20 }
 0x534   : > { %v9677_v50 = vpop.eup %9676  ;;  %9694 = vrcp.f32 %v6670_v21  ;;  %v6671_v54 = vadd.f32 1.0, %v9675_v60 }
 0x535   : > { %v9679_v12 = vpop.eup %9678  ;;  %9696 = vrcp.f32 %v6672_v36  ;;  %v6673_v14 = vadd.f32 1.0, %v9677_v50  ;;  %v12230_v32 = vadd.f32 %v8165_v27, %v12210_v59  ;;  %v6092_v50 = vadd.f32 %v12148_v41, %v12210_v59 }
 0x536   : > { %v9681_v4 = vpop.eup %9680  ;;  %9698 = vrcp.f32 %v6671_v54  ;;  %v6677_v40 = vadd.f32 1.0, %v9679_v12 }
 0x537   : > { %v9683_v47 = vpop.eup %9682  ;;  %9700 = vrcp.f32 %v6673_v14  ;;  %v6679_v18 = vadd.f32 1.0, %v9681_v4  ;;  %v5970_v22 = vpop.f32.mrb[128].mxu0 }
 0x538   : > { %v9685_v23 = vpop.eup %9684  ;;  %9702 = vrcp.f32 %v6677_v40  ;;  %v6678_v30 = vadd.f32 1.0, %v9683_v47  ;;  %v8182_v35 = vpop.f32.mrb[160].mxu1  ;;  %v8358_v16 = vadd.f32 %v5970_v22, %v12227_v34 }
 0x539   : > { %v9687_v61 = vpop.eup %9686  ;;  %9704 = vrcp.f32 %v6679_v18  ;;  %v6680_v1 = vadd.f32 1.0, %v9685_v23  ;;  %v5972_v29 = vpop.f32.mrb[129].mxu0 }
 0x53a   : > { %v9689_v49 = vpop.eup %9688  ;;  %9706 = vrcp.f32 %v6678_v30  ;;  %v6684_v63 = vadd.f32 1.0, %v9687_v61  ;;  %v8183_v44 = vpop.f32.mrb[161].mxu1  ;;  %v8359_v28 = vadd.f32 %v5972_v29, %v12232_v15  ;;  %v6247_v0 = vsub.f32 0.0, %v8358_v16 }
 0x53b   : > { %v9691_v56 = vpop.eup %9690  ;;  %9708 = vrcp.f32 %v6680_v1  ;;  %v6686_v42 = vadd.f32 1.0, %v9689_v49  ;;  %v8184_v24 = vadd.f32 %v8183_v44, %v8182_v35  ;;  %v5974_v33 = vpop.f32.mrb[130].mxu0  ;;  %v6095_v29 = vadd.f32 %v12150_v19, %v12210_v59 }
 0x53c   : > { %v8185_v3 = vpop.f32.mrb[162].mxu1  ;;  %v9693_v6 = vpop.eup %9692  ;;  %9710 = vrcp.f32 %v6684_v63  ;;  %v6685_v57 = vadd.f32 1.0, %v9691_v56  ;;  %v8360_v5 = vadd.f32 %v5974_v33, %v12227_v34  ;;  %v6248_v7 = vsub.f32 0.0, %v8359_v28 }
 0x53d   : > { %v5976_v17 = vpop.f32.mrb[131].mxu0  ;;  %v8186_v11 = vpop.f32.mrb[163].mxu1  ;;  %9712 = vrcp.f32 %v6686_v42  ;;  %v6687_v13 = vadd.f32 1.0, %v9693_v6  ;;  %v6181_v26 = vadd.f32 %v8184_v24, %v6084_v2  ;;  %v6363_v21 = vmul.f32 1.442695, %v6247_v0 }
 0x53e   : > { %v9695_v9 = vpop.eup %9694  ;;  %9714 = vrcp.f32 %v6685_v57  ;;  %v6254_v39 = vsub.f32 0.0, %v8360_v5  ;;  %v8361_v10 = vadd.f32 %v5976_v17, %v12232_v15  ;;  %v6365_v36 = vmul.f32 1.442695, %v6248_v7 }
 0x53f   : > { %v9697_v60 = vpop.eup %9696  ;;  %9716 = vrcp.f32 %v6687_v13  ;;  %v6249_v37 = vsub.f32 0.0, %v6181_v26  ;;  %v8187_v20 = vadd.f32 %v8186_v11, %v8185_v3  ;;  %v5980_v40 = vpop.f32.mrb[132].mxu0 }
 0x540   : > { %v9699_v8 = vpop.eup %9698  ;;  %9718 = vpow2.f32 %v6363_v21  ;;  %v6377_v54 = vmul.f32 1.442695, %v6254_v39  ;;  %v6255_v45 = vsub.f32 0.0, %v8361_v10  ;;  %v8188_v47 = vpop.f32.mrb[164].mxu1  ;;  %v8362_v61 = vadd.f32 %v5980_v40, %v12227_v34 }
 0x541   : > { %v9701_v12 = vpop.eup %9700  ;;  %v7962_v14 = vpack.c.bf16 %v9699_v8, %v9695_v9  ;;  %9720 = vpow2.f32 %v6365_v36  ;;  %v6367_v27 = vmul.f32 1.442695, %v6249_v37  ;;  %v6184_v4 = vadd.f32 %v8187_v20, %v6087_v51  ;;  %v5982_v1 = vpop.f32.mrb[133].mxu0 }
 0x542   : > { %v9703_v18 = vpop.eup %9702  ;;  %v7963_v23 = vpack.c.bf16 %v9701_v12, %v9697_v60  ;;  %9722 = vpow2.f32 %v6377_v54  ;;  %v6379_v30 = vmul.f32 1.442695, %v6255_v45  ;;  %v8189_v41 = vpop.f32.mrb[165].mxu1  ;;  %v8363_v35 = vadd.f32 %v5982_v1, %v12232_v15 }
 0x543   : > { %v9705_v2 = vpop.eup %9704  ;;  %7208 = vst [vmem:[%s11987_s28 + $0x16c] sm:$0xff] %v7962_v14  ;;  %9724 = vpow2.f32 %v6367_v27  ;;  %v6256_v22 = vsub.f32 0.0, %v6184_v4  ;;  %v8190_v49 = vadd.f32 %v8189_v41, %v8188_v47  ;;  %v5984_v63 = vpop.f32.mrb[134].mxu0  ;;  %v6261_v44 = vsub.f32 0.0, %v8362_v61 }
 0x544   : > { %v8191_v51 = vpop.f32.mrb[166].mxu1  ;;  %v9707_v16 = vpop.eup %9706  ;;  %7209 = vst [vmem:[%s11987_s28 + $0x174] sm:$0xff] %v7963_v23  ;;  %9726 = vpow2.f32 %v6379_v30  ;;  %v8364_v56 = vadd.f32 %v5984_v63, %v12227_v34  ;;  %v6262_v6 = vsub.f32 0.0, %v8363_v35  ;;  %v6100_v39 = vadd.f32 %v12153_v31, %v12210_v59 }
 0x545   : > { %v5986_v42 = vpop.f32.mrb[135].mxu0  ;;  %v8192_v28 = vpop.f32.mrb[167].mxu1  ;;  %v7966_v33 = vpack.c.bf16 %v9707_v16, %v9703_v18  ;;  %v6381_v3 = vmul.f32 1.442695, %v6256_v22  ;;  %v6189_v57 = vadd.f32 %v8190_v49, %v6092_v50  ;;  %v6391_v17 = vmul.f32 1.442695, %v6261_v44 }
 0x546   : > { %v9709_v24 = vpop.eup %9708  ;;  %v6268_v11 = vsub.f32 0.0, %v8364_v56  ;;  %v8365_v13 = vadd.f32 %v5986_v42, %v12232_v15  ;;  %v6393_v7 = vmul.f32 1.442695, %v6262_v6  ;;  %v8193_v9 = vadd.f32 %v8192_v28, %v8191_v51 }
 0x547   : > { %v9711_v0 = vpop.eup %9710  ;;  %v7967_v5 = vpack.c.bf16 %v9709_v24, %v9705_v2  ;;  %7212 = vst [vmem:[%s11987_s28 + $0x188] sm:$0xff] %v7966_v33  ;;  %9728 = vpow2.f32 %v6381_v3  ;;  %v6263_v26 = vsub.f32 0.0, %v6189_v57  ;;  %v5990_v50 = vpop.f32.mrb[136].mxu0 }
 0x548   : > { %v9713_v19 = vpop.eup %9712  ;;  %9730 = vpow2.f32 %v6391_v17  ;;  %v6405_v10 = vmul.f32 1.442695, %v6268_v11  ;;  %v6269_v60 = vsub.f32 0.0, %v8365_v13  ;;  %v6192_v8 = vadd.f32 %v8193_v9, %v6095_v29  ;;  %v8194_v54 = vpop.f32.mrb[168].mxu1 }
 0x549   : > { %v9715_v21 = vpop.eup %9714  ;;  %7213 = vst [vmem:[%s11987_s28 + $0x190] sm:$0xff] %v7967_v5  ;;  %9732 = vpow2.f32 %v6393_v7  ;;  %v6395_v20 = vmul.f32 1.442695, %v6263_v26  ;;  %v8366_v27 = vadd.f32 %v5990_v50, %v12227_v34  ;;  %v5992_v4 = vpop.f32.mrb[137].mxu0  ;;  %v6108_v5 = vadd.f32 %v12159_v62, %v12210_v59 }
 0x54a   : > { %v9717_v36 = vpop.eup %9716  ;;  %v7970_v37 = vpack.c.bf16 %v9715_v21, %v9711_v0  ;;  %9734 = vpow2.f32 %v6405_v10  ;;  %v6407_v14 = vmul.f32 1.442695, %v6269_v60  ;;  %v8195_v31 = vpop.f32.mrb[169].mxu1  ;;  %v6270_v18 = vsub.f32 0.0, %v6192_v8 }
 0x54b   : > { %v9719_v45 = vpop.eup %9718  ;;  %v7971_v12 = vpack.c.bf16 %v9717_v36, %v9713_v19  ;;  %9736 = vpow2.f32 %v6395_v20  ;;  %v8367_v23 = vadd.f32 %v5992_v4, %v12232_v15  ;;  %v5994_v30 = vpop.f32.mrb[138].mxu0  ;;  %v6275_v2 = vsub.f32 0.0, %v8366_v27 }
 0x54c   : > { %v9721_v40 = vpop.eup %9720  ;;  %7216 = vst [vmem:[%s11987_s28 + $0x1a4] sm:$0xff] %v7970_v37  ;;  %v6583_v47 = vadd.f32 1.0, %v9719_v45  ;;  %v8197_v61 = vpop.f32.mrb[170].mxu1  ;;  %9738 = vpow2.f32 %v6407_v14  ;;  %v8196_v22 = vadd.f32 %v8195_v31, %v8194_v54  ;;  %v6409_v16 = vmul.f32 1.442695, %v6270_v18 }
 0x54d   : > { %v9723_v1 = vpop.eup %9722  ;;  %7217 = vst [vmem:[%s11987_s28 + $0x1ac] sm:$0xff] %v7971_v12  ;;  %v6584_v41 = vadd.f32 1.0, %v9721_v40  ;;  %v5996_v35 = vpop.f32.mrb[139].mxu0  ;;  %v6276_v56 = vsub.f32 0.0, %v8367_v23  ;;  %v6419_v24 = vmul.f32 1.442695, %v6275_v2  ;;  %v8368_v33 = vadd.f32 %v5994_v30, %v12227_v34 }
 0x54e   : > { %v8198_v49 = vpop.f32.mrb[171].mxu1  ;;  %v9725_v63 = vpop.eup %9724  ;;  %9740 = vrcp.f32 %v6583_v47  ;;  %v6590_v51 = vadd.f32 1.0, %v9723_v1  ;;  %v6197_v42 = vadd.f32 %v8196_v22, %v6100_v39  ;;  %v6103_v0 = vadd.f32 %v12155_v38, %v12210_v59 }
 0x54f   : > { %v9727_v29 = vpop.eup %9726  ;;  %9742 = vrcp.f32 %v6584_v41  ;;  %v6585_v44 = vadd.f32 1.0, %v9725_v63  ;;  %v8199_v6 = vadd.f32 %v8198_v49, %v8197_v61  ;;  %v8369_v17 = vadd.f32 %v5996_v35, %v12232_v15  ;;  %v6000_v11 = vpop.f32.mrb[140].mxu0 }
 0x550   : > { %9744 = vrcp.f32 %v6590_v51  ;;  %v6591_v28 = vadd.f32 1.0, %v9727_v29  ;;  %v6277_v3 = vsub.f32 0.0, %v6197_v42  ;;  %v8200_v13 = vpop.f32.mrb[172].mxu1  ;;  %v12268_v7 = vadd.f32 %v12164_v53, %v12210_v59  ;;  %v6002_v21 = vpop.f32.mrb[141].mxu0 }
 0x551   : > { %9746 = vrcp.f32 %v6585_v44  ;;  %v9729_v57 = vpop.eup %9728  ;;  %v6421_v9 = vmul.f32 1.442695, %v6276_v56  ;;  %v8201_v39 = vpop.f32.mrb[173].mxu1  ;;  %v6282_v62 = vsub.f32 0.0, %v8368_v33  ;;  %v6200_v60 = vadd.f32 %v8199_v6, %v6103_v0 }
 0x552   : > { %9748 = vrcp.f32 %v6591_v28  ;;  %v9731_v19 = vpop.eup %9730  ;;  %v6592_v26 = vadd.f32 1.0, %v9729_v57  ;;  %v6004_v36 = vpop.f32.mrb[142].mxu0  ;;  %v6423_v50 = vmul.f32 1.442695, %v6277_v3  ;;  %v8370_v53 = vadd.f32 %v6000_v11, %v12227_v34 }
 0x553   : > { %9750 = vpow2.f32 %v6409_v16  ;;  %v9733_v38 = vpop.eup %9732  ;;  %v6597_v10 = vadd.f32 1.0, %v9731_v19  ;;  %v8203_v37 = vpop.f32.mrb[174].mxu1  ;;  %v6283_v27 = vsub.f32 0.0, %v8369_v17  ;;  %v8371_v4 = vadd.f32 %v6002_v21, %v12232_v15 }
 0x554   : > { %9752 = vpow2.f32 %v6419_v24  ;;  %v9735_v20 = vpop.eup %9734  ;;  %v6598_v8 = vadd.f32 1.0, %v9733_v38  ;;  %v6006_v54 = vpop.f32.mrb[143].mxu0  ;;  %v6284_v47 = vsub.f32 0.0, %v6200_v60  ;;  %v8202_v18 = vadd.f32 %v8201_v39, %v8200_v13 }
 0x555   : > { %9754 = vrcp.f32 %v6592_v26  ;;  %v8204_v45 = vpop.f32.mrb[175].mxu1  ;;  %v9737_v12 = vpop.eup %9736  ;;  %v6604_v14 = vadd.f32 1.0, %v9735_v20  ;;  %v6433_v61 = vmul.f32 1.442695, %v6282_v62  ;;  %v6289_v1 = vsub.f32 0.0, %v8370_v53 }
 0x556   : > { %9756 = vrcp.f32 %v6597_v10  ;;  %v9739_v31 = vpop.eup %9738  ;;  %v6599_v40 = vadd.f32 1.0, %v9737_v12  ;;  %v6290_v2 = vsub.f32 0.0, %v8371_v4  ;;  %v6205_v22 = vadd.f32 %v8202_v18, %v6108_v5 }
 0x557   : > { %9758 = vrcp.f32 %v6598_v8  ;;  %v6605_v30 = vadd.f32 1.0, %v9739_v31  ;;  %v8372_v35 = vadd.f32 %v6004_v36, %v12227_v34  ;;  %v6435_v51 = vmul.f32 1.442695, %v6283_v27  ;;  %v6010_v29 = vpop.f32.mrb[144].mxu0  ;;  %v8206_v44 = vpop.f32.mrb[176].mxu1 }
 0x558   : > { %v9741_v23 = vpop.eup %9740  ;;  %9760 = vrcp.f32 %v6604_v14  ;;  %v8373_v16 = vadd.f32 %v6006_v54, %v12232_v15  ;;  %v6437_v42 = vmul.f32 1.442695, %v6284_v47  ;;  %v6291_v28 = vsub.f32 0.0, %v6205_v22  ;;  %v6012_v33 = vpop.f32.mrb[145].mxu0 }
 0x559   : > { %v9743_v41 = vpop.eup %9742  ;;  %9762 = vrcp.f32 %v6599_v40  ;;  %v8205_v24 = vadd.f32 %v8204_v45, %v8203_v37  ;;  %v8207_v3 = vpop.f32.mrb[177].mxu1  ;;  %v6116_v57 = vadd.f32 %v12176_v48, %v12210_v59  ;;  %v6447_v5 = vmul.f32 1.442695, %v6289_v1 }
 0x55a   : > { %v9745_v49 = vpop.eup %9744  ;;  %v7912_v63 = vpack.c.bf16 %v9743_v41, %v9741_v23  ;;  %9764 = vrcp.f32 %v6605_v30  ;;  %v6014_v17 = vpop.f32.mrb[146].mxu0  ;;  %v6449_v26 = vmul.f32 1.442695, %v6290_v2  ;;  %v6297_v48 = vsub.f32 0.0, %v8373_v16 }
 0x55b   : > { %v9747_v56 = vpop.eup %9746  ;;  %9766 = vpow2.f32 %v6421_v9  ;;  %v8209_v11 = vpop.f32.mrb[178].mxu1  ;;  %v6296_v9 = vsub.f32 0.0, %v8372_v35  ;;  %v6208_v62 = vadd.f32 %v8205_v24, %v12268_v7  ;;  %v6451_v37 = vmul.f32 1.442695, %v6291_v28 }
 0x55c   : > { %v9749_v6 = vpop.eup %9748  ;;  %7157 = vst [vmem:[%s11987_s28 + $0x10] sm:$0xff] %v7912_v63  ;;  %v7913_v0 = vpack.c.bf16 %v9747_v56, %v9747_v56  ;;  %9768 = vpow2.f32 %v6423_v50  ;;  %v6016_v21 = vpop.f32.mrb[147].mxu0  ;;  %v8374_v20 = vadd.f32 %v6010_v29, %v12227_v34  ;;  %v8208_v54 = vadd.f32 %v8207_v3, %v8206_v44 }
 0x55d   : > { %v9751_v13 = vpop.eup %9750  ;;  %v7916_v19 = vpack.c.bf16 %v9749_v6, %v9745_v49  ;;  %9770 = vpow2.f32 %v6433_v61  ;;  %v8210_v39 = vpop.f32.mrb[179].mxu1  ;;  %v6298_v53 = vsub.f32 0.0, %v6208_v62  ;;  %v6461_v12 = vmul.f32 1.442695, %v6296_v9 }
 0x55e   : > { %v9753_v38 = vpop.eup %9752  ;;  %7159 = vst.msk [vmem:[%s11987_s28 + $0x18] sm:$0xf] %vm7158_vm1, %v7913_v0  ;;  %v6606_v10 = vadd.f32 1.0, %v9751_v13  ;;  %9772 = vpow2.f32 %v6435_v51  ;;  %v8375_v14 = vadd.f32 %v6012_v33, %v12232_v15  ;;  %v6463_v4 = vmul.f32 1.442695, %v6297_v48 }
 0x55f   : > { %v9755_v60 = vpop.eup %9754  ;;  %7162 = vst [vmem:[%s11987_s28 + $0x2c] sm:$0xff] %v7916_v19  ;;  %v6611_v36 = vadd.f32 1.0, %v9753_v38  ;;  %9774 = vpow2.f32 %v6437_v42  ;;  %v12285_v31 = vadd.f32 %v8208_v54, %v6116_v57  ;;  %v6020_v40 = vpop.f32.mrb[148].mxu0  ;;  %v6119_v23 = vadd.f32 %v12180_v25, %v12210_v59 }
 0x560   : > { %v9757_v8 = vpop.eup %9756  ;;  %v7917_v50 = vpack.c.bf16 %v9755_v60, %v9755_v60  ;;  %9776 = vrcp.f32 %v6606_v10  ;;  %v8212_v47 = vpop.f32.mrb[180].mxu1  ;;  %v6465_v30 = vmul.f32 1.442695, %v6298_v53  ;;  %v6303_v61 = vsub.f32 0.0, %v8374_v20 }
 0x561   : > { %v9759_v45 = vpop.eup %9758  ;;  %9778 = vrcp.f32 %v6611_v36  ;;  %v12289_v1 = vpop.f32.mrb[149].mxu0  ;;  %v8376_v35 = vadd.f32 %v6014_v17, %v12227_v34  ;;  %v8211_v49 = vadd.f32 %v8210_v39, %v8209_v11  ;;  %v6304_v29 = vsub.f32 0.0, %v8375_v14 }
 0x562   : > { %v9761_v27 = vpop.eup %9760  ;;  %7163 = vst.msk [vmem:[%s11987_s28 + $0x34] sm:$0xf] %vm7158_vm1, %v7917_v50  ;;  %v7920_v7 = vpack.c.bf16 %v9759_v45, %v9757_v8  ;;  %9780 = vpow2.f32 %v6447_v5  ;;  %v8213_v41 = vpop.f32.mrb[181].mxu1  ;;  %v8377_v24 = vadd.f32 %v6016_v21, %v12232_v15  ;;  %v6124_v6 = vadd.f32 %v12191_v58, %v12210_v59 }
 0x563   : > { %v9763_v18 = vpop.eup %9762  ;;  %9782 = vpow2.f32 %v6449_v26  ;;  %v12293_v63 = vpop.f32.mrb[150].mxu0  ;;  %v12300_v33 = vadd.f32 %v8211_v49, %v6119_v23  ;;  %v6475_v17 = vmul.f32 1.442695, %v6303_v61  ;;  %v6310_v11 = vsub.f32 0.0, %v8376_v35 }
 0x564   : > { %v9765_v2 = vpop.eup %9764  ;;  %7166 = vst [vmem:[%s11987_s28 + $0x48] sm:$0xff] %v7920_v7  ;;  %v7921_v22 = vpack.c.bf16 %v9763_v18, %v9763_v18  ;;  %9784 = vpow2.f32 %v6451_v37  ;;  %v8215_v51 = vpop.f32.mrb[182].mxu1  ;;  %v6305_v26 = vsub.f32 0.0, %v12285_v31  ;;  %v8214_v9 = vadd.f32 %v8213_v41, %v8212_v47 }
 0x565   : > { %v9767_v16 = vpop.eup %9766  ;;  %v7924_v25 = vpack.c.bf16 %v9765_v2, %v9761_v27  ;;  %9786 = vpow2.f32 %v6461_v12  ;;  %v12295_v44 = vpop.f32.mrb[151].mxu0  ;;  %v6477_v38 = vmul.f32 1.442695, %v6304_v29  ;;  %v6311_v10 = vsub.f32 0.0, %v8377_v24 }
 0x566   : > { %v8216_v56 = vpop.f32.mrb[183].mxu1  ;;  %v9769_v42 = vpop.eup %9768  ;;  %7167 = vst.msk [vmem:[%s11987_s28 + $0x50] sm:$0xf] %vm7158_vm1, %v7921_v22  ;;  %v6612_v28 = vadd.f32 1.0, %v9767_v16  ;;  %9788 = vpow2.f32 %v6463_v4  ;;  %v12308_v36 = vadd.f32 %v8214_v9, %v6124_v6  ;;  %v6127_v50 = vadd.f32 %v12198_v43, %v12210_v59 }
 0x567   : > { %v9771_v3 = vpop.eup %9770  ;;  %7170 = vst [vmem:[%s11987_s28 + $0x64] sm:$0xff] %v7924_v25  ;;  %v6613_v57 = vadd.f32 1.0, %v9769_v42  ;;  %9790 = vpow2.f32 %v6465_v30  ;;  %v6030_v58 = vpop.f32.mrb[152].mxu0  ;;  %v12314_v53 = vmul.f32 1.442695, %v6310_v11  ;;  %v8378_v54 = vadd.f32 %v6020_v40, %v12227_v34 }
 0x568   : > { %v9773_v0 = vpop.eup %9772  ;;  %9792 = vrcp.f32 %v6612_v28  ;;  %v6618_v5 = vadd.f32 1.0, %v9771_v3  ;;  %v8218_v48 = vpop.f32.mrb[184].mxu1  ;;  %v6479_v7 = vmul.f32 1.442695, %v6305_v26  ;;  %v8217_v4 = vadd.f32 %v8216_v56, %v8215_v51 }
 0x569   : > { %v9775_v13 = vpop.eup %9774  ;;  %9794 = vrcp.f32 %v6613_v57  ;;  %v6619_v19 = vadd.f32 1.0, %v9773_v0  ;;  %v12310_v37 = vpop.f32.mrb[153].mxu0  ;;  %v6491_v18 = vmul.f32 1.442695, %v6311_v10  ;;  %v8379_v40 = vadd.f32 %v12289_v1, %v12232_v15 }
 0x56a   : > { %v9777_v21 = vpop.eup %9776  ;;  %9796 = vrcp.f32 %v6618_v5  ;;  %v6620_v39 = vadd.f32 1.0, %v9775_v13  ;;  %v8219_v20 = vpop.f32.mrb[185].mxu1  ;;  %v8380_v61 = vadd.f32 %v12293_v63, %v12227_v34  ;;  %v12329_v41 = vadd.f32 %v8217_v4, %v6127_v50 }
 0x56b   : > { %v12306_v62 = vpop.eup %9778  ;;  %v7925_v60 = vpack.c.bf16 %v9777_v21, %v9777_v21  ;;  %9798 = vrcp.f32 %v6619_v19  ;;  %v6034_v45 = vpop.f32.mrb[154].mxu0  ;;  %v6312_v35 = vsub.f32 0.0, %v12300_v33  ;;  %v6317_v49 = vsub.f32 0.0, %v8378_v54 }
 0x56c   : > { %v9781_v8 = vpop.eup %9780  ;;  %9800 = vrcp.f32 %v6620_v39  ;;  %v12317_v12 = vpop.f32.mrb[186].mxu1  ;;  %v8381_v1 = vadd.f32 %v12295_v44, %v12232_v15  ;;  %v12335_v25 = vadd.f32 %v6030_v58, %v12227_v34  ;;  %v6318_v56 = vsub.f32 0.0, %v8379_v40 }
 0x56d   : > { %v9783_v14 = vpop.eup %9782  ;;  %7171 = vst.msk [vmem:[%s11987_s28 + $0x6c] sm:$0xf] %vm7158_vm1, %v7925_v60  ;;  %v6625_v27 = vadd.f32 1.0, %v9781_v8  ;;  %9802 = vpow2.f32 %v6475_v17  ;;  %v12321_v31 = vpop.f32.mrb[155].mxu0  ;;  %v8220_v42 = vadd.f32 %v8219_v20, %v8218_v48  ;;  %v6319_v6 = vsub.f32 0.0, %v12308_v36 }
 0x56e   : > { %v12323_v47 = vpop.f32.mrb[187].mxu1  ;;  %v9785_v43 = vpop.eup %9784  ;;  %v6626_v59 = vadd.f32 1.0, %v9783_v14  ;;  %9804 = vpow2.f32 %v6477_v38  ;;  %v6324_v57 = vsub.f32 0.0, %v8380_v61  ;;  %v6493_v11 = vmul.f32 1.442695, %v6312_v35 }
 0x56f   : > { %v9787_v23 = vpop.eup %9786  ;;  %9806 = vrcp.f32 %v6625_v27  ;;  %v6627_v30 = vadd.f32 1.0, %v9785_v43  ;;  %v6040_v28 = vpop.f32.mrb[156].mxu0  ;;  %v12342_v13 = vadd.f32 %v8220_v42, %v12213_v46  ;;  %v6503_v21 = vmul.f32 1.442695, %v6317_v49 }
 0x570   : > { %v9789_v2 = vpop.eup %9788  ;;  %9808 = vrcp.f32 %v6626_v59  ;;  %v6632_v22 = vadd.f32 1.0, %v9787_v23  ;;  %v8224_v24 = vpop.f32.mrb[188].mxu1  ;;  %v6325_v39 = vsub.f32 0.0, %v8381_v1  ;;  %v12348_v38 = vadd.f32 %v6034_v45, %v12227_v34 }
 0x571   : > { %v9791_v51 = vpop.eup %9790  ;;  %9810 = vrcp.f32 %v6627_v30  ;;  %v6633_v16 = vadd.f32 1.0, %v9789_v2  ;;  %v12339_v0 = vpop.f32.mrb[157].mxu0  ;;  %v6507_v20 = vmul.f32 1.442695, %v6319_v6  ;;  %v6517_v8 = vmul.f32 1.442695, %v6324_v57 }
 0x572   : > { %v9793_v29 = vpop.eup %9792  ;;  %9812 = vrcp.f32 %v6632_v22  ;;  %v6634_v63 = vadd.f32 1.0, %v9791_v51  ;;  %v8225_v44 = vpop.f32.mrb[189].mxu1  ;;  %v6326_v45 = vsub.f32 0.0, %v12329_v41  ;;  %v8223_v14 = vadd.f32 %v12323_v47, %v12317_v12 }
 0x573   : > { %v9795_v3 = vpop.eup %9794  ;;  %v7928_v33 = vpack.c.bf16 %v9793_v29, %v12306_v62  ;;  %9814 = vrcp.f32 %v6633_v16  ;;  %v6044_v19 = vpop.f32.mrb[158].mxu0  ;;  %v6505_v62 = vmul.f32 1.442695, %v6318_v56  ;;  %v6331_v4 = vsub.f32 0.0, %v12335_v25 }
 0x574   : > { %v9797_v5 = vpop.eup %9796  ;;  %v7929_v17 = vpack.c.bf16 %v9795_v3, %v9795_v3  ;;  %9816 = vrcp.f32 %v6634_v63  ;;  %v12344_v26 = vpop.f32.mrb[190].mxu1  ;;  %v8383_v59 = vadd.f32 %v12310_v37, %v12232_v15  ;;  %v12368_v40 = vadd.f32 %v6040_v28, %v12227_v34 }
 0x575   : > { %v9799_v9 = vpop.eup %9798  ;;  %7174 = vst [vmem:[%s11987_s28 + $0x80] sm:$0xff] %v7928_v33  ;;  %9818 = vpow2.f32 %v6479_v7  ;;  %v12350_v10 = vpop.f32.mrb[159].mxu0  ;;  %v8226_v23 = vadd.f32 %v8225_v44, %v8224_v24  ;;  %v12371_v30 = vadd.f32 %v6044_v19, %v12227_v34  ;;  %v6521_v2 = vmul.f32 1.442695, %v6326_v45 }
 0x576   : > { %v8228_v58 = vpop.f32.mrb[191].mxu1  ;;  %v9801_v48 = vpop.eup %9800  ;;  %7175 = vst.msk [vmem:[%s11987_s28 + $0x88] sm:$0xf] %vm7158_vm1, %v7929_v17  ;;  %v7932_v46 = vpack.c.bf16 %v9799_v9, %v9797_v5  ;;  %9820 = vpow2.f32 %v12314_v53  ;;  %v6519_v53 = vmul.f32 1.442695, %v6325_v39  ;;  %v6332_v16 = vsub.f32 0.0, %v8383_v59 }
 0x577   : > { %v9803_v60 = vpop.eup %9802  ;;  %v7933_v36 = vpack.c.bf16 %v9801_v48, %v9801_v48  ;;  %9822 = vpow2.f32 %v6491_v18  ;;  %v12365_v18 = vadd.f32 %v8223_v14, %v12218_v55  ;;  %v6531_v55 = vmul.f32 1.442695, %v6331_v4 }
 0x578   : > { %v9805_v50 = vpop.eup %9804  ;;  %7178 = vst [vmem:[%s11987_s28 + $0x9c] sm:$0xff] %v7932_v46  ;;  %v6639_v54 = vadd.f32 1.0, %v9803_v60  ;;  %9824 = vpow2.f32 %v6493_v11  ;;  %v12375_v22 = vadd.f32 %v8226_v23, %v12225_v52  ;;  %v6333_v29 = vsub.f32 0.0, %v12342_v13 }
 0x579   : > { %v9807_v27 = vpop.eup %9806  ;;  %7179 = vst.msk [vmem:[%s11987_s28 + $0xa4] sm:$0xf] %vm7158_vm1, %v7933_v36  ;;  %v6640_v7 = vadd.f32 1.0, %v9805_v50  ;;  %9826 = vpow2.f32 %v6503_v21  ;;  %v8229_v56 = vadd.f32 %v8228_v58, %v12344_v26  ;;  %v6533_v33 = vmul.f32 1.442695, %v6332_v16 }
 0x57a   : > { %v9809_v43 = vpop.eup %9808  ;;  %9828 = vrcp.f32 %v6639_v54  ;;  %v6535_v5 = vmul.f32 1.442695, %v6333_v29  ;;  %v8385_v17 = vadd.f32 %v12321_v31, %v12232_v15  ;;  %v6338_v21 = vsub.f32 0.0, %v12348_v38 }
 0x57b   : > { %v9811_v12 = vpop.eup %9810  ;;  %v7936_v47 = vpack.c.bf16 %v9809_v43, %v9807_v27  ;;  %9830 = vrcp.f32 %v6640_v7  ;;  %v12385_v6 = vadd.f32 %v8229_v56, %v12230_v32  ;;  %v8387_v32 = vadd.f32 %v12339_v0, %v12232_v15 }
 0x57c   : > { %v9813_v61 = vpop.eup %9812  ;;  %v7937_v41 = vpack.c.bf16 %v9811_v12, %v9811_v12  ;;  %9832 = vpow2.f32 %v6505_v62  ;;  %v6339_v48 = vsub.f32 0.0, %v8385_v17  ;;  %v6340_v62 = vsub.f32 0.0, %v12365_v18 }
 0x57d   : > { %v9815_v37 = vpop.eup %9814  ;;  %7182 = vst [vmem:[%s11987_s28 + $0xb8] sm:$0xff] %v7936_v47  ;;  %9834 = vpow2.f32 %v6507_v20  ;;  %v6345_v20 = vsub.f32 0.0, %v12368_v40  ;;  %v6545_v50 = vmul.f32 1.442695, %v6338_v21  ;;  %v6346_v0 = vsub.f32 0.0, %v8387_v32 }
 0x57e   : > { %v9817_v35 = vpop.eup %9816  ;;  %7183 = vst.msk [vmem:[%s11987_s28 + $0xc0] sm:$0xf] %vm7158_vm1, %v7937_v41  ;;  %v7940_v49 = vpack.c.bf16 %v9815_v37, %v9813_v61  ;;  %9836 = vpow2.f32 %v6517_v8  ;;  %v6547_v14 = vmul.f32 1.442695, %v6339_v48  ;;  %v8389_v27 = vadd.f32 %v12350_v10, %v12232_v15 }
 0x57f   : > { %v9819_v34 = vpop.eup %9818  ;;  %v7941_v51 = vpack.c.bf16 %v9817_v35, %v9817_v35  ;;  %9838 = vpow2.f32 %v6519_v53  ;;  %v6549_v4 = vmul.f32 1.442695, %v6340_v62  ;;  %v6559_v59 = vmul.f32 1.442695, %v6345_v20 }
 0x580   : > { %v9821_v1 = vpop.eup %9820  ;;  %7186 = vst [vmem:[%s11987_s28 + $0xd4] sm:$0xff] %v7940_v49  ;;  %v6641_v25 = vadd.f32 1.0, %v9819_v34  ;;  %9840 = vpow2.f32 %v6521_v2  ;;  %v6347_v18 = vsub.f32 0.0, %v12375_v22  ;;  %v6561_v47 = vmul.f32 1.442695, %v6346_v0 }
 0x581   : > { %v9823_v63 = vpop.eup %9822  ;;  %7187 = vst.msk [vmem:[%s11987_s28 + $0xdc] sm:$0xf] %vm7158_vm1, %v7941_v51  ;;  %v6646_v52 = vadd.f32 1.0, %v9821_v1  ;;  %9842 = vpow2.f32 %v6531_v55  ;;  %v6352_v23 = vsub.f32 0.0, %v12371_v30  ;;  %v6353_v61 = vsub.f32 0.0, %v8389_v27 }
 0x582   : > { %v9825_v42 = vpop.eup %9824  ;;  %9844 = vrcp.f32 %v6641_v25  ;;  %v6647_v28 = vadd.f32 1.0, %v9823_v63  ;;  %v6354_v2 = vsub.f32 0.0, %v12385_v6  ;;  %v6563_v22 = vmul.f32 1.442695, %v6347_v18 }
 0x583   : > { %v9827_v24 = vpop.eup %9826  ;;  %9846 = vrcp.f32 %v6646_v52  ;;  %v6648_v3 = vadd.f32 1.0, %v9825_v42  ;;  %v6573_v30 = vmul.f32 1.442695, %v6352_v23  ;;  %v6575_v16 = vmul.f32 1.442695, %v6353_v61 }
 0x584   : > { %v9829_v57 = vpop.eup %9828  ;;  %9848 = vrcp.f32 %v6647_v28  ;;  %v6653_v44 = vadd.f32 1.0, %v9827_v24  ;;  %v6577_v29 = vmul.f32 1.442695, %v6354_v2 }
 0x585   : > { %v9831_v11 = vpop.eup %9830  ;;  %9850 = vrcp.f32 %v6648_v3 }
 0x586   : > { %v9833_v13 = vpop.eup %9832  ;;  %v7944_v19 = vpack.c.bf16 %v9831_v11, %v9829_v57  ;;  %9852 = vrcp.f32 %v6653_v44 }
 0x587   : > { %v9835_v26 = vpop.eup %9834  ;;  %v6654_v9 = vadd.f32 1.0, %v9833_v13  ;;  %9854 = vpow2.f32 %v6533_v33 }
 0x588   : > { %v9837_v39 = vpop.eup %9836  ;;  %7190 = vst [vmem:[%s11987_s28 + $0xf0] sm:$0xff] %v7944_v19  ;;  %v6655_v58 = vadd.f32 1.0, %v9835_v26  ;;  %9856 = vpow2.f32 %v6535_v5 }
 0x589   : > { %v9839_v46 = vpop.eup %9838  ;;  %9858 = vrcp.f32 %v6654_v9  ;;  %v6660_v31 = vadd.f32 1.0, %v9837_v39 }
 0x58a   : > { %v9841_v60 = vpop.eup %9840  ;;  %9860 = vrcp.f32 %v6655_v58  ;;  %v6661_v36 = vadd.f32 1.0, %v9839_v46 }
 0x58b   : > { %v9843_v8 = vpop.eup %9842  ;;  %9862 = vrcp.f32 %v6660_v31  ;;  %v6662_v38 = vadd.f32 1.0, %v9841_v60 }
 0x58c   : > { %v9845_v54 = vpop.eup %9844  ;;  %9864 = vrcp.f32 %v6661_v36  ;;  %v6667_v45 = vadd.f32 1.0, %v9843_v8 }
 0x58d   : > { %v9847_v7 = vpop.eup %9846  ;;  %v7945_v53 = vpack.c.bf16 %v9845_v54, %v9845_v54  ;;  %9866 = vrcp.f32 %v6662_v38 }
 0x58e   : > { %v9849_v43 = vpop.eup %9848  ;;  %9868 = vrcp.f32 %v6667_v45 }
 0x58f   : > { %v9851_v40 = vpop.eup %9850  ;;  %7191 = vst.msk [vmem:[%s11987_s28 + $0xf8] sm:$0xf] %vm7158_vm1, %v7945_v53  ;;  %v7948_v12 = vpack.c.bf16 %v9849_v43, %v9847_v7  ;;  %9870 = vpow2.f32 %v6545_v50 }
 0x590   : > { %v9853_v15 = vpop.eup %9852  ;;  %v7949_v10 = vpack.c.bf16 %v9851_v40, %v9851_v40  ;;  %9872 = vpow2.f32 %v6547_v14 }
 0x591   : > { %v9855_v41 = vpop.eup %9854  ;;  %7194 = vst [vmem:[%s11987_s28 + $0x10c] sm:$0xff] %v7948_v12  ;;  %9874 = vpow2.f32 %v6549_v4 }
 0x592   : > { %v9857_v37 = vpop.eup %9856  ;;  %7195 = vst.msk [vmem:[%s11987_s28 + $0x114] sm:$0xf] %vm7158_vm1, %v7949_v10  ;;  %v6668_v55 = vadd.f32 1.0, %v9855_v41  ;;  %9876 = vpow2.f32 %v6559_v59 }
 0x593   : > { %v9859_v35 = vpop.eup %9858  ;;  %v6669_v49 = vadd.f32 1.0, %v9857_v37  ;;  %9878 = vpow2.f32 %v6561_v47 }
 0x594   : > { %v9861_v34 = vpop.eup %9860  ;;  %v7952_v51 = vpack.c.bf16 %v9859_v35, %v9853_v15  ;;  %9880 = vrcp.f32 %v6668_v55 }
 0x595   : > { %v9863_v1 = vpop.eup %9862  ;;  %v7953_v25 = vpack.c.bf16 %v9861_v34, %v9861_v34  ;;  %9882 = vrcp.f32 %v6669_v49 }
 0x596   : > { %v9865_v63 = vpop.eup %9864  ;;  %7198 = vst [vmem:[%s11987_s28 + $0x128] sm:$0xff] %v7952_v51  ;;  %9884 = vpow2.f32 %v6563_v22 }
 0x597   : > { %v9867_v52 = vpop.eup %9866  ;;  %7199 = vst.msk [vmem:[%s11987_s28 + $0x130] sm:$0xf] %vm7158_vm1, %v7953_v25  ;;  %v7956_v56 = vpack.c.bf16 %v9865_v63, %v9863_v1  ;;  %9886 = vpow2.f32 %v6573_v30 }
 0x598   : > { %v9869_v42 = vpop.eup %9868  ;;  %v7957_v28 = vpack.c.bf16 %v9867_v52, %v9867_v52  ;;  %9888 = vpow2.f32 %v6575_v16 }
 0x599   : > { %v9871_v24 = vpop.eup %9870  ;;  %7202 = vst [vmem:[%s11987_s28 + $0x144] sm:$0xff] %v7956_v56  ;;  %9890 = vpow2.f32 %v6577_v29 }
 0x59a   : > { %v9873_v3 = vpop.eup %9872  ;;  %7203 = vst.msk [vmem:[%s11987_s28 + $0x14c] sm:$0xf] %vm7158_vm1, %v7957_v28  ;;  %v6674_v33 = vadd.f32 1.0, %v9871_v24 }
 0x59b   : > { %v9875_v6 = vpop.eup %9874  ;;  %v6675_v57 = vadd.f32 1.0, %v9873_v3 }
 0x59c   : > { %v9877_v44 = vpop.eup %9876  ;;  %9892 = vrcp.f32 %v6674_v33  ;;  %v6676_v5 = vadd.f32 1.0, %v9875_v6 }
 0x59d   : > { %v9879_v17 = vpop.eup %9878  ;;  %9894 = vrcp.f32 %v6675_v57  ;;  %v6681_v11 = vadd.f32 1.0, %v9877_v44 }
 0x59e   : > { %v9881_v13 = vpop.eup %9880  ;;  %9896 = vrcp.f32 %v6676_v5  ;;  %v6682_v19 = vadd.f32 1.0, %v9879_v17 }
 0x59f   : > { %v9883_v26 = vpop.eup %9882  ;;  %v7960_v9 = vpack.c.bf16 %v9881_v13, %v9869_v42  ;;  %9898 = vrcp.f32 %v6681_v11 }
 0x5a0   : > { %v9885_v21 = vpop.eup %9884  ;;  %v7961_v32 = vpack.c.bf16 %v9883_v26, %v9883_v26  ;;  %9900 = vrcp.f32 %v6682_v19 }
 0x5a1   : > { %v9887_v39 = vpop.eup %9886  ;;  %7206 = vst [vmem:[%s11987_s28 + $0x160] sm:$0xff] %v7960_v9  ;;  %v6683_v58 = vadd.f32 1.0, %v9885_v21 }
 0x5a2   : > { %v9889_v48 = vpop.eup %9888  ;;  %7207 = vst.msk [vmem:[%s11987_s28 + $0x168] sm:$0xf] %vm7158_vm1, %v7961_v32  ;;  %v6688_v46 = vadd.f32 1.0, %v9887_v39 }
 0x5a3   : > { %v9891_v31 = vpop.eup %9890  ;;  %9902 = vrcp.f32 %v6683_v58  ;;  %v6689_v62 = vadd.f32 1.0, %v9889_v48 }
 0x5a4   : > { %9904 = vrcp.f32 %v6688_v46  ;;  %v6690_v60 = vadd.f32 1.0, %v9891_v31 }
 0x5a5   : > { %9906 = vrcp.f32 %v6689_v62 }
 0x5a6   : > { %v9893_v36 = vpop.eup %9892  ;;  %9908 = vrcp.f32 %v6690_v60 }
 0x5a7   : > { %v9895_v20 = vpop.eup %9894 }
 0x5a8   : > { %v9897_v8 = vpop.eup %9896  ;;  %v7964_v38 = vpack.c.bf16 %v9895_v20, %v9893_v36 }
 0x5a9   : > { %v9899_v50 = vpop.eup %9898  ;;  %v7965_v0 = vpack.c.bf16 %v9897_v8, %v9897_v8 }
 0x5aa   : > { %v9901_v54 = vpop.eup %9900  ;;  %7210 = vst [vmem:[%s11987_s28 + $0x17c] sm:$0xff] %v7964_v38 }
 0x5ab   : > { %7211 = vst.msk [vmem:[%s11987_s28 + $0x184] sm:$0xf] %vm7158_vm1, %v7965_v0  ;;  %v7968_v45 = vpack.c.bf16 %v9901_v54, %v9899_v50 }
 0x5ad   : > { %v9903_v14 = vpop.eup %9902  ;;  %7214 = vst [vmem:[%s11987_s28 + $0x198] sm:$0xff] %v7968_v45 }
 0x5ae   : > { %v9905_v27 = vpop.eup %9904  ;;  %v7969_v7 = vpack.c.bf16 %v9903_v14, %v9903_v14 }
 0x5af   : > { %v9907_v53 = vpop.eup %9906 }
 0x5b0   : > { %v9909_v4 = vpop.eup %9908  ;;  %7215 = vst.msk [vmem:[%s11987_s28 + $0x1a0] sm:$0xf] %vm7158_vm1, %v7969_v7  ;;  %v7972_v43 = vpack.c.bf16 %v9907_v53, %v9905_v27 }
 0x5b1   : > { %v7973_v59 = vpack.c.bf16 %v9909_v4, %v9909_v4 }
 0x5b2   : > { %7218 = vst [vmem:[%s11987_s28 + $0x1b4] sm:$0xff] %v7972_v43 }
 0x5b3   : > { %7219 = vst.msk [vmem:[%s11987_s28 + $0x1bc] sm:$0xf] %vm7158_vm1, %v7973_v59 }
 0x5b4 PF: > { %s19_s30 = sadd.s32 1, %s9917_s30  }
 0x5b5   : > { %p16_p4 = scmp.ge.s32.totalorder %s19_s30, 4  }
 0x5b7   :  { %18 = sbr.rel (!%p16_p4) target bundleno = 1 (0x1), region = 86 }

</bundles_post_ra>
